<compile_context>
chip_gen: v5e
topology: v5e:2x2
jax: 0.10.0
libtpu: 0.0.40
codegen_flags: <defaults>
</compile_context>

<pallas_src>
import functools

import jax
import jax.numpy as jnp
import numpy as np
from jax import lax
from jax.experimental import pallas as pl
from jax.experimental.pallas import tpu as pltpu


# ------------------------------ fused Pallas kernel ------------------------------

def _repsr_fused_kernel(rs_ref, x_ref, wf_ref, bf_ref, wb_ref, bb_ref,
                        wl_ref, bl_ref, mask_ref, o_ref,
                        pbuf_ref, feat_ref, res_ref, *, H, W, num_block):
    # rs_ref   : (num_block,)      f32  SMEM (scalar prefetch) residual scales
    # x_ref    : (Cf, PBUF)        bf16 flattened zero-padded input image
    # wf/wl    : (9*Cout, Cf)      bf16 conv weights, rows ordered (ky, kx, cout)
    # bf/bl    : (Cout, 1)         f32
    # wb       : (2*nb, 9*Cf, Cf)  bf16 body conv weights;  bb: (2*nb, Cf, 1) f32
    # mask_ref : (1, H*Wp)         bf16 1 on valid columns, 0 on the 2 junk cols/row
    # o_ref    : (Cl, H*W)         f32  lane-dense conv_after_body output
    # pbuf_ref : (Cf, PBUF)        bf16 VMEM staging buffer (zero border preserved)
    # feat_ref : (Cf, H*Wp)        f32  conv_first activation
    # res_ref  : (Cf, H*Wp)        f32  running residual
    Wp = W + 2
    HWp = H * Wp
    mask = mask_ref[...]                                    # (1, HWp) bf16

    def conv(w, b, relu):
        # Patch-free 3x3 conv: 9 accumulating MXU matmuls over direct lane slices
        # of the flat padded buffer (no im2col buffer round-trip).
        cout = w.shape[0] // 9
        acc = None
        for t in range(9):
            ky, kx = divmod(t, 3)
            s = ky * Wp + kx
            d = jnp.dot(w[t * cout:(t + 1) * cout, :],      # (cout, Cf) sublane slice
                        pbuf_ref[:, s:s + HWp],             # (Cf, HWp)
                        preferred_element_type=jnp.float32)
            acc = d if acc is None else acc + d
        acc = acc + b                                       # f32 bias
        return jnp.maximum(acc, 0.0) if relu else acc

    def stage(act_f32):
        # Write an activation into the interior of the padded buffer.  The bf16
        # mask zeroes the 2 junk columns per row so the zero border is preserved.
        pbuf_ref[:, Wp + 1:Wp + 1 + HWp] = act_f32.astype(jnp.bfloat16) * mask

    pbuf_ref[...] = x_ref[...]                              # padded input (bf16)
    feat_ref[...] = conv(wf_ref[...], bf_ref[...], relu=True)   # x = relu(conv_first(x))
    res_ref[...] = feat_ref[...]

    # TODO(synk): RBRepSR class body is not in the provided source; implemented as the
    # deploy-time (re-parameterized) conv3x3 -> ReLU -> conv3x3, scaled by res_scale.
    def body(i, carry):                                     # res = body(x)
        stage(res_ref[...])
        mid = conv(wb_ref[2 * i], bb_ref[2 * i], relu=True)
        stage(mid)
        out = conv(wb_ref[2 * i + 1], bb_ref[2 * i + 1], relu=False)
        res_ref[...] = res_ref[...] + rs_ref[i] * out
        return carry

    lax.fori_loop(0, num_block, body, 0)

    stage(res_ref[...] + feat_ref[...])                     # res = res + x
    acc = conv(wl_ref[...], bl_ref[...], relu=False)        # conv_after_body, (Cl, HWp)

    # Fused junk-column drop: lane-dense per-row stores (no post-kernel wide slice).
    for h in range(H):
        o_ref[:, h * W:(h + 1) * W] = acc[:, h * Wp:h * Wp + W].astype(o_ref.dtype)


# ------------------------------- packing / wrapper --------------------------------

def _pack_w(w_hwio, cin_pad=None):
    """(3,3,Cin,Cout) f32 -> (9*Cout, Cin) bf16, rows ordered as (ky, kx, cout)."""
    kh, kw, cin, cout = w_hwio.shape
    if cin_pad is not None and cin_pad > cin:
        w_hwio = jnp.pad(w_hwio, ((0, 0), (0, 0), (0, cin_pad - cin), (0, 0)))
        cin = cin_pad
    w = jnp.transpose(w_hwio, (0, 1, 3, 2))                 # (ky, kx, cout, cin)
    return w.reshape(kh * kw * cout, cin).astype(jnp.bfloat16)


def _pixel_shuffle_nchw(y, r):
    # torch PixelShuffle: out[n, c, h*r+i, w*r+j] = y[n, c*r*r + i*r + j, h, w]
    N, C, H, W = y.shape
    noc = C // (r * r)
    y = y.reshape(N, noc, r, r, H, W)
    y = jnp.transpose(y, (0, 1, 4, 2, 5, 3))
    return y.reshape(N, noc, H * r, W * r)


def repsr_forward_fused(params, x_nchw, upscale):
    N, Cin, H, W = x_nchw.shape
    Cf = params["conv_first"][0].shape[-1]
    Hp, Wp = H + 2, W + 2
    HWp = H * Wp
    PBUF = Hp * Wp + 2            # +2 slop so the (ky=2,kx=2) tap slice stays in bounds
    num_block = len(params["body"])

    # pack the input once: zero-extend channels to Cf, zero-pad H/W, flatten, bf16
    xw = jnp.pad(x_nchw, ((0, 0), (0, Cf - Cin), (1, 1), (1, 1)))
    xw = xw.reshape(N, Cf, Hp * Wp)
    xw = jnp.pad(xw, ((0, 0), (0, 0), (0, PBUF - Hp * Wp))).astype(jnp.bfloat16)

    mask = jnp.asarray((np.arange(HWp) % Wp < W).astype(np.float32),
                       jnp.bfloat16).reshape(1, HWp)

    wf = _pack_w(params["conv_first"][0], cin_pad=Cf)                  # (9*Cf, Cf)
    bfst = params["conv_first"][1].reshape(Cf, 1).astype(jnp.float32)
    wb = jnp.stack([_pack_w(p[k]) for p in params["body"] for k in ("w1", "w2")])
    bb = jnp.stack([p[k].reshape(Cf, 1) for p in params["body"]
                    for k in ("b1", "b2")]).astype(jnp.float32)
    wl = _pack_w(params["conv_after_body"][0])                         # (9*Cl, Cf)
    Cl = wl.shape[0] // 9
    bl = params["conv_after_body"][1].reshape(Cl, 1).astype(jnp.float32)
    res_scales = jnp.asarray([p["res_scale"] for p in params["body"]], jnp.float32)

    kernel = functools.partial(_repsr_fused_kernel, H=H, W=W, num_block=num_block)

    # Advisory cost estimate so XLA schedules the surrounding pack / pixel-shuffle ops.
    n_feat_convs = 1 + 2 * num_block
    flops = N * 2 * 9 * Cf * HWp * (Cf * n_feat_convs + Cl)
    bytes_accessed = (N * Cf * PBUF * 2 + HWp * 2 + num_block * 4
                      + (9 * Cf * Cf + 2 * num_block * 9 * Cf * Cf + 9 * Cl * Cf) * 2
                      + (Cf + 2 * num_block * Cf + Cl) * 4
                      + N * Cl * H * W * 4)

    grid_spec = pltpu.PrefetchScalarGridSpec(
        num_scalar_prefetch=1,                       # res_scales -> SMEM
        grid=(N,),
        in_specs=[
            pl.BlockSpec((None, Cf, PBUF), lambda n, rs: (n, 0, 0)),          # x (per image)
            pl.BlockSpec((9 * Cf, Cf), lambda n, rs: (0, 0)),                 # conv_first w
            pl.BlockSpec((Cf, 1), lambda n, rs: (0, 0)),                      # conv_first b
            pl.BlockSpec((2 * num_block, 9 * Cf, Cf), lambda n, rs: (0, 0, 0)),  # body w
            pl.BlockSpec((2 * num_block, Cf, 1), lambda n, rs: (0, 0, 0)),       # body b
            pl.BlockSpec((9 * Cl, Cf), lambda n, rs: (0, 0)),                 # conv_after_body w
            pl.BlockSpec((Cl, 1), lambda n, rs: (0, 0)),                      # conv_after_body b
            pl.BlockSpec((1, HWp), lambda n, rs: (0, 0)),                     # column mask
        ],
        out_specs=pl.BlockSpec((None, Cl, H * W), lambda n, rs: (n, 0, 0)),
        scratch_shapes=[
            pltpu.VMEM((Cf, PBUF), jnp.bfloat16),    # zero-padded staging buffer
            pltpu.VMEM((Cf, HWp), jnp.float32),      # feat (conv_first activation)
            pltpu.VMEM((Cf, HWp), jnp.float32),      # running residual
        ],
    )

    y = pl.pallas_call(
        kernel,
        out_shape=jax.ShapeDtypeStruct((N, Cl, H * W), jnp.float32),
        grid_spec=grid_spec,
        compiler_params=pltpu.CompilerParams(
            dimension_semantics=("parallel",),       # N>=2 feeds both v7x TCs
            vmem_limit_bytes=48 * 1024 * 1024),
        cost_estimate=pl.CostEstimate(flops=flops, transcendentals=0,
                                      bytes_accessed=bytes_accessed),
    )(res_scales, xw, wf, bfst, wb, bb, wl, bl, mask)

    # lane-dense output: pure metadata reshape, then PixelShuffle(upscale)
    y = y.reshape(N, Cl, H, W)
    return _pixel_shuffle_nchw(y, upscale)


# ------------------------------- params & reference -------------------------------

def init_params(key, num_in_ch, num_feat, num_block, upscale, res_scale):
    def conv_init(k, cin, cout, scale=0.1):
        kw, kb = jax.random.split(k)
        w = scale * jax.random.normal(kw, (3, 3, cin, cout), jnp.float32)
        b = scale * jax.random.normal(kb, (cout,), jnp.float32)
        return w, b

    keys = jax.random.split(key, num_block + 2)
    params = {"conv_first": conv_init(keys[0], num_in_ch, num_feat), "body": []}
    for i in range(num_block):
        k1, k2 = jax.random.split(keys[1 + i])
        w1, b1 = conv_init(k1, num_feat, num_feat)
        w2, b2 = conv_init(k2, num_feat, num_feat)
        params["body"].append(dict(w1=w1, b1=b1, w2=w2, b2=b2,
                                   res_scale=float(res_scale)))
    # conv_after_body maps num_feat -> upscale**2 channels, exactly as in the spec
    # (the PyTorch code ignores num_out_ch here, i.e. single-channel SR output).
    params["conv_after_body"] = conv_init(keys[-1], num_feat, upscale ** 2)
    return params


def _conv3x3_ref(x, w, b, relu=False):
    # bf16-matched XLA reference (same rounding points as the kernel, f32 accumulation)
    y = jax.lax.conv_general_dilated(
        x.astype(jnp.bfloat16), w.astype(jnp.bfloat16),
        window_strides=(1, 1), padding=((1, 1), (1, 1)),
        dimension_numbers=("NCHW", "HWIO", "NCHW"),
        preferred_element_type=jnp.float32)
    y = y + b[None, :, None, None]
    return jnp.maximum(y, 0.0) if relu else y


def repsr_forward_ref(params, x_nchw, upscale):
    w, b = params["conv_first"]
    feat = _conv3x3_ref(x_nchw, w, b, relu=True)
    res = feat
    for p in params["body"]:
        out = _conv3x3_ref(res, p["w1"], p["b1"], relu=True)
        out = _conv3x3_ref(out, p["w2"], p["b2"], relu=False)
        res = res + p["res_scale"] * out
    res = res + feat
    w, b = params["conv_after_body"]
    y = _conv3x3_ref(res, w, b, relu=False)
    return _pixel_shuffle_nchw(y, upscale)


# ----------------------------------- main -----------------------------------------

if __name__ == "__main__":
    N, num_in_ch, H, W = 2, 3, 16, 16
    num_feat, num_block, upscale, res_scale = 16, 2, 4, 1.0

    key = jax.random.PRNGKey(0)
    k_x, k_p = jax.random.split(key)
    x_nchw = jax.random.normal(k_x, (N, num_in_ch, H, W), jnp.float32)
    params = init_params(k_p, num_in_ch, num_feat, num_block, upscale, res_scale)

    fused = jax.jit(lambda inp: repsr_forward_fused(params, inp, upscale))
    out = jax.block_until_ready(fused(x_nchw))
    assert out.shape == (N, 1, H * upscale, W * upscale), out.shape

    ref = jax.block_until_ready(repsr_forward_ref(params, x_nchw, upscale))
    np.testing.assert_allclose(np.asarray(out), np.asarray(ref),
                               rtol=5e-3, atol=5e-3)

    print("KERNEL_OK")
</pallas_src>

<mosaic_0001>
module attributes {stable_mosaic.version = 11 : i64} {
  func.func @_repsr_fused_kernel(%arg0: i32, %arg1: memref<2xf32, #tpu.memory_space<smem>>, %arg2: memref<1x16x326xbf16, #tpu.memory_space<vmem>>, %arg3: memref<144x16xbf16, #tpu.memory_space<vmem>>, %arg4: memref<16x1xf32, #tpu.memory_space<vmem>>, %arg5: memref<4x144x16xbf16, #tpu.memory_space<vmem>>, %arg6: memref<4x16x1xf32, #tpu.memory_space<vmem>>, %arg7: memref<144x16xbf16, #tpu.memory_space<vmem>>, %arg8: memref<16x1xf32, #tpu.memory_space<vmem>>, %arg9: memref<1x288xbf16, #tpu.memory_space<vmem>>, %arg10: memref<1x16x256xf32, #tpu.memory_space<vmem>>, %arg11: memref<16x326xbf16, #tpu.memory_space<vmem>>, %arg12: memref<16x288xf32, #tpu.memory_space<vmem>>, %arg13: memref<16x288xf32, #tpu.memory_space<vmem>>) attributes {dimension_semantics = [#tpu.dimension_semantics<parallel>], iteration_bounds = array<i64: 2>, scalar_prefetch = 1 : i64, scratch_operands = 3 : i64, tpu.core_type = #tpu.core_type<tc>, window_params = [{transform_indices = @transform_0, window_bounds = array<i64: 1, 16, 326>}, {pipeline_mode = #tpu.pipeline_mode<synchronous>, transform_indices = @transform_1, window_bounds = array<i64: 144, 16>}, {pipeline_mode = #tpu.pipeline_mode<synchronous>, transform_indices = @transform_2, window_bounds = array<i64: 16, 1>}, {pipeline_mode = #tpu.pipeline_mode<synchronous>, transform_indices = @transform_3, window_bounds = array<i64: 4, 144, 16>}, {pipeline_mode = #tpu.pipeline_mode<synchronous>, transform_indices = @transform_4, window_bounds = array<i64: 4, 16, 1>}, {pipeline_mode = #tpu.pipeline_mode<synchronous>, transform_indices = @transform_5, window_bounds = array<i64: 144, 16>}, {pipeline_mode = #tpu.pipeline_mode<synchronous>, transform_indices = @transform_6, window_bounds = array<i64: 16, 1>}, {pipeline_mode = #tpu.pipeline_mode<synchronous>, transform_indices = @transform_7, window_bounds = array<i64: 1, 288>}, {transform_indices = @transform_8, window_bounds = array<i64: 1, 16, 256>}]} {
    %c0 = arith.constant 0 : index
    %c0_0 = arith.constant 0 : index
    %0 = vector.load %arg9[%c0, %c0_0] : memref<1x288xbf16, #tpu.memory_space<vmem>>, vector<1x288xbf16>
    %c0_1 = arith.constant 0 : index
    %c0_2 = arith.constant 0 : index
    %c0_3 = arith.constant 0 : index
    %1 = vector.load %arg2[%c0_1, %c0_2, %c0_3] : memref<1x16x326xbf16, #tpu.memory_space<vmem>>, vector<1x16x326xbf16>
    %2 = vector.shape_cast %1 : vector<1x16x326xbf16> to vector<16x326xbf16>
    %c0_4 = arith.constant 0 : index
    %c0_5 = arith.constant 0 : index
    %3 = vector.load %arg11[%c0_4, %c0_5] : memref<16x326xbf16, #tpu.memory_space<vmem>>, vector<16x326xbf16>
    tpu.vector_store %arg11[%c0_4, %c0_5], %2 {strides = array<i32>} : memref<16x326xbf16, #tpu.memory_space<vmem>>, vector<16x326xbf16>,
    %c0_6 = arith.constant 0 : index
    %c0_7 = arith.constant 0 : index
    %4 = vector.load %arg3[%c0_6, %c0_7] : memref<144x16xbf16, #tpu.memory_space<vmem>>, vector<144x16xbf16>
    %c0_8 = arith.constant 0 : index
    %c0_9 = arith.constant 0 : index
    %5 = vector.load %arg4[%c0_8, %c0_9] : memref<16x1xf32, #tpu.memory_space<vmem>>, vector<16x1xf32>
    %6 = vector.extract_strided_slice %4 {offsets = [0, 0], sizes = [16, 16], strides = [1, 1]} : vector<144x16xbf16> to vector<16x16xbf16>
    %c0_10 = arith.constant 0 : index
    %c0_11 = arith.constant 0 : index
    %7 = vector.load %arg11[%c0_10, %c0_11] : memref<16x326xbf16, #tpu.memory_space<vmem>>, vector<16x288xbf16>
    %cst = arith.constant dense<0.000000e+00> : vector<16x288xf32>
    %8 = tpu.matmul %6, %7, %cst {dimension_numbers = #tpu.dot_dimension_numbers<[1], [0], [0], [1], [0, 0, 1, 1], [], []>} : vector<16x16xbf16>, vector<16x288xbf16>, vector<16x288xf32> -> vector<16x288xf32>
    %9 = vector.extract_strided_slice %4 {offsets = [16, 0], sizes = [16, 16], strides = [1, 1]} : vector<144x16xbf16> to vector<16x16xbf16>
    %c0_12 = arith.constant 0 : index
    %c1 = arith.constant 1 : index
    %10 = vector.load %arg11[%c0_12, %c1] : memref<16x326xbf16, #tpu.memory_space<vmem>>, vector<16x288xbf16>
    %cst_13 = arith.constant dense<0.000000e+00> : vector<16x288xf32>
    %11 = tpu.matmul %9, %10, %cst_13 {dimension_numbers = #tpu.dot_dimension_numbers<[1], [0], [0], [1], [0, 0, 1, 1], [], []>} : vector<16x16xbf16>, vector<16x288xbf16>, vector<16x288xf32> -> vector<16x288xf32>
    %12 = arith.addf %8, %11 : vector<16x288xf32>
    %13 = vector.extract_strided_slice %4 {offsets = [32, 0], sizes = [16, 16], strides = [1, 1]} : vector<144x16xbf16> to vector<16x16xbf16>
    %c0_14 = arith.constant 0 : index
    %c2 = arith.constant 2 : index
    %14 = vector.load %arg11[%c0_14, %c2] : memref<16x326xbf16, #tpu.memory_space<vmem>>, vector<16x288xbf16>
    %cst_15 = arith.constant dense<0.000000e+00> : vector<16x288xf32>
    %15 = tpu.matmul %13, %14, %cst_15 {dimension_numbers = #tpu.dot_dimension_numbers<[1], [0], [0], [1], [0, 0, 1, 1], [], []>} : vector<16x16xbf16>, vector<16x288xbf16>, vector<16x288xf32> -> vector<16x288xf32>
    %16 = arith.addf %12, %15 : vector<16x288xf32>
    %17 = vector.extract_strided_slice %4 {offsets = [48, 0], sizes = [16, 16], strides = [1, 1]} : vector<144x16xbf16> to vector<16x16xbf16>
    %c0_16 = arith.constant 0 : index
    %c18 = arith.constant 18 : index
    %18 = vector.load %arg11[%c0_16, %c18] : memref<16x326xbf16, #tpu.memory_space<vmem>>, vector<16x288xbf16>
    %cst_17 = arith.constant dense<0.000000e+00> : vector<16x288xf32>
    %19 = tpu.matmul %17, %18, %cst_17 {dimension_numbers = #tpu.dot_dimension_numbers<[1], [0], [0], [1], [0, 0, 1, 1], [], []>} : vector<16x16xbf16>, vector<16x288xbf16>, vector<16x288xf32> -> vector<16x288xf32>
    %20 = arith.addf %16, %19 : vector<16x288xf32>
    %21 = vector.extract_strided_slice %4 {offsets = [64, 0], sizes = [16, 16], strides = [1, 1]} : vector<144x16xbf16> to vector<16x16xbf16>
    %c0_18 = arith.constant 0 : index
    %c19 = arith.constant 19 : index
    %22 = vector.load %arg11[%c0_18, %c19] : memref<16x326xbf16, #tpu.memory_space<vmem>>, vector<16x288xbf16>
    %cst_19 = arith.constant dense<0.000000e+00> : vector<16x288xf32>
    %23 = tpu.matmul %21, %22, %cst_19 {dimension_numbers = #tpu.dot_dimension_numbers<[1], [0], [0], [1], [0, 0, 1, 1], [], []>} : vector<16x16xbf16>, vector<16x288xbf16>, vector<16x288xf32> -> vector<16x288xf32>
    %24 = arith.addf %20, %23 : vector<16x288xf32>
    %25 = vector.extract_strided_slice %4 {offsets = [80, 0], sizes = [16, 16], strides = [1, 1]} : vector<144x16xbf16> to vector<16x16xbf16>
    %c0_20 = arith.constant 0 : index
    %c20 = arith.constant 20 : index
    %26 = vector.load %arg11[%c0_20, %c20] : memref<16x326xbf16, #tpu.memory_space<vmem>>, vector<16x288xbf16>
    %cst_21 = arith.constant dense<0.000000e+00> : vector<16x288xf32>
    %27 = tpu.matmul %25, %26, %cst_21 {dimension_numbers = #tpu.dot_dimension_numbers<[1], [0], [0], [1], [0, 0, 1, 1], [], []>} : vector<16x16xbf16>, vector<16x288xbf16>, vector<16x288xf32> -> vector<16x288xf32>
    %28 = arith.addf %24, %27 : vector<16x288xf32>
    %29 = vector.extract_strided_slice %4 {offsets = [96, 0], sizes = [16, 16], strides = [1, 1]} : vector<144x16xbf16> to vector<16x16xbf16>
    %c0_22 = arith.constant 0 : index
    %c36 = arith.constant 36 : index
    %30 = vector.load %arg11[%c0_22, %c36] : memref<16x326xbf16, #tpu.memory_space<vmem>>, vector<16x288xbf16>
    %cst_23 = arith.constant dense<0.000000e+00> : vector<16x288xf32>
    %31 = tpu.matmul %29, %30, %cst_23 {dimension_numbers = #tpu.dot_dimension_numbers<[1], [0], [0], [1], [0, 0, 1, 1], [], []>} : vector<16x16xbf16>, vector<16x288xbf16>, vector<16x288xf32> -> vector<16x288xf32>
    %32 = arith.addf %28, %31 : vector<16x288xf32>
    %33 = vector.extract_strided_slice %4 {offsets = [112, 0], sizes = [16, 16], strides = [1, 1]} : vector<144x16xbf16> to vector<16x16xbf16>
    %c0_24 = arith.constant 0 : index
    %c37 = arith.constant 37 : index
    %34 = vector.load %arg11[%c0_24, %c37] : memref<16x326xbf16, #tpu.memory_space<vmem>>, vector<16x288xbf16>
    %cst_25 = arith.constant dense<0.000000e+00> : vector<16x288xf32>
    %35 = tpu.matmul %33, %34, %cst_25 {dimension_numbers = #tpu.dot_dimension_numbers<[1], [0], [0], [1], [0, 0, 1, 1], [], []>} : vector<16x16xbf16>, vector<16x288xbf16>, vector<16x288xf32> -> vector<16x288xf32>
    %36 = arith.addf %32, %35 : vector<16x288xf32>
    %37 = vector.extract_strided_slice %4 {offsets = [128, 0], sizes = [16, 16], strides = [1, 1]} : vector<144x16xbf16> to vector<16x16xbf16>
    %c0_26 = arith.constant 0 : index
    %c38 = arith.constant 38 : index
    %38 = vector.load %arg11[%c0_26, %c38] : memref<16x326xbf16, #tpu.memory_space<vmem>>, vector<16x288xbf16>
    %cst_27 = arith.constant dense<0.000000e+00> : vector<16x288xf32>
    %39 = tpu.matmul %37, %38, %cst_27 {dimension_numbers = #tpu.dot_dimension_numbers<[1], [0], [0], [1], [0, 0, 1, 1], [], []>} : vector<16x16xbf16>, vector<16x288xbf16>, vector<16x288xf32> -> vector<16x288xf32>
    %40 = arith.addf %36, %39 : vector<16x288xf32>
    %41 = vector.broadcast %5 : vector<16x1xf32> to vector<16x288xf32>
    %42 = arith.addf %40, %41 : vector<16x288xf32>
    %cst_28 = arith.constant 0.000000e+00 : f32
    %43 = vector.broadcast %cst_28 : f32 to vector<16x288xf32>
    %44 = arith.maximumf %42, %43 : vector<16x288xf32>
    %c0_29 = arith.constant 0 : index
    %c0_30 = arith.constant 0 : index
    %45 = vector.load %arg12[%c0_29, %c0_30] : memref<16x288xf32, #tpu.memory_space<vmem>>, vector<16x288xf32>
    tpu.vector_store %arg12[%c0_29, %c0_30], %44 {strides = array<i32>} : memref<16x288xf32, #tpu.memory_space<vmem>>, vector<16x288xf32>,
    %c0_31 = arith.constant 0 : index
    %c0_32 = arith.constant 0 : index
    %46 = vector.load %arg12[%c0_31, %c0_32] : memref<16x288xf32, #tpu.memory_space<vmem>>, vector<16x288xf32>
    %c0_33 = arith.constant 0 : index
    %c0_34 = arith.constant 0 : index
    %47 = vector.load %arg13[%c0_33, %c0_34] : memref<16x288xf32, #tpu.memory_space<vmem>>, vector<16x288xf32>
    tpu.vector_store %arg13[%c0_33, %c0_34], %46 {strides = array<i32>} : memref<16x288xf32, #tpu.memory_space<vmem>>, vector<16x288xf32>,
    %c0_i32 = arith.constant 0 : i32
    %c2_i32 = arith.constant 2 : i32
    %48 = arith.addi %c0_i32, %c2_i32 : i32
    %c1_i32 = arith.constant 1 : i32
    scf.for %arg14 = %c0_i32 to %48 step %c1_i32  : i32 {
      %c0_106 = arith.constant 0 : index
      %c0_107 = arith.constant 0 : index
      %159 = vector.load %arg13[%c0_106, %c0_107] : memref<16x288xf32, #tpu.memory_space<vmem>>, vector<16x288xf32>
      %160 = arith.truncf %159 : vector<16x288xf32> to vector<16x288xbf16>
      %161 = vector.broadcast %0 : vector<1x288xbf16> to vector<16x288xbf16>
      %162 = arith.mulf %160, %161 : vector<16x288xbf16>
      %c0_108 = arith.constant 0 : index
      %c19_109 = arith.constant 19 : index
      %163 = vector.load %arg11[%c0_108, %c19_109] : memref<16x326xbf16, #tpu.memory_space<vmem>>, vector<16x288xbf16>
      tpu.vector_store %arg11[%c0_108, %c19_109], %162 {strides = array<i32>} : memref<16x326xbf16, #tpu.memory_space<vmem>>, vector<16x288xbf16>,
      %c2_i32_110 = arith.constant 2 : i32
      %164 = arith.muli %c2_i32_110, %arg14 : i32
      %165 = arith.index_cast %164 : i32 to index
      %c0_111 = arith.constant 0 : index
      %c0_112 = arith.constant 0 : index
      %166 = vector.load %arg5[%165, %c0_111, %c0_112] : memref<4x144x16xbf16, #tpu.memory_space<vmem>>, vector<1x144x16xbf16>
      %167 = vector.shape_cast %166 : vector<1x144x16xbf16> to vector<144x16xbf16>
      %c2_i32_113 = arith.constant 2 : i32
      %168 = arith.muli %c2_i32_113, %arg14 : i32
      %169 = arith.index_cast %168 : i32 to index
      %c0_114 = arith.constant 0 : index
      %c0_115 = arith.constant 0 : index
      %170 = vector.load %arg6[%169, %c0_114, %c0_115] : memref<4x16x1xf32, #tpu.memory_space<vmem>>, vector<1x16x1xf32>
      %171 = vector.shape_cast %170 : vector<1x16x1xf32> to vector<16x1xf32>
      %172 = vector.extract_strided_slice %167 {offsets = [0, 0], sizes = [16, 16], strides = [1, 1]} : vector<144x16xbf16> to vector<16x16xbf16>
      %c0_116 = arith.constant 0 : index
      %c0_117 = arith.constant 0 : index
      %173 = vector.load %arg11[%c0_116, %c0_117] : memref<16x326xbf16, #tpu.memory_space<vmem>>, vector<16x288xbf16>
      %cst_118 = arith.constant dense<0.000000e+00> : vector<16x288xf32>
      %174 = tpu.matmul %172, %173, %cst_118 {dimension_numbers = #tpu.dot_dimension_numbers<[1], [0], [0], [1], [0, 0, 1, 1], [], []>} : vector<16x16xbf16>, vector<16x288xbf16>, vector<16x288xf32> -> vector<16x288xf32>
      %175 = vector.extract_strided_slice %167 {offsets = [16, 0], sizes = [16, 16], strides = [1, 1]} : vector<144x16xbf16> to vector<16x16xbf16>
      %c0_119 = arith.constant 0 : index
      %c1_120 = arith.constant 1 : index
      %176 = vector.load %arg11[%c0_119, %c1_120] : memref<16x326xbf16, #tpu.memory_space<vmem>>, vector<16x288xbf16>
      %cst_121 = arith.constant dense<0.000000e+00> : vector<16x288xf32>
      %177 = tpu.matmul %175, %176, %cst_121 {dimension_numbers = #tpu.dot_dimension_numbers<[1], [0], [0], [1], [0, 0, 1, 1], [], []>} : vector<16x16xbf16>, vector<16x288xbf16>, vector<16x288xf32> -> vector<16x288xf32>
      %178 = arith.addf %174, %177 : vector<16x288xf32>
      %179 = vector.extract_strided_slice %167 {offsets = [32, 0], sizes = [16, 16], strides = [1, 1]} : vector<144x16xbf16> to vector<16x16xbf16>
      %c0_122 = arith.constant 0 : index
      %c2_123 = arith.constant 2 : index
      %180 = vector.load %arg11[%c0_122, %c2_123] : memref<16x326xbf16, #tpu.memory_space<vmem>>, vector<16x288xbf16>
      %cst_124 = arith.constant dense<0.000000e+00> : vector<16x288xf32>
      %181 = tpu.matmul %179, %180, %cst_124 {dimension_numbers = #tpu.dot_dimension_numbers<[1], [0], [0], [1], [0, 0, 1, 1], [], []>} : vector<16x16xbf16>, vector<16x288xbf16>, vector<16x288xf32> -> vector<16x288xf32>
      %182 = arith.addf %178, %181 : vector<16x288xf32>
      %183 = vector.extract_strided_slice %167 {offsets = [48, 0], sizes = [16, 16], strides = [1, 1]} : vector<144x16xbf16> to vector<16x16xbf16>
      %c0_125 = arith.constant 0 : index
      %c18_126 = arith.constant 18 : index
      %184 = vector.load %arg11[%c0_125, %c18_126] : memref<16x326xbf16, #tpu.memory_space<vmem>>, vector<16x288xbf16>
      %cst_127 = arith.constant dense<0.000000e+00> : vector<16x288xf32>
      %185 = tpu.matmul %183, %184, %cst_127 {dimension_numbers = #tpu.dot_dimension_numbers<[1], [0], [0], [1], [0, 0, 1, 1], [], []>} : vector<16x16xbf16>, vector<16x288xbf16>, vector<16x288xf32> -> vector<16x288xf32>
      %186 = arith.addf %182, %185 : vector<16x288xf32>
      %187 = vector.extract_strided_slice %167 {offsets = [64, 0], sizes = [16, 16], strides = [1, 1]} : vector<144x16xbf16> to vector<16x16xbf16>
      %c0_128 = arith.constant 0 : index
      %c19_129 = arith.constant 19 : index
      %188 = vector.load %arg11[%c0_128, %c19_129] : memref<16x326xbf16, #tpu.memory_space<vmem>>, vector<16x288xbf16>
      %cst_130 = arith.constant dense<0.000000e+00> : vector<16x288xf32>
      %189 = tpu.matmul %187, %188, %cst_130 {dimension_numbers = #tpu.dot_dimension_numbers<[1], [0], [0], [1], [0, 0, 1, 1], [], []>} : vector<16x16xbf16>, vector<16x288xbf16>, vector<16x288xf32> -> vector<16x288xf32>
      %190 = arith.addf %186, %189 : vector<16x288xf32>
      %191 = vector.extract_strided_slice %167 {offsets = [80, 0], sizes = [16, 16], strides = [1, 1]} : vector<144x16xbf16> to vector<16x16xbf16>
      %c0_131 = arith.constant 0 : index
      %c20_132 = arith.constant 20 : index
      %192 = vector.load %arg11[%c0_131, %c20_132] : memref<16x326xbf16, #tpu.memory_space<vmem>>, vector<16x288xbf16>
      %cst_133 = arith.constant dense<0.000000e+00> : vector<16x288xf32>
      %193 = tpu.matmul %191, %192, %cst_133 {dimension_numbers = #tpu.dot_dimension_numbers<[1], [0], [0], [1], [0, 0, 1, 1], [], []>} : vector<16x16xbf16>, vector<16x288xbf16>, vector<16x288xf32> -> vector<16x288xf32>
      %194 = arith.addf %190, %193 : vector<16x288xf32>
      %195 = vector.extract_strided_slice %167 {offsets = [96, 0], sizes = [16, 16], strides = [1, 1]} : vector<144x16xbf16> to vector<16x16xbf16>
      %c0_134 = arith.constant 0 : index
      %c36_135 = arith.constant 36 : index
      %196 = vector.load %arg11[%c0_134, %c36_135] : memref<16x326xbf16, #tpu.memory_space<vmem>>, vector<16x288xbf16>
      %cst_136 = arith.constant dense<0.000000e+00> : vector<16x288xf32>
      %197 = tpu.matmul %195, %196, %cst_136 {dimension_numbers = #tpu.dot_dimension_numbers<[1], [0], [0], [1], [0, 0, 1, 1], [], []>} : vector<16x16xbf16>, vector<16x288xbf16>, vector<16x288xf32> -> vector<16x288xf32>
      %198 = arith.addf %194, %197 : vector<16x288xf32>
      %199 = vector.extract_strided_slice %167 {offsets = [112, 0], sizes = [16, 16], strides = [1, 1]} : vector<144x16xbf16> to vector<16x16xbf16>
      %c0_137 = arith.constant 0 : index
      %c37_138 = arith.constant 37 : index
      %200 = vector.load %arg11[%c0_137, %c37_138] : memref<16x326xbf16, #tpu.memory_space<vmem>>, vector<16x288xbf16>
      %cst_139 = arith.constant dense<0.000000e+00> : vector<16x288xf32>
      %201 = tpu.matmul %199, %200, %cst_139 {dimension_numbers = #tpu.dot_dimension_numbers<[1], [0], [0], [1], [0, 0, 1, 1], [], []>} : vector<16x16xbf16>, vector<16x288xbf16>, vector<16x288xf32> -> vector<16x288xf32>
      %202 = arith.addf %198, %201 : vector<16x288xf32>
      %203 = vector.extract_strided_slice %167 {offsets = [128, 0], sizes = [16, 16], strides = [1, 1]} : vector<144x16xbf16> to vector<16x16xbf16>
      %c0_140 = arith.constant 0 : index
      %c38_141 = arith.constant 38 : index
      %204 = vector.load %arg11[%c0_140, %c38_141] : memref<16x326xbf16, #tpu.memory_space<vmem>>, vector<16x288xbf16>
      %cst_142 = arith.constant dense<0.000000e+00> : vector<16x288xf32>
      %205 = tpu.matmul %203, %204, %cst_142 {dimension_numbers = #tpu.dot_dimension_numbers<[1], [0], [0], [1], [0, 0, 1, 1], [], []>} : vector<16x16xbf16>, vector<16x288xbf16>, vector<16x288xf32> -> vector<16x288xf32>
      %206 = arith.addf %202, %205 : vector<16x288xf32>
      %207 = vector.broadcast %171 : vector<16x1xf32> to vector<16x288xf32>
      %208 = arith.addf %206, %207 : vector<16x288xf32>
      %cst_143 = arith.constant 0.000000e+00 : f32
      %209 = vector.broadcast %cst_143 : f32 to vector<16x288xf32>
      %210 = arith.maximumf %208, %209 : vector<16x288xf32>
      %211 = arith.truncf %210 : vector<16x288xf32> to vector<16x288xbf16>
      %212 = vector.broadcast %0 : vector<1x288xbf16> to vector<16x288xbf16>
      %213 = arith.mulf %211, %212 : vector<16x288xbf16>
      %c0_144 = arith.constant 0 : index
      %c19_145 = arith.constant 19 : index
      %214 = vector.load %arg11[%c0_144, %c19_145] : memref<16x326xbf16, #tpu.memory_space<vmem>>, vector<16x288xbf16>
      tpu.vector_store %arg11[%c0_144, %c19_145], %213 {strides = array<i32>} : memref<16x326xbf16, #tpu.memory_space<vmem>>, vector<16x288xbf16>,
      %c2_i32_146 = arith.constant 2 : i32
      %215 = arith.muli %c2_i32_146, %arg14 : i32
      %c1_i32_147 = arith.constant 1 : i32
      %216 = arith.addi %215, %c1_i32_147 : i32
      %217 = arith.index_cast %216 : i32 to index
      %c0_148 = arith.constant 0 : index
      %c0_149 = arith.constant 0 : index
      %218 = vector.load %arg5[%217, %c0_148, %c0_149] : memref<4x144x16xbf16, #tpu.memory_space<vmem>>, vector<1x144x16xbf16>
      %219 = vector.shape_cast %218 : vector<1x144x16xbf16> to vector<144x16xbf16>
      %c2_i32_150 = arith.constant 2 : i32
      %220 = arith.muli %c2_i32_150, %arg14 : i32
      %c1_i32_151 = arith.constant 1 : i32
      %221 = arith.addi %220, %c1_i32_151 : i32
      %222 = arith.index_cast %221 : i32 to index
      %c0_152 = arith.constant 0 : index
      %c0_153 = arith.constant 0 : index
      %223 = vector.load %arg6[%222, %c0_152, %c0_153] : memref<4x16x1xf32, #tpu.memory_space<vmem>>, vector<1x16x1xf32>
      %224 = vector.shape_cast %223 : vector<1x16x1xf32> to vector<16x1xf32>
      %225 = vector.extract_strided_slice %219 {offsets = [0, 0], sizes = [16, 16], strides = [1, 1]} : vector<144x16xbf16> to vector<16x16xbf16>
      %c0_154 = arith.constant 0 : index
      %c0_155 = arith.constant 0 : index
      %226 = vector.load %arg11[%c0_154, %c0_155] : memref<16x326xbf16, #tpu.memory_space<vmem>>, vector<16x288xbf16>
      %cst_156 = arith.constant dense<0.000000e+00> : vector<16x288xf32>
      %227 = tpu.matmul %225, %226, %cst_156 {dimension_numbers = #tpu.dot_dimension_numbers<[1], [0], [0], [1], [0, 0, 1, 1], [], []>} : vector<16x16xbf16>, vector<16x288xbf16>, vector<16x288xf32> -> vector<16x288xf32>
      %228 = vector.extract_strided_slice %219 {offsets = [16, 0], sizes = [16, 16], strides = [1, 1]} : vector<144x16xbf16> to vector<16x16xbf16>
      %c0_157 = arith.constant 0 : index
      %c1_158 = arith.constant 1 : index
      %229 = vector.load %arg11[%c0_157, %c1_158] : memref<16x326xbf16, #tpu.memory_space<vmem>>, vector<16x288xbf16>
      %cst_159 = arith.constant dense<0.000000e+00> : vector<16x288xf32>
      %230 = tpu.matmul %228, %229, %cst_159 {dimension_numbers = #tpu.dot_dimension_numbers<[1], [0], [0], [1], [0, 0, 1, 1], [], []>} : vector<16x16xbf16>, vector<16x288xbf16>, vector<16x288xf32> -> vector<16x288xf32>
      %231 = arith.addf %227, %230 : vector<16x288xf32>
      %232 = vector.extract_strided_slice %219 {offsets = [32, 0], sizes = [16, 16], strides = [1, 1]} : vector<144x16xbf16> to vector<16x16xbf16>
      %c0_160 = arith.constant 0 : index
      %c2_161 = arith.constant 2 : index
      %233 = vector.load %arg11[%c0_160, %c2_161] : memref<16x326xbf16, #tpu.memory_space<vmem>>, vector<16x288xbf16>
      %cst_162 = arith.constant dense<0.000000e+00> : vector<16x288xf32>
      %234 = tpu.matmul %232, %233, %cst_162 {dimension_numbers = #tpu.dot_dimension_numbers<[1], [0], [0], [1], [0, 0, 1, 1], [], []>} : vector<16x16xbf16>, vector<16x288xbf16>, vector<16x288xf32> -> vector<16x288xf32>
      %235 = arith.addf %231, %234 : vector<16x288xf32>
      %236 = vector.extract_strided_slice %219 {offsets = [48, 0], sizes = [16, 16], strides = [1, 1]} : vector<144x16xbf16> to vector<16x16xbf16>
      %c0_163 = arith.constant 0 : index
      %c18_164 = arith.constant 18 : index
      %237 = vector.load %arg11[%c0_163, %c18_164] : memref<16x326xbf16, #tpu.memory_space<vmem>>, vector<16x288xbf16>
      %cst_165 = arith.constant dense<0.000000e+00> : vector<16x288xf32>
      %238 = tpu.matmul %236, %237, %cst_165 {dimension_numbers = #tpu.dot_dimension_numbers<[1], [0], [0], [1], [0, 0, 1, 1], [], []>} : vector<16x16xbf16>, vector<16x288xbf16>, vector<16x288xf32> -> vector<16x288xf32>
      %239 = arith.addf %235, %238 : vector<16x288xf32>
      %240 = vector.extract_strided_slice %219 {offsets = [64, 0], sizes = [16, 16], strides = [1, 1]} : vector<144x16xbf16> to vector<16x16xbf16>
      %c0_166 = arith.constant 0 : index
      %c19_167 = arith.constant 19 : index
      %241 = vector.load %arg11[%c0_166, %c19_167] : memref<16x326xbf16, #tpu.memory_space<vmem>>, vector<16x288xbf16>
      %cst_168 = arith.constant dense<0.000000e+00> : vector<16x288xf32>
      %242 = tpu.matmul %240, %241, %cst_168 {dimension_numbers = #tpu.dot_dimension_numbers<[1], [0], [0], [1], [0, 0, 1, 1], [], []>} : vector<16x16xbf16>, vector<16x288xbf16>, vector<16x288xf32> -> vector<16x288xf32>
      %243 = arith.addf %239, %242 : vector<16x288xf32>
      %244 = vector.extract_strided_slice %219 {offsets = [80, 0], sizes = [16, 16], strides = [1, 1]} : vector<144x16xbf16> to vector<16x16xbf16>
      %c0_169 = arith.constant 0 : index
      %c20_170 = arith.constant 20 : index
      %245 = vector.load %arg11[%c0_169, %c20_170] : memref<16x326xbf16, #tpu.memory_space<vmem>>, vector<16x288xbf16>
      %cst_171 = arith.constant dense<0.000000e+00> : vector<16x288xf32>
      %246 = tpu.matmul %244, %245, %cst_171 {dimension_numbers = #tpu.dot_dimension_numbers<[1], [0], [0], [1], [0, 0, 1, 1], [], []>} : vector<16x16xbf16>, vector<16x288xbf16>, vector<16x288xf32> -> vector<16x288xf32>
      %247 = arith.addf %243, %246 : vector<16x288xf32>
      %248 = vector.extract_strided_slice %219 {offsets = [96, 0], sizes = [16, 16], strides = [1, 1]} : vector<144x16xbf16> to vector<16x16xbf16>
      %c0_172 = arith.constant 0 : index
      %c36_173 = arith.constant 36 : index
      %249 = vector.load %arg11[%c0_172, %c36_173] : memref<16x326xbf16, #tpu.memory_space<vmem>>, vector<16x288xbf16>
      %cst_174 = arith.constant dense<0.000000e+00> : vector<16x288xf32>
      %250 = tpu.matmul %248, %249, %cst_174 {dimension_numbers = #tpu.dot_dimension_numbers<[1], [0], [0], [1], [0, 0, 1, 1], [], []>} : vector<16x16xbf16>, vector<16x288xbf16>, vector<16x288xf32> -> vector<16x288xf32>
      %251 = arith.addf %247, %250 : vector<16x288xf32>
      %252 = vector.extract_strided_slice %219 {offsets = [112, 0], sizes = [16, 16], strides = [1, 1]} : vector<144x16xbf16> to vector<16x16xbf16>
      %c0_175 = arith.constant 0 : index
      %c37_176 = arith.constant 37 : index
      %253 = vector.load %arg11[%c0_175, %c37_176] : memref<16x326xbf16, #tpu.memory_space<vmem>>, vector<16x288xbf16>
      %cst_177 = arith.constant dense<0.000000e+00> : vector<16x288xf32>
      %254 = tpu.matmul %252, %253, %cst_177 {dimension_numbers = #tpu.dot_dimension_numbers<[1], [0], [0], [1], [0, 0, 1, 1], [], []>} : vector<16x16xbf16>, vector<16x288xbf16>, vector<16x288xf32> -> vector<16x288xf32>
      %255 = arith.addf %251, %254 : vector<16x288xf32>
      %256 = vector.extract_strided_slice %219 {offsets = [128, 0], sizes = [16, 16], strides = [1, 1]} : vector<144x16xbf16> to vector<16x16xbf16>
      %c0_178 = arith.constant 0 : index
      %c38_179 = arith.constant 38 : index
      %257 = vector.load %arg11[%c0_178, %c38_179] : memref<16x326xbf16, #tpu.memory_space<vmem>>, vector<16x288xbf16>
      %cst_180 = arith.constant dense<0.000000e+00> : vector<16x288xf32>
      %258 = tpu.matmul %256, %257, %cst_180 {dimension_numbers = #tpu.dot_dimension_numbers<[1], [0], [0], [1], [0, 0, 1, 1], [], []>} : vector<16x16xbf16>, vector<16x288xbf16>, vector<16x288xf32> -> vector<16x288xf32>
      %259 = arith.addf %255, %258 : vector<16x288xf32>
      %260 = vector.broadcast %224 : vector<16x1xf32> to vector<16x288xf32>
      %261 = arith.addf %259, %260 : vector<16x288xf32>
      %c0_181 = arith.constant 0 : index
      %c0_182 = arith.constant 0 : index
      %262 = vector.load %arg13[%c0_181, %c0_182] : memref<16x288xf32, #tpu.memory_space<vmem>>, vector<16x288xf32>
      %263 = arith.index_cast %arg14 : i32 to index
      %264 = memref.load %arg1[%263] : memref<2xf32, #tpu.memory_space<smem>>
      %265 = vector.broadcast %264 : f32 to vector<16x288xf32>
      %266 = arith.mulf %265, %261 : vector<16x288xf32>
      %267 = arith.addf %262, %266 : vector<16x288xf32>
      %c0_183 = arith.constant 0 : index
      %c0_184 = arith.constant 0 : index
      %268 = vector.load %arg13[%c0_183, %c0_184] : memref<16x288xf32, #tpu.memory_space<vmem>>, vector<16x288xf32>
      tpu.vector_store %arg13[%c0_183, %c0_184], %267 {strides = array<i32>} : memref<16x288xf32, #tpu.memory_space<vmem>>, vector<16x288xf32>,
    }
    %c2_i32_35 = arith.constant 2 : i32
    %c0_36 = arith.constant 0 : index
    %c0_37 = arith.constant 0 : index
    %49 = vector.load %arg13[%c0_36, %c0_37] : memref<16x288xf32, #tpu.memory_space<vmem>>, vector<16x288xf32>
    %c0_38 = arith.constant 0 : index
    %c0_39 = arith.constant 0 : index
    %50 = vector.load %arg12[%c0_38, %c0_39] : memref<16x288xf32, #tpu.memory_space<vmem>>, vector<16x288xf32>
    %51 = arith.addf %49, %50 : vector<16x288xf32>
    %52 = arith.truncf %51 : vector<16x288xf32> to vector<16x288xbf16>
    %53 = vector.broadcast %0 : vector<1x288xbf16> to vector<16x288xbf16>
    %54 = arith.mulf %52, %53 : vector<16x288xbf16>
    %c0_40 = arith.constant 0 : index
    %c19_41 = arith.constant 19 : index
    %55 = vector.load %arg11[%c0_40, %c19_41] : memref<16x326xbf16, #tpu.memory_space<vmem>>, vector<16x288xbf16>
    tpu.vector_store %arg11[%c0_40, %c19_41], %54 {strides = array<i32>} : memref<16x326xbf16, #tpu.memory_space<vmem>>, vector<16x288xbf16>,
    %c0_42 = arith.constant 0 : index
    %c0_43 = arith.constant 0 : index
    %56 = vector.load %arg7[%c0_42, %c0_43] : memref<144x16xbf16, #tpu.memory_space<vmem>>, vector<144x16xbf16>
    %c0_44 = arith.constant 0 : index
    %c0_45 = arith.constant 0 : index
    %57 = vector.load %arg8[%c0_44, %c0_45] : memref<16x1xf32, #tpu.memory_space<vmem>>, vector<16x1xf32>
    %58 = vector.extract_strided_slice %56 {offsets = [0, 0], sizes = [16, 16], strides = [1, 1]} : vector<144x16xbf16> to vector<16x16xbf16>
    %c0_46 = arith.constant 0 : index
    %c0_47 = arith.constant 0 : index
    %59 = vector.load %arg11[%c0_46, %c0_47] : memref<16x326xbf16, #tpu.memory_space<vmem>>, vector<16x288xbf16>
    %cst_48 = arith.constant dense<0.000000e+00> : vector<16x288xf32>
    %60 = tpu.matmul %58, %59, %cst_48 {dimension_numbers = #tpu.dot_dimension_numbers<[1], [0], [0], [1], [0, 0, 1, 1], [], []>} : vector<16x16xbf16>, vector<16x288xbf16>, vector<16x288xf32> -> vector<16x288xf32>
    %61 = vector.extract_strided_slice %56 {offsets = [16, 0], sizes = [16, 16], strides = [1, 1]} : vector<144x16xbf16> to vector<16x16xbf16>
    %c0_49 = arith.constant 0 : index
    %c1_50 = arith.constant 1 : index
    %62 = vector.load %arg11[%c0_49, %c1_50] : memref<16x326xbf16, #tpu.memory_space<vmem>>, vector<16x288xbf16>
    %cst_51 = arith.constant dense<0.000000e+00> : vector<16x288xf32>
    %63 = tpu.matmul %61, %62, %cst_51 {dimension_numbers = #tpu.dot_dimension_numbers<[1], [0], [0], [1], [0, 0, 1, 1], [], []>} : vector<16x16xbf16>, vector<16x288xbf16>, vector<16x288xf32> -> vector<16x288xf32>
    %64 = arith.addf %60, %63 : vector<16x288xf32>
    %65 = vector.extract_strided_slice %56 {offsets = [32, 0], sizes = [16, 16], strides = [1, 1]} : vector<144x16xbf16> to vector<16x16xbf16>
    %c0_52 = arith.constant 0 : index
    %c2_53 = arith.constant 2 : index
    %66 = vector.load %arg11[%c0_52, %c2_53] : memref<16x326xbf16, #tpu.memory_space<vmem>>, vector<16x288xbf16>
    %cst_54 = arith.constant dense<0.000000e+00> : vector<16x288xf32>
    %67 = tpu.matmul %65, %66, %cst_54 {dimension_numbers = #tpu.dot_dimension_numbers<[1], [0], [0], [1], [0, 0, 1, 1], [], []>} : vector<16x16xbf16>, vector<16x288xbf16>, vector<16x288xf32> -> vector<16x288xf32>
    %68 = arith.addf %64, %67 : vector<16x288xf32>
    %69 = vector.extract_strided_slice %56 {offsets = [48, 0], sizes = [16, 16], strides = [1, 1]} : vector<144x16xbf16> to vector<16x16xbf16>
    %c0_55 = arith.constant 0 : index
    %c18_56 = arith.constant 18 : index
    %70 = vector.load %arg11[%c0_55, %c18_56] : memref<16x326xbf16, #tpu.memory_space<vmem>>, vector<16x288xbf16>
    %cst_57 = arith.constant dense<0.000000e+00> : vector<16x288xf32>
    %71 = tpu.matmul %69, %70, %cst_57 {dimension_numbers = #tpu.dot_dimension_numbers<[1], [0], [0], [1], [0, 0, 1, 1], [], []>} : vector<16x16xbf16>, vector<16x288xbf16>, vector<16x288xf32> -> vector<16x288xf32>
    %72 = arith.addf %68, %71 : vector<16x288xf32>
    %73 = vector.extract_strided_slice %56 {offsets = [64, 0], sizes = [16, 16], strides = [1, 1]} : vector<144x16xbf16> to vector<16x16xbf16>
    %c0_58 = arith.constant 0 : index
    %c19_59 = arith.constant 19 : index
    %74 = vector.load %arg11[%c0_58, %c19_59] : memref<16x326xbf16, #tpu.memory_space<vmem>>, vector<16x288xbf16>
    %cst_60 = arith.constant dense<0.000000e+00> : vector<16x288xf32>
    %75 = tpu.matmul %73, %74, %cst_60 {dimension_numbers = #tpu.dot_dimension_numbers<[1], [0], [0], [1], [0, 0, 1, 1], [], []>} : vector<16x16xbf16>, vector<16x288xbf16>, vector<16x288xf32> -> vector<16x288xf32>
    %76 = arith.addf %72, %75 : vector<16x288xf32>
    %77 = vector.extract_strided_slice %56 {offsets = [80, 0], sizes = [16, 16], strides = [1, 1]} : vector<144x16xbf16> to vector<16x16xbf16>
    %c0_61 = arith.constant 0 : index
    %c20_62 = arith.constant 20 : index
    %78 = vector.load %arg11[%c0_61, %c20_62] : memref<16x326xbf16, #tpu.memory_space<vmem>>, vector<16x288xbf16>
    %cst_63 = arith.constant dense<0.000000e+00> : vector<16x288xf32>
    %79 = tpu.matmul %77, %78, %cst_63 {dimension_numbers = #tpu.dot_dimension_numbers<[1], [0], [0], [1], [0, 0, 1, 1], [], []>} : vector<16x16xbf16>, vector<16x288xbf16>, vector<16x288xf32> -> vector<16x288xf32>
    %80 = arith.addf %76, %79 : vector<16x288xf32>
    %81 = vector.extract_strided_slice %56 {offsets = [96, 0], sizes = [16, 16], strides = [1, 1]} : vector<144x16xbf16> to vector<16x16xbf16>
    %c0_64 = arith.constant 0 : index
    %c36_65 = arith.constant 36 : index
    %82 = vector.load %arg11[%c0_64, %c36_65] : memref<16x326xbf16, #tpu.memory_space<vmem>>, vector<16x288xbf16>
    %cst_66 = arith.constant dense<0.000000e+00> : vector<16x288xf32>
    %83 = tpu.matmul %81, %82, %cst_66 {dimension_numbers = #tpu.dot_dimension_numbers<[1], [0], [0], [1], [0, 0, 1, 1], [], []>} : vector<16x16xbf16>, vector<16x288xbf16>, vector<16x288xf32> -> vector<16x288xf32>
    %84 = arith.addf %80, %83 : vector<16x288xf32>
    %85 = vector.extract_strided_slice %56 {offsets = [112, 0], sizes = [16, 16], strides = [1, 1]} : vector<144x16xbf16> to vector<16x16xbf16>
    %c0_67 = arith.constant 0 : index
    %c37_68 = arith.constant 37 : index
    %86 = vector.load %arg11[%c0_67, %c37_68] : memref<16x326xbf16, #tpu.memory_space<vmem>>, vector<16x288xbf16>
    %cst_69 = arith.constant dense<0.000000e+00> : vector<16x288xf32>
    %87 = tpu.matmul %85, %86, %cst_69 {dimension_numbers = #tpu.dot_dimension_numbers<[1], [0], [0], [1], [0, 0, 1, 1], [], []>} : vector<16x16xbf16>, vector<16x288xbf16>, vector<16x288xf32> -> vector<16x288xf32>
    %88 = arith.addf %84, %87 : vector<16x288xf32>
    %89 = vector.extract_strided_slice %56 {offsets = [128, 0], sizes = [16, 16], strides = [1, 1]} : vector<144x16xbf16> to vector<16x16xbf16>
    %c0_70 = arith.constant 0 : index
    %c38_71 = arith.constant 38 : index
    %90 = vector.load %arg11[%c0_70, %c38_71] : memref<16x326xbf16, #tpu.memory_space<vmem>>, vector<16x288xbf16>
    %cst_72 = arith.constant dense<0.000000e+00> : vector<16x288xf32>
    %91 = tpu.matmul %89, %90, %cst_72 {dimension_numbers = #tpu.dot_dimension_numbers<[1], [0], [0], [1], [0, 0, 1, 1], [], []>} : vector<16x16xbf16>, vector<16x288xbf16>, vector<16x288xf32> -> vector<16x288xf32>
    %92 = arith.addf %88, %91 : vector<16x288xf32>
    %93 = vector.broadcast %57 : vector<16x1xf32> to vector<16x288xf32>
    %94 = arith.addf %92, %93 : vector<16x288xf32>
    %95 = vector.extract_strided_slice %94 {offsets = [0, 0], sizes = [16, 16], strides = [1, 1]} : vector<16x288xf32> to vector<16x16xf32>
    %c0_73 = arith.constant 0 : index
    %c0_74 = arith.constant 0 : index
    %c0_75 = arith.constant 0 : index
    %96 = vector.load %arg10[%c0_73, %c0_74, %c0_75] : memref<1x16x256xf32, #tpu.memory_space<vmem>>, vector<1x16x16xf32>
    %97 = vector.shape_cast %96 : vector<1x16x16xf32> to vector<16x16xf32>
    %98 = vector.shape_cast %95 : vector<16x16xf32> to vector<1x16x16xf32>
    tpu.vector_store %arg10[%c0_73, %c0_74, %c0_75], %98 {strides = array<i32>} : memref<1x16x256xf32, #tpu.memory_space<vmem>>, vector<1x16x16xf32>,
    %99 = vector.extract_strided_slice %94 {offsets = [0, 18], sizes = [16, 16], strides = [1, 1]} : vector<16x288xf32> to vector<16x16xf32>
    %c0_76 = arith.constant 0 : index
    %c0_77 = arith.constant 0 : index
    %c16 = arith.constant 16 : index
    %100 = vector.load %arg10[%c0_76, %c0_77, %c16] : memref<1x16x256xf32, #tpu.memory_space<vmem>>, vector<1x16x16xf32>
    %101 = vector.shape_cast %100 : vector<1x16x16xf32> to vector<16x16xf32>
    %102 = vector.shape_cast %99 : vector<16x16xf32> to vector<1x16x16xf32>
    tpu.vector_store %arg10[%c0_76, %c0_77, %c16], %102 {strides = array<i32>} : memref<1x16x256xf32, #tpu.memory_space<vmem>>, vector<1x16x16xf32>,
    %103 = vector.extract_strided_slice %94 {offsets = [0, 36], sizes = [16, 16], strides = [1, 1]} : vector<16x288xf32> to vector<16x16xf32>
    %c0_78 = arith.constant 0 : index
    %c0_79 = arith.constant 0 : index
    %c32 = arith.constant 32 : index
    %104 = vector.load %arg10[%c0_78, %c0_79, %c32] : memref<1x16x256xf32, #tpu.memory_space<vmem>>, vector<1x16x16xf32>
    %105 = vector.shape_cast %104 : vector<1x16x16xf32> to vector<16x16xf32>
    %106 = vector.shape_cast %103 : vector<16x16xf32> to vector<1x16x16xf32>
    tpu.vector_store %arg10[%c0_78, %c0_79, %c32], %106 {strides = array<i32>} : memref<1x16x256xf32, #tpu.memory_space<vmem>>, vector<1x16x16xf32>,
    %107 = vector.extract_strided_slice %94 {offsets = [0, 54], sizes = [16, 16], strides = [1, 1]} : vector<16x288xf32> to vector<16x16xf32>
    %c0_80 = arith.constant 0 : index
    %c0_81 = arith.constant 0 : index
    %c48 = arith.constant 48 : index
    %108 = vector.load %arg10[%c0_80, %c0_81, %c48] : memref<1x16x256xf32, #tpu.memory_space<vmem>>, vector<1x16x16xf32>
    %109 = vector.shape_cast %108 : vector<1x16x16xf32> to vector<16x16xf32>
    %110 = vector.shape_cast %107 : vector<16x16xf32> to vector<1x16x16xf32>
    tpu.vector_store %arg10[%c0_80, %c0_81, %c48], %110 {strides = array<i32>} : memref<1x16x256xf32, #tpu.memory_space<vmem>>, vector<1x16x16xf32>,
    %111 = vector.extract_strided_slice %94 {offsets = [0, 72], sizes = [16, 16], strides = [1, 1]} : vector<16x288xf32> to vector<16x16xf32>
    %c0_82 = arith.constant 0 : index
    %c0_83 = arith.constant 0 : index
    %c64 = arith.constant 64 : index
    %112 = vector.load %arg10[%c0_82, %c0_83, %c64] : memref<1x16x256xf32, #tpu.memory_space<vmem>>, vector<1x16x16xf32>
    %113 = vector.shape_cast %112 : vector<1x16x16xf32> to vector<16x16xf32>
    %114 = vector.shape_cast %111 : vector<16x16xf32> to vector<1x16x16xf32>
    tpu.vector_store %arg10[%c0_82, %c0_83, %c64], %114 {strides = array<i32>} : memref<1x16x256xf32, #tpu.memory_space<vmem>>, vector<1x16x16xf32>,
    %115 = vector.extract_strided_slice %94 {offsets = [0, 90], sizes = [16, 16], strides = [1, 1]} : vector<16x288xf32> to vector<16x16xf32>
    %c0_84 = arith.constant 0 : index
    %c0_85 = arith.constant 0 : index
    %c80 = arith.constant 80 : index
    %116 = vector.load %arg10[%c0_84, %c0_85, %c80] : memref<1x16x256xf32, #tpu.memory_space<vmem>>, vector<1x16x16xf32>
    %117 = vector.shape_cast %116 : vector<1x16x16xf32> to vector<16x16xf32>
    %118 = vector.shape_cast %115 : vector<16x16xf32> to vector<1x16x16xf32>
    tpu.vector_store %arg10[%c0_84, %c0_85, %c80], %118 {strides = array<i32>} : memref<1x16x256xf32, #tpu.memory_space<vmem>>, vector<1x16x16xf32>,
    %119 = vector.extract_strided_slice %94 {offsets = [0, 108], sizes = [16, 16], strides = [1, 1]} : vector<16x288xf32> to vector<16x16xf32>
    %c0_86 = arith.constant 0 : index
    %c0_87 = arith.constant 0 : index
    %c96 = arith.constant 96 : index
    %120 = vector.load %arg10[%c0_86, %c0_87, %c96] : memref<1x16x256xf32, #tpu.memory_space<vmem>>, vector<1x16x16xf32>
    %121 = vector.shape_cast %120 : vector<1x16x16xf32> to vector<16x16xf32>
    %122 = vector.shape_cast %119 : vector<16x16xf32> to vector<1x16x16xf32>
    tpu.vector_store %arg10[%c0_86, %c0_87, %c96], %122 {strides = array<i32>} : memref<1x16x256xf32, #tpu.memory_space<vmem>>, vector<1x16x16xf32>,
    %123 = vector.extract_strided_slice %94 {offsets = [0, 126], sizes = [16, 16], strides = [1, 1]} : vector<16x288xf32> to vector<16x16xf32>
    %c0_88 = arith.constant 0 : index
    %c0_89 = arith.constant 0 : index
    %c112 = arith.constant 112 : index
    %124 = vector.load %arg10[%c0_88, %c0_89, %c112] : memref<1x16x256xf32, #tpu.memory_space<vmem>>, vector<1x16x16xf32>
    %125 = vector.shape_cast %124 : vector<1x16x16xf32> to vector<16x16xf32>
    %126 = vector.shape_cast %123 : vector<16x16xf32> to vector<1x16x16xf32>
    tpu.vector_store %arg10[%c0_88, %c0_89, %c112], %126 {strides = array<i32>} : memref<1x16x256xf32, #tpu.memory_space<vmem>>, vector<1x16x16xf32>,
    %127 = vector.extract_strided_slice %94 {offsets = [0, 144], sizes = [16, 16], strides = [1, 1]} : vector<16x288xf32> to vector<16x16xf32>
    %c0_90 = arith.constant 0 : index
    %c0_91 = arith.constant 0 : index
    %c128 = arith.constant 128 : index
    %128 = vector.load %arg10[%c0_90, %c0_91, %c128] : memref<1x16x256xf32, #tpu.memory_space<vmem>>, vector<1x16x16xf32>
    %129 = vector.shape_cast %128 : vector<1x16x16xf32> to vector<16x16xf32>
    %130 = vector.shape_cast %127 : vector<16x16xf32> to vector<1x16x16xf32>
    tpu.vector_store %arg10[%c0_90, %c0_91, %c128], %130 {strides = array<i32>} : memref<1x16x256xf32, #tpu.memory_space<vmem>>, vector<1x16x16xf32>,
    %131 = vector.extract_strided_slice %94 {offsets = [0, 162], sizes = [16, 16], strides = [1, 1]} : vector<16x288xf32> to vector<16x16xf32>
    %c0_92 = arith.constant 0 : index
    %c0_93 = arith.constant 0 : index
    %c144 = arith.constant 144 : index
    %132 = vector.load %arg10[%c0_92, %c0_93, %c144] : memref<1x16x256xf32, #tpu.memory_space<vmem>>, vector<1x16x16xf32>
    %133 = vector.shape_cast %132 : vector<1x16x16xf32> to vector<16x16xf32>
    %134 = vector.shape_cast %131 : vector<16x16xf32> to vector<1x16x16xf32>
    tpu.vector_store %arg10[%c0_92, %c0_93, %c144], %134 {strides = array<i32>} : memref<1x16x256xf32, #tpu.memory_space<vmem>>, vector<1x16x16xf32>,
    %135 = vector.extract_strided_slice %94 {offsets = [0, 180], sizes = [16, 16], strides = [1, 1]} : vector<16x288xf32> to vector<16x16xf32>
    %c0_94 = arith.constant 0 : index
    %c0_95 = arith.constant 0 : index
    %c160 = arith.constant 160 : index
    %136 = vector.load %arg10[%c0_94, %c0_95, %c160] : memref<1x16x256xf32, #tpu.memory_space<vmem>>, vector<1x16x16xf32>
    %137 = vector.shape_cast %136 : vector<1x16x16xf32> to vector<16x16xf32>
    %138 = vector.shape_cast %135 : vector<16x16xf32> to vector<1x16x16xf32>
    tpu.vector_store %arg10[%c0_94, %c0_95, %c160], %138 {strides = array<i32>} : memref<1x16x256xf32, #tpu.memory_space<vmem>>, vector<1x16x16xf32>,
    %139 = vector.extract_strided_slice %94 {offsets = [0, 198], sizes = [16, 16], strides = [1, 1]} : vector<16x288xf32> to vector<16x16xf32>
    %c0_96 = arith.constant 0 : index
    %c0_97 = arith.constant 0 : index
    %c176 = arith.constant 176 : index
    %140 = vector.load %arg10[%c0_96, %c0_97, %c176] : memref<1x16x256xf32, #tpu.memory_space<vmem>>, vector<1x16x16xf32>
    %141 = vector.shape_cast %140 : vector<1x16x16xf32> to vector<16x16xf32>
    %142 = vector.shape_cast %139 : vector<16x16xf32> to vector<1x16x16xf32>
    tpu.vector_store %arg10[%c0_96, %c0_97, %c176], %142 {strides = array<i32>} : memref<1x16x256xf32, #tpu.memory_space<vmem>>, vector<1x16x16xf32>,
    %143 = vector.extract_strided_slice %94 {offsets = [0, 216], sizes = [16, 16], strides = [1, 1]} : vector<16x288xf32> to vector<16x16xf32>
    %c0_98 = arith.constant 0 : index
    %c0_99 = arith.constant 0 : index
    %c192 = arith.constant 192 : index
    %144 = vector.load %arg10[%c0_98, %c0_99, %c192] : memref<1x16x256xf32, #tpu.memory_space<vmem>>, vector<1x16x16xf32>
    %145 = vector.shape_cast %144 : vector<1x16x16xf32> to vector<16x16xf32>
    %146 = vector.shape_cast %143 : vector<16x16xf32> to vector<1x16x16xf32>
    tpu.vector_store %arg10[%c0_98, %c0_99, %c192], %146 {strides = array<i32>} : memref<1x16x256xf32, #tpu.memory_space<vmem>>, vector<1x16x16xf32>,
    %147 = vector.extract_strided_slice %94 {offsets = [0, 234], sizes = [16, 16], strides = [1, 1]} : vector<16x288xf32> to vector<16x16xf32>
    %c0_100 = arith.constant 0 : index
    %c0_101 = arith.constant 0 : index
    %c208 = arith.constant 208 : index
    %148 = vector.load %arg10[%c0_100, %c0_101, %c208] : memref<1x16x256xf32, #tpu.memory_space<vmem>>, vector<1x16x16xf32>
    %149 = vector.shape_cast %148 : vector<1x16x16xf32> to vector<16x16xf32>
    %150 = vector.shape_cast %147 : vector<16x16xf32> to vector<1x16x16xf32>
    tpu.vector_store %arg10[%c0_100, %c0_101, %c208], %150 {strides = array<i32>} : memref<1x16x256xf32, #tpu.memory_space<vmem>>, vector<1x16x16xf32>,
    %151 = vector.extract_strided_slice %94 {offsets = [0, 252], sizes = [16, 16], strides = [1, 1]} : vector<16x288xf32> to vector<16x16xf32>
    %c0_102 = arith.constant 0 : index
    %c0_103 = arith.constant 0 : index
    %c224 = arith.constant 224 : index
    %152 = vector.load %arg10[%c0_102, %c0_103, %c224] : memref<1x16x256xf32, #tpu.memory_space<vmem>>, vector<1x16x16xf32>
    %153 = vector.shape_cast %152 : vector<1x16x16xf32> to vector<16x16xf32>
    %154 = vector.shape_cast %151 : vector<16x16xf32> to vector<1x16x16xf32>
    tpu.vector_store %arg10[%c0_102, %c0_103, %c224], %154 {strides = array<i32>} : memref<1x16x256xf32, #tpu.memory_space<vmem>>, vector<1x16x16xf32>,
    %155 = vector.extract_strided_slice %94 {offsets = [0, 270], sizes = [16, 16], strides = [1, 1]} : vector<16x288xf32> to vector<16x16xf32>
    %c0_104 = arith.constant 0 : index
    %c0_105 = arith.constant 0 : index
    %c240 = arith.constant 240 : index
    %156 = vector.load %arg10[%c0_104, %c0_105, %c240] : memref<1x16x256xf32, #tpu.memory_space<vmem>>, vector<1x16x16xf32>
    %157 = vector.shape_cast %156 : vector<1x16x16xf32> to vector<16x16xf32>
    %158 = vector.shape_cast %155 : vector<16x16xf32> to vector<1x16x16xf32>
    tpu.vector_store %arg10[%c0_104, %c0_105, %c240], %158 {strides = array<i32>} : memref<1x16x256xf32, #tpu.memory_space<vmem>>, vector<1x16x16xf32>,
    return
  }
  func.func @transform_0(%arg0: i32, %arg1: memref<2xf32, #tpu.memory_space<smem>>) -> (i32, i32, i32) {
    %c0_i32 = arith.constant 0 : i32
    %c0_i32_0 = arith.constant 0 : i32
    %c0_i32_1 = arith.constant 0 : i32
    return %arg0, %c0_i32, %c0_i32_0 : i32, i32, i32
  }
  func.func @transform_1(%arg0: i32, %arg1: memref<2xf32, #tpu.memory_space<smem>>) -> (i32, i32) {
    %c0_i32 = arith.constant 0 : i32
    %c0_i32_0 = arith.constant 0 : i32
    %c0_i32_1 = arith.constant 0 : i32
    return %c0_i32, %c0_i32_0 : i32, i32
  }
  func.func @transform_2(%arg0: i32, %arg1: memref<2xf32, #tpu.memory_space<smem>>) -> (i32, i32) {
    %c0_i32 = arith.constant 0 : i32
    %c0_i32_0 = arith.constant 0 : i32
    %c0_i32_1 = arith.constant 0 : i32
    return %c0_i32, %c0_i32_0 : i32, i32
  }
  func.func @transform_3(%arg0: i32, %arg1: memref<2xf32, #tpu.memory_space<smem>>) -> (i32, i32, i32) {
    %c0_i32 = arith.constant 0 : i32
    %c0_i32_0 = arith.constant 0 : i32
    %c0_i32_1 = arith.constant 0 : i32
    %c0_i32_2 = arith.constant 0 : i32
    return %c0_i32, %c0_i32_0, %c0_i32_1 : i32, i32, i32
  }
  func.func @transform_4(%arg0: i32, %arg1: memref<2xf32, #tpu.memory_space<smem>>) -> (i32, i32, i32) {
    %c0_i32 = arith.constant 0 : i32
    %c0_i32_0 = arith.constant 0 : i32
    %c0_i32_1 = arith.constant 0 : i32
    %c0_i32_2 = arith.constant 0 : i32
    return %c0_i32, %c0_i32_0, %c0_i32_1 : i32, i32, i32
  }
  func.func @transform_5(%arg0: i32, %arg1: memref<2xf32, #tpu.memory_space<smem>>) -> (i32, i32) {
    %c0_i32 = arith.constant 0 : i32
    %c0_i32_0 = arith.constant 0 : i32
    %c0_i32_1 = arith.constant 0 : i32
    return %c0_i32, %c0_i32_0 : i32, i32
  }
  func.func @transform_6(%arg0: i32, %arg1: memref<2xf32, #tpu.memory_space<smem>>) -> (i32, i32) {
    %c0_i32 = arith.constant 0 : i32
    %c0_i32_0 = arith.constant 0 : i32
    %c0_i32_1 = arith.constant 0 : i32
    return %c0_i32, %c0_i32_0 : i32, i32
  }
  func.func @transform_7(%arg0: i32, %arg1: memref<2xf32, #tpu.memory_space<smem>>) -> (i32, i32) {
    %c0_i32 = arith.constant 0 : i32
    %c0_i32_0 = arith.constant 0 : i32
    %c0_i32_1 = arith.constant 0 : i32
    return %c0_i32, %c0_i32_0 : i32, i32
  }
  func.func @transform_8(%arg0: i32, %arg1: memref<2xf32, #tpu.memory_space<smem>>) -> (i32, i32, i32) {
    %c0_i32 = arith.constant 0 : i32
    %c0_i32_0 = arith.constant 0 : i32
    %c0_i32_1 = arith.constant 0 : i32
    return %arg0, %c0_i32, %c0_i32_0 : i32, i32, i32
  }
}

</mosaic_0001>

<bundles_post_ra>
// kernel: _lambda_.1
= control target key start
LH: loop header
LB: loop body
LE: loop exit
PB: predicated region body
PF: predicated region fallthrough
CT: control target
= control target key end

     0   :  { %s3859_s12 = smov [#allocation6]   ;;  %s4562_s0 = inlined_call_operand.vmem [shape: f32[2], index: 0, kind: input, shape index: {}]   ;;  %s4563_s1 = inlined_call_operand.vmem [shape: bf16[2,16,326], index: 1, kind: input, shape index: {}]   ;;  %s4564_s2 = inlined_call_operand.vmem [shape: bf16[144,16], index: 2, kind: input, shape index: {}]   ;;  %s4565_s3 = inlined_call_operand.vmem [shape: f32[16,1], index: 3, kind: input, shape index: {}]   ;;  %s4566_s4 = inlined_call_operand.vmem [shape: bf16[4,144,16], index: 4, kind: input, shape index: {}]   ;;  %s4567_s5 = inlined_call_operand.vmem [shape: f32[4,16,1], index: 5, kind: input, shape index: {}]   ;;  %s4568_s6 = inlined_call_operand.vmem [shape: bf16[144,16], index: 6, kind: input, shape index: {}]   ;;  %s4569_s7 = inlined_call_operand.vmem [shape: f32[16,1], index: 7, kind: input, shape index: {}]   ;;  %s4570_s8 = inlined_call_operand.vmem [shape: bf16[1,288], index: 8, kind: input, shape index: {}]   ;;  %s4571_s9 = inlined_call_operand.vmem [shape: f32[2,16,256], index: 9, kind: output, shape index: {}]  }
   0x1   :  { %s15_s11 = sshll.u32 %s4562_s0, 4  ;;  %s16_s11 = int_to_ptr.vmem [resolvable:$true] %s15_s11 }
   0x2   :  { %18 = dma.vmem_to_smem %s16_s11, 16, %s3859_s12, [#allocation5] }
   0x3   :  { %3849 = dma.done.wait [#allocation5], 16 }
   0x4   :  { %3850 = vsyncadd [#allocation5], 4294967280 }
   0x5   :  { %21 = sfence }
   0x6   :  { %s3945_s13 = smov 0  }
   0x7 LB: > { %s3381_s14 = sadd.s32 4294967295, %s3853_s13   ;;  %p3385_p0 = scmp.ge.s32.totalorder %s3853_s13, 1  ;;  %s3853_s13 = sphi %s3945_s13, %s27_s13  }
   0x8   : > { %p271_p1 = scmp.lt.s32.totalorder %s3853_s13, 3 }
   0xa   : > { %p272_p2 = pnand %p3385_p0, %p271_p1 }
   0xb   : > { %p305_p3 = scmp.lt.s32.totalorder (!%p272_p2), %s3381_s14, 1  ;;  %s3860_s22 = smov (!%p272_p2), 127  }
   0xc   : > { %275 = sbr.rel (%p272_p2) target bundleno = 2108 (0x83c), region = 52  ;;  %s3861_s23 = smov (!%p272_p2), 126  }
   0xd   : > { %s3862_s24 = smov (!%p272_p2), 110   ;;  %s3863_s25 = smov (!%p272_p2), 109  }
   0xe   : > { %s3864_s26 = smov (!%p272_p2), 108   ;;  %s4576_s27 = smov (!%p272_p2), 92  }
   0xf   : > { %s4574_s28 = smov (!%p272_p2), 91   ;;  %s4572_s29 = smov (!%p272_p2), 90  }
  0x10   : > { %s4083_s30 = smov (!%p272_p2), 0  }
  0x11   : > { %s4584_s14 = smov (!%p305_p3, %s3381_s14), 1  ;;  %vm322_vm0 = vcmask 568320   ;;  %v3720_v13 = vld [vmem:[%s4564_s2] sm:$0xff]  ;;  %vm380_vm1 = vcmask 130048   ;;  %vm490_vm2 = vcmask 1031168   ;;  %v3998_v18 = vld [vmem:[%s4564_s2 + $0x10] sm:$0xff] }
  0x12   : > { %s3771_s0 = smul.u32 24, %s4584_s14  ;;  %s3719_s15 = sshll.u32 %s4584_s14, 5  ;;  %v3992_v15 = vld [vmem:[%s4570_s8] sm:$0x7]  ;;  %vm374_vm3 = vcmask 1039360   ;;  %v3721_v20 = vld [vmem:[%s4564_s2 + $0x8] sm:$0xff] }
  0x13   : > { %s3956_s18 = scalar_lea.vmem %s4571_s9, %s3719_s15  ;;  %vm558_vm4 = vcmask 900096   ;;  %v3723_v33 = vld [vmem:[%s4564_s2 + $0x18] sm:$0xff]  ;;  %vm626_vm5 = vcmask 891904   ;;  %vm694_vm6 = vcmask 883712   ;;  %v3725_v42 = vld [vmem:[%s4564_s2 + $0x28] sm:$0xff]  ;;  %vm762_vm7 = vcmask 752640  }
  0x14   : > { %s309_s21 = scalar_lea.vmem %s4563_s1, %s3771_s0  ;;  %v3724_v49 = vld [vmem:[%s4564_s2 + $0x20] sm:$0xff]  ;;  %vm830_vm8 = vcmask 744448   ;;  %v3726_v54 = vld [vmem:[%s4564_s2 + $0x30] sm:$0xff]  ;;  %vm898_vm9 = vcmask 736256   ;;  %v3727_v58 = vld [vmem:[%s4564_s2 + $0x38] sm:$0xff]  ;;  %vm979_vm10 = vcmask 261120  }
  0x15   : > { %v318_v0 = vld [vmem:[%s309_s21 + $0x8] sm:$0xf]  ;;  %v320_v1 = vld [vmem:[%s309_s21 + $0x14] sm:$0xf]  ;;  %v317_v2 = vld [vmem:[%s309_s21] sm:$0xff] }
  0x16   : > { %323 = vst.msk [vmem:[#allocation2 + $0x8] sm:$0xf] %vm322_vm0, %v318_v0  ;;  %v319_v3 = vld [vmem:[%s309_s21 + $0xc] sm:$0xff]  ;;  %v344_v62 = vld [vmem:[%s4565_s3] sm:$0xff]  ;;  %v3868_v0 = vmov 0  }
  0x17   : > { %325 = vst.msk [vmem:[#allocation2 + $0x14] sm:$0xf] %vm322_vm0, %v320_v1  ;;  %v345_v63 = vld [vmem:[%s4565_s3 + $0x8] sm:$0xff]  ;;  %3821 = vset.pattern.permute.xlu0 %v3868_v0  ;;  %3822 = vset.pattern.permute.xlu1 %v3868_v0  ;;  %v3728_v1 = vld [vmem:[%s4564_s2 + $0x40] sm:$0xff] }
  0x18   : > { %321 = vst [vmem:[#allocation2] sm:$0xff] %v317_v2 }
  0x19   : > { %324 = vst [vmem:[#allocation2 + $0xc] sm:$0xff] %v319_v3 }
  0x1d   : > { %v3403_v4 = vld [vmem:[#allocation2 + $0x8] sm:$0xf] }
  0x1e   : > { %v3731_v5 = vld [vmem:[#allocation2 + $0x10] sm:$0xf0] }
  0x1f   : > { %v3404_v6 = vor.u32 %v3731_v5, %v3403_v4  ;;  %v3729_v7 = vld [vmem:[#allocation2 + $0x4] sm:$0xf]  ;;  %v3395_v8 = vld [vmem:[#allocation2] sm:$0xf] }
  0x20   : > { %v3397_v9 = vld [vmem:[#allocation2 + $0xc] sm:$0xf0]  ;;  %v3730_v10 = vld [vmem:[#allocation2 + $0x8] sm:$0xf0] }
  0x21   : > { %372 = vrot.lane.b32.xlu0 %v3404_v6, %s3860_s22  ;;  %v3400_v11 = vor.u32 %v3729_v7, %v3397_v9  ;;  %v3396_v12 = vor.u32 %v3730_v10, %v3395_v8 }
  0x23   : > { %370 = vrot.lane.b32.xlu1 %v3400_v11, %s3860_s22  ;;  %486 = vrot.lane.b32.xlu2 %v3400_v11, %s3861_s23 }
  0x24   : > { %444 = vmatpush.bf16.msra.mxu3 %v3396_v12 }
  0x27   : > { %3412 = vmatmul.msk.bf16.vlgmr.msra.gmra.mxu3 %vm380_vm1, %v3720_v13 }
  0x29   : > { %368 = vrot.lane.b32.xlu0 %v3396_v12, %s3860_s22 }
  0x2b   : > { %484 = vrot.lane.b32.xlu1 %v3396_v12, %s3861_s23  ;;  %488 = vrot.lane.b32.xlu2 %v3404_v6, %s3861_s23 }
  0x31   : > { %554 = vrot.lane.b32.xlu0 %v3400_v11, %s3862_s24 }
  0x33   : > { %556 = vrot.lane.b32.xlu1 %v3404_v6, %s3862_s24  ;;  %552 = vrot.lane.b32.xlu2 %v3396_v12, %s3862_s24 }
  0x39   : > { %624 = vrot.lane.b32.xlu0 %v3404_v6, %s3863_s25 }
  0x3b   : > { %620 = vrot.lane.b32.xlu1 %v3396_v12, %s3863_s25  ;;  %622 = vrot.lane.b32.xlu2 %v3400_v11, %s3863_s25 }
  0x41   : > { %688 = vrot.lane.b32.xlu0 %v3396_v12, %s3864_s26 }
  0x43   : > { %690 = vrot.lane.b32.xlu1 %v3400_v11, %s3864_s26  ;;  %756 = vrot.lane.b32.xlu2 %v3396_v12, %s4576_s27 }
  0x49   : > { %758 = vrot.lane.b32.xlu0 %v3400_v11, %s4576_s27 }
  0x4b   : > { %692 = vrot.lane.b32.xlu1 %v3404_v6, %s3864_s26  ;;  %760 = vrot.lane.b32.xlu2 %v3404_v6, %s4576_s27 }
  0x51   : > { %826 = vrot.lane.b32.xlu0 %v3400_v11, %s4574_s28 }
  0x53   : > { %828 = vrot.lane.b32.xlu1 %v3404_v6, %s4574_s28  ;;  %824 = vrot.lane.b32.xlu2 %v3396_v12, %s4574_s28 }
  0x59   : > { %896 = vrot.lane.b32.xlu0 %v3404_v6, %s4572_s29 }
  0x5b   : > { %892 = vrot.lane.b32.xlu1 %v3396_v12, %s4572_s29  ;;  %894 = vrot.lane.b32.xlu2 %v3400_v11, %s4572_s29 }
  0x61   : > { %957 = vperm.xlu0 %3821, %v344_v62  }
  0x63   : > { %962 = vperm.xlu1 %3822, %v345_v63  }
  0x7d   : > { %v487_v14 = vpop.permute.xlu2 %486 }
  0x85   : > { %v489_v16 = vpop.permute.xlu2 %488 }
  0x86   : > { %v492_v17 = vsel %vm490_vm2, %v487_v14, %v489_v16 }
  0x87   : > { %520 = vmatpush.bf16.msrb.mxu3 %v492_v17 }
  0x8a   : > { %3420 = vmatmul.msk.bf16.vlgmr.msrb.gmra.mxu3 %vm380_vm1, %v3998_v18 }
  0x8d   : > { %v553_v26 = vpop.permute.xlu2 %552 }
  0x93   : > { %v373_v19 = vpop.permute.xlu0 %372 }
  0x94   : > { %419 = vmatpush.bf16.msra.mxu2 %v373_v19 }
  0x95   : > { %v371_v21 = vpop.permute.xlu1 %370  ;;  %v623_v31 = vpop.permute.xlu2 %622 }
  0x96   : > { %v376_v22 = vsel %vm374_vm3, %v371_v21, %v373_v19 }
  0x97   : > { %405 = vmatpush.bf16.msra.mxu1 %v376_v22  ;;  %3407 = vmatmul.msk.bf16.vlgmr.msra.gmra.mxu2 %vm380_vm1, %v3721_v20 }
  0x9a   : > { %3406 = vmatmul.msk.bf16.vlgmr.msra.gmra.mxu1 %vm380_vm1, %v3721_v20 }
  0x9b   : > { %472 = vmatpush.bf16.msrb.mxu1 %v3404_v6  ;;  %v369_v23 = vpop.permute.xlu0 %368 }
  0x9c   : > { %v375_v24 = vsel %vm374_vm3, %v369_v23, %v371_v21 }
  0x9d   : > { %v485_v25 = vpop.permute.xlu1 %484  ;;  %391 = vmatpush.bf16.msra.mxu0 %v375_v24  ;;  %v757_v38 = vpop.permute.xlu2 %756 }
  0x9e   : > { %v491_v27 = vsel %vm490_vm2, %v485_v25, %v487_v14 }
  0x9f   : > { %506 = vmatpush.bf16.msrb.mxu2 %v491_v27 }
  0xa0   : > { %3405 = vmatmul.msk.bf16.vlgmr.msra.gmra.mxu0 %vm380_vm1, %v3721_v20 }
  0xa1   : > { %458 = vmatpush.bf16.msrb.mxu0 %v3400_v11 }
  0xa3   : > { %v555_v28 = vpop.permute.xlu0 %554 }
  0xa4   : > { %v559_v29 = vsel %vm558_vm4, %v553_v26, %v555_v28 }
  0xa5   : > { %534 = vmatpush.bf16.msra.mxu0 %v489_v16  ;;  %v557_v30 = vpop.permute.xlu1 %556  ;;  %574 = vmatpush.bf16.msra.mxu1 %v559_v29  ;;  %v761_v43 = vpop.permute.xlu2 %760 }
  0xa6   : > { %v560_v32 = vsel %vm558_vm4, %v555_v28, %v557_v30  ;;  %602 = vmatpush.bf16.msra.mxu3 %v557_v30 }
  0xa7   : > { %3419 = vmatmul.msk.bf16.vlgmr.msrb.gmra.mxu2 %vm380_vm1, %v3998_v18 }
  0xa8   : > { %588 = vmatpush.bf16.msra.mxu2 %v560_v32 }
  0xa9   : > { %3428 = vmatmul.msk.bf16.vlgmr.msra.gmra.mxu3 %vm380_vm1, %v3723_v33 }
  0xaa   : > { %3414 = vmatmul.msk.bf16.vlgmr.msrb.gmra.mxu1 %vm380_vm1, %v3720_v13  ;;  %v446_v2 = vpop.f32.mrf.mxu3 }
  0xab   : > { %v625_v34 = vpop.permute.xlu0 %624 }
  0xac   : > { %v628_v35 = vsel %vm626_vm5, %v623_v31, %v625_v34  ;;  %670 = vmatpush.bf16.msrb.mxu2 %v625_v34 }
  0xad   : > { %v621_v36 = vpop.permute.xlu1 %620  ;;  %656 = vmatpush.bf16.msrb.mxu1 %v628_v35  ;;  %v825_v51 = vpop.permute.xlu2 %824 }
  0xae   : > { %v627_v37 = vsel %vm626_vm5, %v621_v36, %v623_v31 }
  0xb0   : > { %3413 = vmatmul.msk.bf16.vlgmr.msrb.gmra.mxu0 %vm380_vm1, %v3720_v13 }
  0xb1   : > { %642 = vmatpush.bf16.msrb.mxu0 %v627_v37 }
  0xb2   : > { %v448_v5 = vpop.f32.mrf.mxu3 }
  0xb3   : > { %v689_v39 = vpop.permute.xlu0 %688 }
  0xb5   : > { %v691_v40 = vpop.permute.xlu1 %690  ;;  %v895_v57 = vpop.permute.xlu2 %894 }
  0xb6   : > { %v695_v41 = vsel %vm694_vm6, %v689_v39, %v691_v40 }
  0xb7   : > { %3427 = vmatmul.msk.bf16.vlgmr.msra.gmra.mxu2 %vm380_vm1, %v3723_v33  ;;  %710 = vmatpush.bf16.msrb.mxu3 %v695_v41 }
  0xba   : > { %3426 = vmatmul.msk.bf16.vlgmr.msra.gmra.mxu1 %vm380_vm1, %v3723_v33  ;;  %3440 = vmatmul.msk.bf16.vlgmr.msrb.gmra.mxu3 %vm380_vm1, %v3725_v42 }
  0xbb   : > { %v759_v44 = vpop.permute.xlu0 %758 }
  0xbc   : > { %v763_v45 = vsel %vm762_vm7, %v757_v38, %v759_v44  ;;  %v764_v46 = vsel %vm762_vm7, %v759_v44, %v761_v43 }
  0xbd   : > { %v693_v47 = vpop.permute.xlu1 %692  ;;  %778 = vmatpush.bf16.msra.mxu2 %v763_v45  ;;  %792 = vmatpush.bf16.msra.mxu3 %v764_v46 }
  0xbe   : > { %v696_v48 = vsel %vm694_vm6, %v691_v40, %v693_v47  ;;  %738 = vmatpush.bf16.msra.mxu1 %v693_v47 }
  0xc0   : > { %3421 = vmatmul.msk.bf16.vlgmr.msra.gmra.mxu0 %vm380_vm1, %v3998_v18 }
  0xc1   : > { %724 = vmatpush.bf16.msra.mxu0 %v696_v48 }
  0xc3   : > { %v827_v50 = vpop.permute.xlu0 %826 }
  0xc4   : > { %v831_v55 = vsel %vm830_vm8, %v825_v51, %v827_v50 }
  0xc5   : > { %v829_v52 = vpop.permute.xlu1 %828 }
  0xc6   : > { %v832_v53 = vsel %vm830_vm8, %v827_v50, %v829_v52  ;;  %874 = vmatpush.bf16.msrb.mxu3 %v829_v52 }
  0xc7   : > { %3435 = vmatmul.msk.bf16.vlgmr.msrb.gmra.mxu2 %vm380_vm1, %v3724_v49 }
  0xc8   : > { %860 = vmatpush.bf16.msrb.mxu2 %v832_v53 }
  0xca   : > { %3434 = vmatmul.msk.bf16.vlgmr.msrb.gmra.mxu1 %vm380_vm1, %v3724_v49  ;;  %3448 = vmatmul.msk.bf16.vlgmr.msra.gmra.mxu3 %vm380_vm1, %v3726_v54 }
  0xcb   : > { %846 = vmatpush.bf16.msrb.mxu1 %v831_v55  ;;  %v897_v56 = vpop.permute.xlu0 %896 }
  0xcc   : > { %v900_v59 = vsel %vm898_vm9, %v895_v57, %v897_v56 }
  0xcd   : > { %v893_v60 = vpop.permute.xlu1 %892 }
  0xce   : > { %v899_v61 = vsel %vm898_vm9, %v893_v60, %v895_v57 }
  0xd0   : > { %3433 = vmatmul.msk.bf16.vlgmr.msrb.gmra.mxu0 %vm380_vm1, %v3724_v49 }
  0xd1   : > { %806 = vmatpush.bf16.msrb.mxu0 %v761_v43 }
  0xd7   : > { %3447 = vmatmul.msk.bf16.vlgmr.msra.gmra.mxu2 %vm380_vm1, %v3726_v54 }
  0xd8   : > { %942 = vmatpush.bf16.msra.mxu2 %v897_v56 }
  0xda   : > { %3442 = vmatmul.msk.bf16.vlgmr.msra.gmra.mxu1 %vm380_vm1, %v3725_v42  ;;  %3456 = vmatmul.msk.bf16.vlgmr.msrb.gmra.mxu3 %vm380_vm1, %v3727_v58 }
  0xdb   : > { %928 = vmatpush.bf16.msra.mxu1 %v900_v59 }
  0xe0   : > { %3441 = vmatmul.msk.bf16.vlgmr.msra.gmra.mxu0 %vm380_vm1, %v3725_v42 }
  0xe1   : > { %914 = vmatpush.bf16.msra.mxu0 %v899_v61 }
  0xe7   : > { %3455 = vmatmul.msk.bf16.vlgmr.msrb.gmra.mxu2 %vm380_vm1, %v3727_v58 }
  0xea   : > { %3454 = vmatmul.msk.bf16.vlgmr.msrb.gmra.mxu1 %vm380_vm1, %v3727_v58 }
  0xf0   : > { %3449 = vmatmul.msk.bf16.vlgmr.msrb.gmra.mxu0 %vm380_vm1, %v3726_v54 }
  0xf7   : > { %3463 = vmatmul.msk.bf16.vlgmr.msra.gmra.mxu2 %vm380_vm1, %v3728_v1 }
  0xfa   : > { %3462 = vmatmul.msk.bf16.vlgmr.msra.gmra.mxu1 %vm380_vm1, %v3728_v1 }
 0x100   : > { %3461 = vmatmul.msk.bf16.vlgmr.msra.gmra.mxu0 %vm380_vm1, %v3728_v1 }
 0x10d   : > { %v522_v10 = vpop.f32.mrf.mxu3 }
 0x115   : > { %v524_v19 = vpop.f32.mrf.mxu3 }
 0x117   : > { %v407_v3 = vpop.f32.mrf.mxu1 }
 0x11a   : > { %v421_v4 = vpop.f32.mrf.mxu2 }
 0x11d   : > { %v393_v6 = vpop.f32.mrf.mxu0 }
 0x11e   : > { %v447_v7 = vadd.f32 %v446_v2, %v393_v6 }
 0x11f   : > { %v409_v8 = vpop.f32.mrf.mxu1 }
 0x122   : > { %v423_v9 = vpop.f32.mrf.mxu2 }
 0x125   : > { %v395_v11 = vpop.f32.mrf.mxu0 }
 0x126   : > { %v449_v12 = vadd.f32 %v448_v5, %v395_v11 }
 0x127   : > { %v474_v13 = vpop.f32.mrf.mxu1 }
 0x128   : > { %v475_v14 = vadd.f32 %v474_v13, %v421_v4 }
 0x12a   : > { %v508_v16 = vpop.f32.mrf.mxu2 }
 0x12b   : > { %v541_v17 = vadd.f32 %v508_v16, %v447_v7 }
 0x12c   : > { %v604_v26 = vpop.f32.mrf.mxu3 }
 0x12d   : > { %v460_v18 = vpop.f32.mrf.mxu0 }
 0x12e   : > { %v461_v48 = vadd.f32 %v460_v18, %v407_v3 }
 0x12f   : > { %v476_v20 = vpop.f32.mrf.mxu1 }
 0x130   : > { %v477_v21 = vadd.f32 %v476_v20, %v423_v9  ;;  %v542_v50 = vadd.f32 %v522_v10, %v461_v48 }
 0x132   : > { %v510_v22 = vpop.f32.mrf.mxu2 }
 0x133   : > { %v544_v23 = vadd.f32 %v510_v22, %v449_v12 }
 0x134   : > { %v606_v31 = vpop.f32.mrf.mxu3 }
 0x135   : > { %v462_v24 = vpop.f32.mrf.mxu0 }
 0x136   : > { %v463_v56 = vadd.f32 %v462_v24, %v409_v8 }
 0x137   : > { %v576_v25 = vpop.f32.mrf.mxu1 }
 0x138   : > { %v609_v62 = vadd.f32 %v576_v25, %v541_v17  ;;  %v545_v63 = vadd.f32 %v524_v19, %v463_v56 }
 0x13a   : > { %v590_v27 = vpop.f32.mrf.mxu2 }
 0x13b   : > { %v610_v54 = vadd.f32 %v590_v27, %v542_v50 }
 0x13d   : > { %v536_v28 = vpop.f32.mrf.mxu0  ;;  %v712_v35 = vpop.f32.mrf.mxu3 }
 0x13e   : > { %v543_v53 = vadd.f32 %v536_v28, %v475_v14  ;;  %v958_v14 = vpop.permute.xlu0 %957 }
 0x13f   : > { %v578_v29 = vpop.f32.mrf.mxu1 }
 0x140   : > { %v611_v58 = vadd.f32 %v604_v26, %v543_v53  ;;  %v612_v19 = vadd.f32 %v578_v29, %v544_v23  ;;  %v963_v29 = vpop.permute.xlu1 %962 }
 0x142   : > { %v592_v30 = vpop.f32.mrf.mxu2 }
 0x143   : > { %v613_v5 = vadd.f32 %v592_v30, %v545_v63 }
 0x145   : > { %v538_v32 = vpop.f32.mrf.mxu0  ;;  %v4073_v40 = vpop.f32.mrf.mxu3 }
 0x146   : > { %v546_v2 = vadd.f32 %v538_v32, %v477_v21 }
 0x147   : > { %v658_v33 = vpop.f32.mrf.mxu1 }
 0x148   : > { %v678_v57 = vadd.f32 %v658_v33, %v610_v54  ;;  %v614_v13 = vadd.f32 %v606_v31, %v546_v2 }
 0x14a   : > { %v672_v34 = vpop.f32.mrf.mxu2 }
 0x14b   : > { %v679_v61 = vadd.f32 %v672_v34, %v611_v58 }
 0x14d   : > { %v644_v36 = vpop.f32.mrf.mxu0  ;;  %v794_v45 = vpop.f32.mrf.mxu3 }
 0x14e   : > { %v677_v3 = vadd.f32 %v644_v36, %v609_v62 }
 0x14f   : > { %v660_v37 = vpop.f32.mrf.mxu1 }
 0x150   : > { %v681_v11 = vadd.f32 %v660_v37, %v613_v5  ;;  %v745_v16 = vadd.f32 %v712_v35, %v677_v3 }
 0x152   : > { %v674_v38 = vpop.f32.mrf.mxu2 }
 0x153   : > { %v682_v22 = vadd.f32 %v674_v38, %v614_v13 }
 0x155   : > { %v646_v39 = vpop.f32.mrf.mxu0  ;;  %v796_v51 = vpop.f32.mrf.mxu3 }
 0x156   : > { %v680_v28 = vadd.f32 %v646_v39, %v612_v19 }
 0x157   : > { %v740_v41 = vpop.f32.mrf.mxu1 }
 0x158   : > { %v747_v4 = vadd.f32 %v740_v41, %v679_v61 }
 0x15a   : > { %v780_v42 = vpop.f32.mrf.mxu2 }
 0x15b   : > { %v813_v24 = vadd.f32 %v780_v42, %v745_v16  ;;  %v748_v42 = vadd.f32 %v4073_v40, %v680_v28 }
 0x15d   : > { %v726_v43 = vpop.f32.mrf.mxu0  ;;  %v876_v7 = vpop.f32.mrf.mxu3 }
 0x15e   : > { %v746_v60 = vadd.f32 %v726_v43, %v678_v57 }
 0x15f   : > { %v742_v44 = vpop.f32.mrf.mxu1 }
 0x160   : > { %v814_v6 = vadd.f32 %v794_v45, %v746_v60  ;;  %v750_v26 = vadd.f32 %v742_v44, %v682_v22 }
 0x162   : > { %v4075_v46 = vpop.f32.mrf.mxu2 }
 0x163   : > { %v816_v45 = vadd.f32 %v4075_v46, %v748_v42 }
 0x165   : > { %v728_v47 = vpop.f32.mrf.mxu0  ;;  %v878_v35 = vpop.f32.mrf.mxu3 }
 0x166   : > { %v749_v18 = vadd.f32 %v728_v47, %v681_v11 }
 0x167   : > { %v848_v49 = vpop.f32.mrf.mxu1 }
 0x168   : > { %v881_v30 = vadd.f32 %v848_v49, %v813_v24  ;;  %v817_v32 = vadd.f32 %v796_v51, %v749_v18 }
 0x16a   : > { %v862_v52 = vpop.f32.mrf.mxu2 }
 0x16b   : > { %v882_v12 = vadd.f32 %v862_v52, %v814_v6 }
 0x16d   : > { %v808_v55 = vpop.f32.mrf.mxu0 }
 0x16e   : > { %v815_v9 = vadd.f32 %v808_v55, %v747_v4 }
 0x16f   : > { %v850_v59 = vpop.f32.mrf.mxu1 }
 0x170   : > { %v883_v17 = vadd.f32 %v876_v7, %v815_v9  ;;  %v884_v51 = vadd.f32 %v850_v59, %v816_v45 }
 0x172   : > { %v864_v1 = vpop.f32.mrf.mxu2 }
 0x173   : > { %v885_v37 = vadd.f32 %v864_v1, %v817_v32 }
 0x175   : > { %v810_v10 = vpop.f32.mrf.mxu0 }
 0x176   : > { %v818_v34 = vadd.f32 %v810_v10, %v750_v26 }
 0x177   : > { %v930_v8 = vpop.f32.mrf.mxu1 }
 0x178   : > { %v950_v20 = vadd.f32 %v930_v8, %v882_v12  ;;  %v886_v39 = vadd.f32 %v878_v35, %v818_v34 }
 0x17a   : > { %v966_v21 = vadd.f32 %v958_v14, %v950_v20  ;;  %v944_v25 = vpop.f32.mrf.mxu2 }
 0x17b   : > { %v951_v27 = vadd.f32 %v944_v25, %v883_v17 }
 0x17c   : > { %v972_v33 = vmax.f32 %v966_v21, 0.0 }
 0x17d   : > { %v967_v36 = vadd.f32 %v958_v14, %v951_v27  ;;  %v916_v31 = vpop.f32.mrf.mxu0 }
 0x17e   : > { %978 = vst [vmem:[#allocation3 + $0x8] sm:$0xff] %v972_v33  ;;  %v949_v41 = vadd.f32 %v916_v31, %v881_v30 }
 0x17f   : > { %991 = vst [vmem:[#allocation4 + $0x8] sm:$0xff] %v972_v33  ;;  %v973_v38 = vmax.f32 %v967_v36, 0.0  ;;  %v932_v23 = vpop.f32.mrf.mxu1 }
 0x180   : > { %v965_v43 = vadd.f32 %v958_v14, %v949_v41  ;;  %v953_v44 = vadd.f32 %v932_v23, %v885_v37 }
 0x181   : > { %980 = vst.msk [vmem:[#allocation3 + $0x10] sm:$0xff] %vm979_vm10, %v973_v38 }
 0x182   : > { %v971_v47 = vmax.f32 %v965_v43, 0.0  ;;  %v969_v48 = vadd.f32 %v963_v29, %v953_v44  ;;  %v946_v49 = vpop.f32.mrf.mxu2 }
 0x183   : > { %v954_v50 = vadd.f32 %v946_v49, %v886_v39 }
 0x184   : > { %977 = vst [vmem:[#allocation3] sm:$0xff] %v971_v47  ;;  %v975_v52 = vmax.f32 %v969_v48, 0.0 }
 0x185   : > { %990 = vst [vmem:[#allocation4] sm:$0xff] %v971_v47  ;;  %v970_v53 = vadd.f32 %v963_v29, %v954_v50  ;;  %v918_v54 = vpop.f32.mrf.mxu0 }
 0x186   : > { %982 = vst [vmem:[#allocation3 + $0x20] sm:$0xff] %v975_v52  ;;  %v952_v55 = vadd.f32 %v918_v54, %v884_v51 }
 0x187   : > { %994 = vst [vmem:[#allocation4 + $0x20] sm:$0xff] %v975_v52  ;;  %v976_v40 = vmax.f32 %v970_v53, 0.0 }
 0x188   : > { %v986_v56 = vld [vmem:[#allocation3 + $0x10] sm:$0xff]  ;;  %v968_v57 = vadd.f32 %v963_v29, %v952_v55 }
 0x189   : > { %992 = vst.msk [vmem:[#allocation4 + $0x10] sm:$0xff] %vm979_vm10, %v986_v56 }
 0x18a   : > { %983 = vst.msk [vmem:[#allocation3 + $0x28] sm:$0xff] %vm979_vm10, %v976_v40  ;;  %v974_v46 = vmax.f32 %v968_v57, 0.0 }
 0x18c   : > { %981 = vst [vmem:[#allocation3 + $0x18] sm:$0xff] %v974_v46 }
 0x18d   : > { %993 = vst [vmem:[#allocation4 + $0x18] sm:$0xff] %v974_v46 }
 0x191   : > { %v989_v58 = vld [vmem:[#allocation3 + $0x28] sm:$0xff] }
 0x192   : > { %995 = vst.msk [vmem:[#allocation4 + $0x28] sm:$0xff] %vm979_vm10, %v989_v58 }
 0x193 LB: >> { %1013 = vst [vmem:[#allocation1] ss:$9 sm:$0xff] %v3992_v15  ;;  %v1002_v59 = vld [vmem:[#allocation4] sm:$0xff]  ;;  %v1003_v60 = vld [vmem:[#allocation4 + $0x8] sm:$0xff]  ;;  %v1004_v61 = vld [vmem:[#allocation4 + $0x10] sm:$0xff]  ;;  %s3869_s10 = smov 19   ;;  %s3857_s30 = sphi %s4083_s30, %s1001_s30  }
 0x194   : >> { %v1008_v62 = vpack.c.bf16 %v1003_v60, %v1002_v59  ;;  %v1009_v63 = vpack.c.bf16 %v1004_v61, %v1004_v61  ;;  %v1005_v1 = vld [vmem:[#allocation4 + $0x18] sm:$0xff]  ;;  %v1006_v2 = vld [vmem:[#allocation4 + $0x20] sm:$0xff]  ;;  %vm1068_vm11 = vcmask 1043608   ;;  %vm1069_vm12 = vcmask 1047556   ;;  %s3870_s11 = smov 126   ;;  %s3871_s12 = smov 127  }
 0x195   : >> { %v1010_v13 = vpack.c.bf16 %v1006_v2, %v1005_v1  ;;  %vm1059_vm13 = vcmask 154624   ;;  %vm4105_vm14 = vmor %vm1069_vm12, %vm1068_vm11  ;;  %vm1072_vm15 = vcmask 412672   ;;  %s3872_s14 = smov 110   ;;  %s3873_s0 = smov 109  }
 0x196   : >> { %v1026_v11 = vunpack.c.l.bf16 %v1008_v62  ;;  %v1027_v12 = vunpack.c.h.bf16 %v1008_v62  ;;  %v1028_v20 = vunpack.c.l.bf16 %v1009_v63  ;;  %s3874_s15 = smov 108   ;;  %s3875_s16 = smov 92  }
 0x197   : >> { %v1029_v24 = vunpack.c.l.bf16 %v1010_v13  ;;  %v1030_v21 = vunpack.c.h.bf16 %v1010_v13  ;;  %s3876_s17 = smov 91   ;;  %s3877_s19 = smov 90  }
 0x198   : >> { %s3732_s20 = smul.u32 144, %s3857_s30  ;;  %s3742_s29 = sshll.u32 %s3857_s30, 5 }
 0x199   : >> { %v1007_v4 = vld [vmem:[#allocation4 + $0x28] sm:$0xff]  ;;  %s4185_s27 = scalar_lea.vmem %s4567_s5, %s3742_s29 }
 0x19a   : >> { %v1014_v5 = vld [vmem:[#allocation1] sm:$0xff]  ;;  %v1015_v3 = vld [vmem:[#allocation1 + $0x9] sm:$0xff]  ;;  %v1016_v6 = vld [vmem:[#allocation1 + $0x12] sm:$0xff]  ;;  %v1011_v8 = vpack.c.bf16 %v1007_v4, %v1007_v4  ;;  %s4147_s28 = scalar_lea.vmem %s4566_s4, %s3732_s20 }
 0x19b   : >> { %v1017_v7 = vpack.i.b16 %v1014_v5, %v1014_v5  ;;  %v1020_v9 = vpack.i.b16 %v1015_v3, %v1015_v3  ;;  %v1023_v10 = vpack.i.b16 %v1016_v6, %v1016_v6  ;;  %v3733_v56 = vld [vmem:[%s4147_s28] sm:$0xff]  ;;  %v3734_v59 = vld [vmem:[%s4147_s28 + $0x8] sm:$0xff] }
 0x19c   : >> { %v1031_v28 = vunpack.c.l.bf16 %v1011_v8 }
 0x19d   : >> { %v1019_v14 = vperm.slane %v1017_v7, 0  ;;  %v1022_v16 = vperm.slane %v1020_v9, 0  ;;  %v1025_v18 = vperm.slane %v1023_v10, 0  ;;  %v3735_v7 = vld [vmem:[%s4147_s28 + $0x10] sm:$0xff] }
 0x19f   : >> { %v4089_v22 = vunpack.c.l.bf16 %v1019_v14  ;;  %v4091_v17 = vunpack.c.l.bf16 %v1022_v16  ;;  %v4093_v19 = vunpack.c.l.bf16 %v1025_v18 }
 0x1a1   : >> { %v1035_v25 = vmul.f32 %v4089_v22, %v1026_v11  ;;  %v1036_v26 = vmul.f32 %v4091_v17, %v1027_v12  ;;  %v1037_v27 = vmul.f32 %v4093_v19, %v1028_v20  ;;  %v1038_v33 = vmul.f32 %v4089_v22, %v1029_v24  ;;  %v3736_v24 = vld [vmem:[%s4147_s28 + $0x18] sm:$0xff] }
 0x1a2   : >> { %v1039_v34 = vmul.f32 %v4091_v17, %v1030_v21  ;;  %v1040_v36 = vmul.f32 %v4093_v19, %v1031_v28 }
 0x1a3   : >> { %v1041_v30 = vpack.c.bf16 %v1036_v26, %v1035_v25  ;;  %v1042_v32 = vpack.c.bf16 %v1037_v27, %v1037_v27  ;;  %v3737_v27 = vld [vmem:[%s4147_s28 + $0x20] sm:$0xff] }
 0x1a4   : >> { %v1043_v31 = vpack.c.bf16 %v1039_v34, %v1038_v33  ;;  %v1044_v37 = vpack.c.bf16 %v1040_v36, %v1040_v36  ;;  %v3738_v36 = vld [vmem:[%s4147_s28 + $0x28] sm:$0xff] }
 0x1a5   : >> { %1049 = vrot.lane.b32.xlu0 %v1041_v30, %s3869_s10  ;;  %1051 = vrot.lane.b32.xlu1 %v1042_v32, %s3869_s10 }
 0x1ad   : >> { %1053 = vrot.lane.b32.xlu0 %v1043_v31, %s3869_s10  ;;  %1055 = vrot.lane.b32.xlu1 %v1044_v37, %s3869_s10 }
 0x217   : >> { %v1050_v35 = vpop.permute.xlu0 %1049  ;;  %v1052_v41 = vpop.permute.xlu1 %1051 }
 0x218   : >> { %v1057_v23 = vrot.slane %v1050_v35, 4 }
 0x21a   : >> { %v1060_v29 = vsel %vm1059_vm13, %v1057_v23, %v1050_v35  ;;  %v1061_v42 = vsel %vm1059_vm13, %v1057_v23, %v1052_v41 }
 0x21b   : >> { %1071 = vst.msk [vmem:[#allocation2] sm:$0xff] %vm4105_vm14, %v1060_v29 }
 0x21c   : >> { %1073 = vst.msk [vmem:[#allocation2 + $0x8] sm:$0xf] %vm1072_vm15, %v1061_v42 }
 0x21f   : >> { %v1054_v43 = vpop.permute.xlu0 %1053  ;;  %v1056_v44 = vpop.permute.xlu1 %1055 }
 0x220   : >> { %v1058_v39 = vrot.slane %v1054_v43, 4 }
 0x222   : >> { %v1062_v45 = vsel %vm1059_vm13, %v1058_v39, %v1054_v43  ;;  %v1063_v47 = vsel %vm1059_vm13, %v1058_v39, %v1056_v44  ;;  %v3474_v48 = vld [vmem:[#allocation2] sm:$0xf]  ;;  %v3743_v55 = vld [vmem:[#allocation2 + $0x4] sm:$0xf]  ;;  %v1100_v43 = vld [vmem:[%s4185_s27] sm:$0xff]  ;;  %v3878_v44 = vmov 0  }
 0x223   : >> { %1074 = vst.msk [vmem:[#allocation2 + $0xc] sm:$0xff] %vm4105_vm14, %v1062_v45  ;;  %v3482_v50 = vld [vmem:[#allocation2 + $0x8] sm:$0xf]  ;;  %3823 = vset.pattern.permute.xlu1 %v3878_v44  ;;  %3824 = vset.pattern.permute.xlu2 %v3878_v44 }
 0x224   : >> { %1075 = vst.msk [vmem:[#allocation2 + $0x14] sm:$0xf] %vm1072_vm15, %v1063_v47  ;;  %3825 = vset.pattern.permute.xlu0 %v3878_v44  ;;  %v3739_v39 = vld [vmem:[%s4147_s28 + $0x30] sm:$0xff] }
 0x22a   : >> { %v3744_v49 = vld [vmem:[#allocation2 + $0x8] sm:$0xf0]  ;;  %v3476_v54 = vld [vmem:[#allocation2 + $0xc] sm:$0xf0] }
 0x22b   : >> { %v3475_v51 = vor.u32 %v3744_v49, %v3474_v48  ;;  %v3745_v52 = vld [vmem:[#allocation2 + $0x10] sm:$0xf0]  ;;  %v3479_v40 = vor.u32 %v3743_v55, %v3476_v54  ;;  %v3741_v49 = vld [vmem:[%s4147_s28 + $0x40] sm:$0xff] }
 0x22c   : >> { %v3483_v53 = vor.u32 %v3745_v52, %v3482_v50  ;;  %v3740_v48 = vld [vmem:[%s4147_s28 + $0x38] sm:$0xff]  ;;  %v1101_v50 = vld [vmem:[%s4185_s27 + $0x8] sm:$0xff] }
 0x22d   : >> { %1238 = vrot.lane.b32.xlu1 %v3475_v51, %s3870_s11  ;;  %1124 = vrot.lane.b32.xlu2 %v3475_v51, %s3871_s12 }
 0x22e   : >> { %1128 = vrot.lane.b32.xlu0 %v3483_v53, %s3871_s12  ;;  %1198 = vmatpush.bf16.msra.mxu3 %v3475_v51 }
 0x231   : >> { %3491 = vmatmul.msk.bf16.vlgmr.msra.gmra.mxu3 %vm380_vm1, %v3733_v56 }
 0x235   : >> { %1305 = vrot.lane.b32.xlu1 %v3475_v51, %s3872_s14  ;;  %1126 = vrot.lane.b32.xlu2 %v3479_v40, %s3871_s12 }
 0x236   : >> { %1242 = vrot.lane.b32.xlu0 %v3483_v53, %s3870_s11 }
 0x23d   : >> { %1372 = vrot.lane.b32.xlu1 %v3475_v51, %s3873_s0  ;;  %1240 = vrot.lane.b32.xlu2 %v3479_v40, %s3870_s11 }
 0x23e   : >> { %1309 = vrot.lane.b32.xlu0 %v3483_v53, %s3872_s14 }
 0x245   : >> { %1439 = vrot.lane.b32.xlu1 %v3475_v51, %s3874_s15  ;;  %1307 = vrot.lane.b32.xlu2 %v3479_v40, %s3872_s14 }
 0x246   : >> { %1376 = vrot.lane.b32.xlu0 %v3483_v53, %s3873_s0 }
 0x24d   : >> { %1506 = vrot.lane.b32.xlu1 %v3475_v51, %s3875_s16  ;;  %1374 = vrot.lane.b32.xlu2 %v3479_v40, %s3873_s0 }
 0x24e   : >> { %1443 = vrot.lane.b32.xlu0 %v3483_v53, %s3874_s15 }
 0x255   : >> { %1573 = vrot.lane.b32.xlu1 %v3475_v51, %s3876_s17  ;;  %1441 = vrot.lane.b32.xlu2 %v3479_v40, %s3874_s15 }
 0x256   : >> { %1510 = vrot.lane.b32.xlu0 %v3483_v53, %s3875_s16 }
 0x25d   : >> { %1640 = vrot.lane.b32.xlu1 %v3475_v51, %s3877_s19  ;;  %1508 = vrot.lane.b32.xlu2 %v3479_v40, %s3875_s16 }
 0x25e   : >> { %1577 = vrot.lane.b32.xlu0 %v3483_v53, %s3876_s17 }
 0x265   : >> { %1575 = vrot.lane.b32.xlu2 %v3479_v40, %s3876_s17  ;;  %1704 = vperm.xlu1 %3823, %v1100_v43  }
 0x266   : >> { %1644 = vrot.lane.b32.xlu0 %v3483_v53, %s3877_s19 }
 0x26d   : >> { %1642 = vrot.lane.b32.xlu2 %v3479_v40, %s3877_s19 }
 0x275   : >> { %1709 = vperm.xlu2 %3824, %v1101_v50  }
 0x287   : >> { %v1125_v57 = vpop.permute.xlu2 %1124 }
 0x28f   : >> { %v1127_v46 = vpop.permute.xlu2 %1126 }
 0x290   : >> { %v1130_v58 = vsel %vm374_vm3, %v1125_v57, %v1127_v46 }
 0x291   : >> { %1145 = vmatpush.bf16.msra.mxu0 %v1130_v58 }
 0x294   : >> { %3484 = vmatmul.msk.bf16.vlgmr.msra.gmra.mxu0 %vm380_vm1, %v3734_v59 }
 0x295   : >> { %1212 = vmatpush.bf16.msrb.mxu0 %v3479_v40 }
 0x297   : >> { %v1241_v60 = vpop.permute.xlu2 %1240 }
 0x29f   : >> { %v1239_v61 = vpop.permute.xlu1 %1238  ;;  %v1308_v2 = vpop.permute.xlu2 %1307 }
 0x2a0   : >> { %v1129_v62 = vpop.permute.xlu0 %1128  ;;  %v1244_v63 = vsel %vm490_vm2, %v1239_v61, %v1241_v60 }
 0x2a1   : >> { %1173 = vmatpush.bf16.msra.mxu2 %v1129_v62  ;;  %v1131_v1 = vsel %vm374_vm3, %v1127_v46, %v1129_v62 }
 0x2a2   : >> { %1159 = vmatpush.bf16.msra.mxu1 %v1131_v1 }
 0x2a4   : >> { %3486 = vmatmul.msk.bf16.vlgmr.msra.gmra.mxu2 %vm380_vm1, %v3734_v59  ;;  %3492 = vmatmul.msk.bf16.vlgmr.msrb.gmra.mxu0 %vm380_vm1, %v3733_v56 }
 0x2a5   : >> { %1259 = vmatpush.bf16.msrb.mxu2 %v1244_v63  ;;  %3485 = vmatmul.msk.bf16.vlgmr.msra.gmra.mxu1 %vm380_vm1, %v3734_v59 }
 0x2a6   : >> { %1226 = vmatpush.bf16.msrb.mxu1 %v3483_v53 }
 0x2a7   : >> { %v1306_v4 = vpop.permute.xlu1 %1305  ;;  %v1375_v9 = vpop.permute.xlu2 %1374 }
 0x2a8   : >> { %v1243_v5 = vpop.permute.xlu0 %1242  ;;  %v1311_v3 = vsel %vm558_vm4, %v1306_v4, %v1308_v2 }
 0x2a9   : >> { %1287 = vmatpush.bf16.msra.mxu0 %v1243_v5  ;;  %v1245_v6 = vsel %vm490_vm2, %v1241_v60, %v1243_v5 }
 0x2aa   : >> { %1326 = vmatpush.bf16.msra.mxu1 %v1311_v3  ;;  %1273 = vmatpush.bf16.msrb.mxu3 %v1245_v6 }
 0x2ad   : >> { %3499 = vmatmul.msk.bf16.vlgmr.msrb.gmra.mxu3 %vm380_vm1, %v3735_v7 }
 0x2af   : >> { %v1373_v10 = vpop.permute.xlu1 %1372  ;;  %v1442_v8 = vpop.permute.xlu2 %1441 }
 0x2b0   : >> { %v1310_v11 = vpop.permute.xlu0 %1309  ;;  %v1378_v12 = vsel %vm626_vm5, %v1373_v10, %v1375_v9 }
 0x2b1   : >> { %v1312_v13 = vsel %vm558_vm4, %v1308_v2, %v1310_v11  ;;  %1354 = vmatpush.bf16.msra.mxu3 %v1310_v11  ;;  %1393 = vmatpush.bf16.msrb.mxu0 %v1378_v12 }
 0x2b2   : >> { %1340 = vmatpush.bf16.msra.mxu2 %v1312_v13 }
 0x2b4   : >> { %3498 = vmatmul.msk.bf16.vlgmr.msrb.gmra.mxu2 %vm380_vm1, %v3735_v7  ;;  %3500 = vmatmul.msk.bf16.vlgmr.msra.gmra.mxu0 %vm380_vm1, %v3735_v7  ;;  %v1200_v53 = vpop.f32.mrf.mxu3 }
 0x2b5   : >> { %3493 = vmatmul.msk.bf16.vlgmr.msrb.gmra.mxu1 %vm380_vm1, %v3733_v56 }
 0x2b7   : >> { %v1440_v14 = vpop.permute.xlu1 %1439  ;;  %v1509_v25 = vpop.permute.xlu2 %1508 }
 0x2b8   : >> { %v1377_v16 = vpop.permute.xlu0 %1376  ;;  %v1445_v18 = vsel %vm694_vm6, %v1440_v14, %v1442_v8 }
 0x2b9   : >> { %v1379_v20 = vsel %vm626_vm5, %v1375_v9, %v1377_v16  ;;  %1421 = vmatpush.bf16.msrb.mxu2 %v1377_v16  ;;  %1460 = vmatpush.bf16.msrb.mxu3 %v1445_v18 }
 0x2ba   : >> { %1407 = vmatpush.bf16.msrb.mxu1 %v1379_v20 }
 0x2bc   : >> { %v1202_v57 = vpop.f32.mrf.mxu3 }
 0x2bd   : >> { %3507 = vmatmul.msk.bf16.vlgmr.msra.gmra.mxu3 %vm380_vm1, %v3736_v24 }
 0x2bf   : >> { %v1507_v21 = vpop.permute.xlu1 %1506  ;;  %v1576_v31 = vpop.permute.xlu2 %1575 }
 0x2c0   : >> { %v1444_v26 = vpop.permute.xlu0 %1443  ;;  %v1512_v30 = vsel %vm762_vm7, %v1507_v21, %v1509_v25 }
 0x2c1   : >> { %v1446_v28 = vsel %vm694_vm6, %v1442_v8, %v1444_v26 }
 0x2c2   : >> { %1474 = vmatpush.bf16.msra.mxu0 %v1446_v28 }
 0x2c4   : >> { %3506 = vmatmul.msk.bf16.vlgmr.msra.gmra.mxu2 %vm380_vm1, %v3736_v24  ;;  %3512 = vmatmul.msk.bf16.vlgmr.msrb.gmra.mxu0 %vm380_vm1, %v3737_v27 }
 0x2c5   : >> { %1527 = vmatpush.bf16.msra.mxu2 %v1512_v30  ;;  %3505 = vmatmul.msk.bf16.vlgmr.msra.gmra.mxu1 %vm380_vm1, %v3736_v24 }
 0x2c6   : >> { %1488 = vmatpush.bf16.msra.mxu1 %v1444_v26 }
 0x2c7   : >> { %v1574_v33 = vpop.permute.xlu1 %1573  ;;  %v1643_v41 = vpop.permute.xlu2 %1642 }
 0x2c8   : >> { %v1511_v32 = vpop.permute.xlu0 %1510  ;;  %v1579_v29 = vsel %vm830_vm8, %v1574_v33, %v1576_v31 }
 0x2c9   : >> { %v1513_v34 = vsel %vm762_vm7, %v1509_v25, %v1511_v32  ;;  %1555 = vmatpush.bf16.msrb.mxu0 %v1511_v32 }
 0x2ca   : >> { %1541 = vmatpush.bf16.msra.mxu3 %v1513_v34 }
 0x2cd   : >> { %3519 = vmatmul.msk.bf16.vlgmr.msrb.gmra.mxu3 %vm380_vm1, %v3738_v36 }
 0x2cf   : >> { %v1641_v35 = vpop.permute.xlu1 %1640 }
 0x2d0   : >> { %v1578_v37 = vpop.permute.xlu0 %1577  ;;  %v1646_v42 = vsel %vm898_vm9, %v1641_v35, %v1643_v41 }
 0x2d1   : >> { %1622 = vmatpush.bf16.msrb.mxu3 %v1578_v37  ;;  %v1580_v23 = vsel %vm830_vm8, %v1576_v31, %v1578_v37 }
 0x2d4   : >> { %3514 = vmatmul.msk.bf16.vlgmr.msrb.gmra.mxu2 %vm380_vm1, %v3737_v27  ;;  %3520 = vmatmul.msk.bf16.vlgmr.msra.gmra.mxu0 %vm380_vm1, %v3738_v36 }
 0x2d5   : >> { %1608 = vmatpush.bf16.msrb.mxu2 %v1580_v23  ;;  %3513 = vmatmul.msk.bf16.vlgmr.msrb.gmra.mxu1 %vm380_vm1, %v3737_v27 }
 0x2d6   : >> { %1594 = vmatpush.bf16.msrb.mxu1 %v1579_v29  ;;  %1661 = vmatpush.bf16.msra.mxu0 %v1646_v42 }
 0x2d8   : >> { %v1645_v45 = vpop.permute.xlu0 %1644 }
 0x2d9   : >> { %v1647_v47 = vsel %vm898_vm9, %v1643_v41, %v1645_v45 }
 0x2dd   : >> { %3527 = vmatmul.msk.bf16.vlgmr.msra.gmra.mxu3 %vm380_vm1, %v3739_v39 }
 0x2e4   : >> { %3526 = vmatmul.msk.bf16.vlgmr.msra.gmra.mxu2 %vm380_vm1, %v3739_v39  ;;  %3528 = vmatmul.msk.bf16.vlgmr.msrb.gmra.mxu0 %vm380_vm1, %v3739_v39 }
 0x2e5   : >> { %1689 = vmatpush.bf16.msra.mxu2 %v1645_v45  ;;  %3521 = vmatmul.msk.bf16.vlgmr.msra.gmra.mxu1 %vm380_vm1, %v3738_v36 }
 0x2e6   : >> { %1675 = vmatpush.bf16.msra.mxu1 %v1647_v47 }
 0x2ed   : >> { %3535 = vmatmul.msk.bf16.vlgmr.msrb.gmra.mxu3 %vm380_vm1, %v3740_v48 }
 0x2f4   : >> { %3534 = vmatmul.msk.bf16.vlgmr.msrb.gmra.mxu2 %vm380_vm1, %v3740_v48  ;;  %3540 = vmatmul.msk.bf16.vlgmr.msra.gmra.mxu0 %vm380_vm1, %v3741_v49 }
 0x2f5   : >> { %3533 = vmatmul.msk.bf16.vlgmr.msrb.gmra.mxu1 %vm380_vm1, %v3740_v48 }
 0x304   : >> { %3542 = vmatmul.msk.bf16.vlgmr.msra.gmra.mxu2 %vm380_vm1, %v3741_v49 }
 0x305   : >> { %3541 = vmatmul.msk.bf16.vlgmr.msra.gmra.mxu1 %vm380_vm1, %v3741_v49 }
 0x311   : >> { %v1147_v51 = vpop.f32.mrf.mxu0 }
 0x312   : >> { %v1201_v33 = vadd.f32 %v1200_v53, %v1147_v51 }
 0x319   : >> { %v1149_v52 = vpop.f32.mrf.mxu0 }
 0x31a   : >> { %v1203_v23 = vadd.f32 %v1202_v57, %v1149_v52 }
 0x321   : >> { %v1214_v54 = vpop.f32.mrf.mxu0 }
 0x322   : >> { %v1161_v55 = vpop.f32.mrf.mxu1 }
 0x323   : >> { %v1215_v40 = vadd.f32 %v1214_v54, %v1161_v55 }
 0x327   : >> { %v1175_v56 = vpop.f32.mrf.mxu2 }
 0x329   : >> { %v1216_v46 = vpop.f32.mrf.mxu0 }
 0x32a   : >> { %v1163_v58 = vpop.f32.mrf.mxu1 }
 0x32b   : >> { %v1217_v55 = vadd.f32 %v1216_v46, %v1163_v58 }
 0x32f   : >> { %v1177_v59 = vpop.f32.mrf.mxu2 }
 0x330   : >> { %v1275_v60 = vpop.f32.mrf.mxu3 }
 0x331   : >> { %v1289_v61 = vpop.f32.mrf.mxu0  ;;  %v1295_v29 = vadd.f32 %v1275_v60, %v1215_v40 }
 0x332   : >> { %v1228_v62 = vpop.f32.mrf.mxu1 }
 0x333   : >> { %v1229_v63 = vadd.f32 %v1228_v62, %v1175_v56 }
 0x335   : >> { %v1296_v54 = vadd.f32 %v1289_v61, %v1229_v63 }
 0x337   : >> { %v1261_v1 = vpop.f32.mrf.mxu2 }
 0x338   : >> { %v1277_v5 = vpop.f32.mrf.mxu3  ;;  %v1294_v36 = vadd.f32 %v1261_v1, %v1201_v33 }
 0x339   : >> { %v4209_v2 = vpop.f32.mrf.mxu0  ;;  %v1298_v1 = vadd.f32 %v1277_v5, %v1217_v55 }
 0x33a   : >> { %v1230_v4 = vpop.f32.mrf.mxu1 }
 0x33b   : >> { %v1231_v52 = vadd.f32 %v1230_v4, %v1177_v59 }
 0x33d   : >> { %v1299_v46 = vadd.f32 %v4209_v2, %v1231_v52 }
 0x33f   : >> { %v1263_v3 = vpop.f32.mrf.mxu2 }
 0x340   : >> { %v1356_v9 = vpop.f32.mrf.mxu3  ;;  %v1297_v43 = vadd.f32 %v1263_v3, %v1203_v23  ;;  %v1710_v23 = vpop.permute.xlu2 %1709 }
 0x341   : >> { %v1395_v6 = vpop.f32.mrf.mxu0  ;;  %v1363_v62 = vadd.f32 %v1356_v9, %v1296_v54 }
 0x342   : >> { %v1328_v7 = vpop.f32.mrf.mxu1 }
 0x343   : >> { %v1361_v35 = vadd.f32 %v1328_v7, %v1294_v36 }
 0x345   : >> { %v1428_v42 = vadd.f32 %v1395_v6, %v1361_v35 }
 0x347   : >> { %v1342_v10 = vpop.f32.mrf.mxu2 }
 0x348   : >> { %v1358_v13 = vpop.f32.mrf.mxu3  ;;  %v1362_v44 = vadd.f32 %v1342_v10, %v1295_v29 }
 0x349   : >> { %v1397_v11 = vpop.f32.mrf.mxu0 }
 0x34a   : >> { %v1330_v12 = vpop.f32.mrf.mxu1 }
 0x34b   : >> { %v1364_v48 = vadd.f32 %v1330_v12, %v1297_v43  ;;  %v1705_v12 = vpop.permute.xlu1 %1704 }
 0x34d   : >> { %v1431_v7 = vadd.f32 %v1397_v11, %v1364_v48 }
 0x34f   : >> { %v1344_v8 = vpop.f32.mrf.mxu2 }
 0x350   : >> { %v1462_v20 = vpop.f32.mrf.mxu3  ;;  %v1365_v57 = vadd.f32 %v1344_v8, %v1298_v1 }
 0x351   : >> { %v1476_v16 = vpop.f32.mrf.mxu0  ;;  %v1495_v39 = vadd.f32 %v1462_v20, %v1428_v42 }
 0x352   : >> { %v1409_v14 = vpop.f32.mrf.mxu1 }
 0x353   : >> { %v1429_v49 = vadd.f32 %v1409_v14, %v1362_v44 }
 0x355   : >> { %v1496_v33 = vadd.f32 %v1476_v16, %v1429_v49  ;;  %v1366_v16 = vadd.f32 %v1358_v13, %v1299_v46 }
 0x357   : >> { %v1423_v18 = vpop.f32.mrf.mxu2 }
 0x358   : >> { %v1464_v27 = vpop.f32.mrf.mxu3  ;;  %v1430_v40 = vadd.f32 %v1423_v18, %v1363_v62 }
 0x359   : >> { %v1478_v21 = vpop.f32.mrf.mxu0  ;;  %v1498_v60 = vadd.f32 %v1464_v27, %v1431_v7 }
 0x35a   : >> { %v1411_v24 = vpop.f32.mrf.mxu1 }
 0x35b   : >> { %v1432_v14 = vadd.f32 %v1411_v24, %v1365_v57 }
 0x35d   : >> { %v1499_v8 = vadd.f32 %v1478_v21, %v1432_v14 }
 0x35f   : >> { %v1425_v25 = vpop.f32.mrf.mxu2 }
 0x360   : >> { %v1543_v34 = vpop.f32.mrf.mxu3  ;;  %v1433_v27 = vadd.f32 %v1425_v25, %v1366_v16 }
 0x361   : >> { %v1557_v28 = vpop.f32.mrf.mxu0  ;;  %v1563_v3 = vadd.f32 %v1543_v34, %v1496_v33 }
 0x362   : >> { %v1490_v26 = vpop.f32.mrf.mxu1 }
 0x363   : >> { %v1497_v20 = vadd.f32 %v1490_v26, %v1430_v40 }
 0x365   : >> { %v1564_v59 = vadd.f32 %v1557_v28, %v1497_v20 }
 0x367   : >> { %v1529_v30 = vpop.f32.mrf.mxu2 }
 0x368   : >> { %v1545_v45 = vpop.f32.mrf.mxu3  ;;  %v1562_v50 = vadd.f32 %v1529_v30, %v1495_v39 }
 0x369   : >> { %v4211_v37 = vpop.f32.mrf.mxu0  ;;  %v1566_v36 = vadd.f32 %v1545_v45, %v1499_v8 }
 0x36a   : >> { %v1492_v32 = vpop.f32.mrf.mxu1 }
 0x36f   : >> { %v1531_v31 = vpop.f32.mrf.mxu2 }
 0x370   : >> { %v1565_v30 = vadd.f32 %v1531_v31, %v1498_v60  ;;  %v1624_v61 = vpop.f32.mrf.mxu3 }
 0x371   : >> { %v1663_v51 = vpop.f32.mrf.mxu0  ;;  %v1631_v34 = vadd.f32 %v1624_v61, %v1564_v59 }
 0x372   : >> { %v1596_v41 = vpop.f32.mrf.mxu1 }
 0x373   : >> { %v1629_v56 = vadd.f32 %v1596_v41, %v1562_v50  ;;  %v1500_v41 = vadd.f32 %v1492_v32, %v1433_v27 }
 0x375   : >> { %v1696_v6 = vadd.f32 %v1663_v51, %v1629_v56  ;;  %v1567_v25 = vadd.f32 %v4211_v37, %v1500_v41 }
 0x377   : >> { %v1610_v47 = vpop.f32.mrf.mxu2  ;;  %v1712_v9 = vadd.f32 %v1705_v12, %v1696_v6 }
 0x378   : >> { %v1630_v63 = vadd.f32 %v1610_v47, %v1563_v3  ;;  %v1626_v39 = vpop.f32.mrf.mxu3 }
 0x379   : >> { %v1665_v4 = vpop.f32.mrf.mxu0  ;;  %v1718_v26 = vmax.f32 %v1712_v9, 0.0  ;;  %v1634_v32 = vadd.f32 %v1626_v39, %v1567_v25  ;;  %v3748_v25 = vld [vmem:[%s4147_s28 + $0x58] sm:$0xff] }
 0x37a   : >> { %v1598_v53 = vpop.f32.mrf.mxu1 }
 0x37b   : >> { %v1632_v5 = vadd.f32 %v1598_v53, %v1565_v30 }
 0x37d   : >> { %v1699_v35 = vadd.f32 %v1665_v4, %v1632_v5 }
 0x37f   : >> { %v1612_v10 = vpop.f32.mrf.mxu2  ;;  %v1715_v13 = vadd.f32 %v1710_v23, %v1699_v35  ;;  %v3565_v35 = vld [vmem:[%s4185_s27 + $0x10] sm:$0xff] }
 0x380   : >> { %v1633_v2 = vadd.f32 %v1612_v10, %v1566_v36 }
 0x381   : >> { %v1721_v51 = vmax.f32 %v1715_v13, 0.0 }
 0x382   : >> { %v1677_v58 = vpop.f32.mrf.mxu1 }
 0x383   : >> { %v1697_v11 = vadd.f32 %v1677_v58, %v1630_v63 }
 0x385   : >> { %v1713_v18 = vadd.f32 %v1705_v12, %v1697_v11 }
 0x387   : >> { %v1719_v24 = vmax.f32 %v1713_v18, 0.0  ;;  %v1691_v31 = vpop.f32.mrf.mxu2 }
 0x388   : >> { %v1698_v29 = vadd.f32 %v1691_v31, %v1631_v34  ;;  %v3746_v31 = vld [vmem:[%s4147_s28 + $0x48] sm:$0xff] }
 0x389   : >> { %v1724_v42 = vpack.c.bf16 %v1719_v24, %v1718_v26  ;;  %v3566_v24 = vld [vmem:[%s4185_s27 + $0x18] sm:$0xff]  ;;  %s2418_s27 = sld [smem:[#allocation6 + %s3857_s30]]  ;;  %s1001_s30 = sadd.s32 1, %s3857_s30  }
 0x38a   : >> { %v1714_v43 = vadd.f32 %v1705_v12, %v1698_v29  ;;  %v1679_v44 = vpop.f32.mrf.mxu1  ;;  %p998_p4 = scmp.ge.s32.totalorder %s1001_s30, 2  }
 0x38b   : >> { %v1728_v28 = vunpack.c.l.bf16 %v1724_v42  ;;  %v1729_v47 = vunpack.c.h.bf16 %v1724_v42  ;;  %v1700_v21 = vadd.f32 %v1679_v44, %v1633_v2  ;;  %v3747_v42 = vld [vmem:[%s4147_s28 + $0x50] sm:$0xff]  ;;  %2461 = vst [vmem:[#allocation1] ss:$9 sm:$0xff] (%p998_p4), %v3992_v15  ;;  %3828 = vset.pattern.permute.xlu0 (%p998_p4), %v3868_v0  ;;  %s4580_s30 = smov (%p998_p4), 92   ;;  %v3759_v38 = vld [vmem:[%s4568_s6] sm:$0xff] (%p998_p4)  ;;  %s3884_s29 = smov (%p998_p4), 120  }
 0x38c   : >> { %v1720_v48 = vmax.f32 %v1714_v43, 0.0  ;;  %s3885_s20 = smov (%p998_p4), 114   ;;  %s3886_s21 = smov (%p998_p4), 102   ;;  %vm3170_vm0 = vcmask (%p998_p4), 261248  }
 0x38d   : >> { %v1716_v45 = vadd.f32 %v1710_v23, %v1700_v21  ;;  %v1734_v49 = vmul.f32 %v1728_v28, %v4089_v22  ;;  %v1735_v50 = vmul.f32 %v1729_v47, %v4091_v17 }
 0x38e   : >> { %v1725_v54 = vpack.c.bf16 %v1720_v48, %v1720_v48 }
 0x38f   : >> { %v1722_v53 = vmax.f32 %v1716_v45, 0.0  ;;  %v1693_v55 = vpop.f32.mrf.mxu2  ;;  %v1740_v56 = vpack.c.bf16 %v1735_v50, %v1734_v49 }
 0x390   : >> { %v1730_v62 = vunpack.c.l.bf16 %v1725_v54  ;;  %v1701_v1 = vadd.f32 %v1693_v55, %v1634_v32 }
 0x391   : >> { %v1726_v7 = vpack.c.bf16 %v1722_v53, %v1721_v51  ;;  %1748 = vrot.lane.b32.xlu0 %v1740_v56, %s3869_s10  ;;  %v3749_v56 = vld [vmem:[%s4147_s28 + $0x60] sm:$0xff] }
 0x392   : >> { %v1717_v33 = vadd.f32 %v1710_v23, %v1701_v1  ;;  %v1736_v37 = vmul.f32 %v1730_v62, %v4093_v19 }
 0x393   : >> { %v1731_v52 = vunpack.c.l.bf16 %v1726_v7  ;;  %v1732_v40 = vunpack.c.h.bf16 %v1726_v7 }
 0x394   : >> { %v1723_v57 = vmax.f32 %v1717_v33, 0.0  ;;  %v1741_v60 = vpack.c.bf16 %v1736_v37, %v1736_v37 }
 0x395   : >> { %v1737_v3 = vmul.f32 %v1731_v52, %v4089_v22  ;;  %v1738_v6 = vmul.f32 %v1732_v40, %v4091_v17 }
 0x396   : >> { %v1727_v10 = vpack.c.bf16 %v1723_v57, %v1723_v57  ;;  %1750 = vrot.lane.b32.xlu2 %v1741_v60, %s3869_s10 }
 0x397   : >> { %v1742_v20 = vpack.c.bf16 %v1738_v6, %v1737_v3  ;;  %v3751_v6 = vld [vmem:[%s4147_s28 + $0x70] sm:$0xff] }
 0x398   : >> { %v1733_v12 = vunpack.c.l.bf16 %v1727_v10  ;;  %v3750_v10 = vld [vmem:[%s4147_s28 + $0x68] sm:$0xff] }
 0x399   : >> { %1752 = vrot.lane.b32.xlu1 %v1742_v20, %s3869_s10 }
 0x39a   : >> { %v1739_v14 = vmul.f32 %v1733_v12, %v4093_v19 }
 0x39c   : >> { %v1743_v30 = vpack.c.bf16 %v1739_v14, %v1739_v14 }
 0x39e   : >> { %1754 = vrot.lane.b32.xlu0 %v1743_v30, %s3869_s10  ;;  %s4582_s10 = smov (%p998_p4), 90  }
 0x3f0   : >> { %v1751_v46 = vpop.permute.xlu2 %1750 }
 0x403   : >> { %v1749_v61 = vpop.permute.xlu0 %1748 }
 0x404   : >> { %v1756_v63 = vrot.slane %v1749_v61, 4 }
 0x406   : >> { %v1758_v58 = vsel %vm1059_vm13, %v1756_v63, %v1749_v61  ;;  %v1759_v22 = vsel %vm1059_vm13, %v1756_v63, %v1751_v46  ;;  %v3752_v63 = vld [vmem:[%s4147_s28 + $0x78] sm:$0xff] }
 0x407   : >> { %1766 = vst.msk [vmem:[#allocation2] sm:$0xff] %vm4105_vm14, %v1758_v58 }
 0x408   : >> { %1767 = vst.msk [vmem:[#allocation2 + $0x8] sm:$0xf] %vm1072_vm15, %v1759_v22 }
 0x40b   : >> { %v1753_v17 = vpop.permute.xlu1 %1752 }
 0x40c   : >> { %v1757_v9 = vrot.slane %v1753_v17, 4 }
 0x40e   : >> { %v1760_v5 = vsel %vm1059_vm13, %v1757_v9, %v1753_v17  ;;  %v3756_v16 = vld [vmem:[#allocation2 + $0x4] sm:$0xf]  ;;  %v3573_v59 = vld [vmem:[#allocation2] sm:$0xf] }
 0x40f   : >> { %1768 = vst.msk [vmem:[#allocation2 + $0xc] sm:$0xff] %vm4105_vm14, %v1760_v5  ;;  %v3581_v34 = vld [vmem:[#allocation2 + $0x8] sm:$0xf]  ;;  %v3753_v5 = vld [vmem:[%s4147_s28 + $0x80] sm:$0xff] }
 0x410   : >> { %v1755_v19 = vpop.permute.xlu0 %1754 }
 0x411   : >> { %v1761_v11 = vsel %vm1059_vm13, %v1757_v9, %v1755_v19  ;;  %v3754_v19 = vld [vmem:[%s4147_s28 + $0x88] sm:$0xff]  ;;  %s3879_s28 = smov (%p998_p4), 19  }
 0x412   : >> { %1769 = vst.msk [vmem:[#allocation2 + $0x14] sm:$0xf] %vm1072_vm15, %v1761_v11 }
 0x416   : >> { %v3575_v4 = vld [vmem:[#allocation2 + $0xc] sm:$0xf0]  ;;  %v3757_v8 = vld [vmem:[#allocation2 + $0x8] sm:$0xf0] }
 0x417   : >> { %v3574_v18 = vor.u32 %v3757_v8, %v3573_v59  ;;  %v3578_v27 = vor.u32 %v3756_v16, %v3575_v4 }
 0x419   : >> { %v3758_v36 = vld [vmem:[#allocation2 + $0x10] sm:$0xf0]  ;;  %1818 = vrot.lane.b32.xlu1 %v3574_v18, %s3871_s12  ;;  %1892 = vmatpush.bf16.msrb.mxu2 %v3574_v18 }
 0x41a   : >> { %v3582_v26 = vor.u32 %v3758_v36, %v3581_v34  ;;  %1820 = vrot.lane.b32.xlu2 %v3578_v27, %s3871_s12 }
 0x41c   : >> { %1822 = vrot.lane.b32.xlu0 %v3582_v26, %s3871_s12  ;;  %3590 = vmatmul.msk.bf16.vlgmr.msrb.gmra.mxu2 %vm380_vm1, %v3746_v31 }
 0x421   : >> { %1932 = vrot.lane.b32.xlu1 %v3574_v18, %s3870_s11 }
 0x422   : >> { %1934 = vrot.lane.b32.xlu2 %v3578_v27, %s3870_s11 }
 0x424   : >> { %1936 = vrot.lane.b32.xlu0 %v3582_v26, %s3870_s11 }
 0x429   : >> { %1999 = vrot.lane.b32.xlu1 %v3574_v18, %s3872_s14 }
 0x42a   : >> { %2001 = vrot.lane.b32.xlu2 %v3578_v27, %s3872_s14 }
 0x42c   : >> { %2003 = vrot.lane.b32.xlu0 %v3582_v26, %s3872_s14 }
 0x431   : >> { %2066 = vrot.lane.b32.xlu1 %v3574_v18, %s3873_s0 }
 0x432   : >> { %2068 = vrot.lane.b32.xlu2 %v3578_v27, %s3873_s0 }
 0x434   : >> { %2070 = vrot.lane.b32.xlu0 %v3582_v26, %s3873_s0 }
 0x439   : >> { %2133 = vrot.lane.b32.xlu1 %v3574_v18, %s3874_s15 }
 0x43a   : >> { %2135 = vrot.lane.b32.xlu2 %v3578_v27, %s3874_s15 }
 0x43c   : >> { %2137 = vrot.lane.b32.xlu0 %v3582_v26, %s3874_s15  ;;  %s3880_s15 = smov (%p998_p4), 122  }
 0x441   : >> { %2200 = vrot.lane.b32.xlu1 %v3574_v18, %s3875_s16 }
 0x442   : >> { %2202 = vrot.lane.b32.xlu2 %v3578_v27, %s3875_s16 }
 0x444   : >> { %2204 = vrot.lane.b32.xlu0 %v3582_v26, %s3875_s16  ;;  %s3881_s16 = smov (%p998_p4), 124  }
 0x449   : >> { %2267 = vrot.lane.b32.xlu1 %v3574_v18, %s3876_s17 }
 0x44a   : >> { %2269 = vrot.lane.b32.xlu2 %v3578_v27, %s3876_s17 }
 0x44c   : >> { %2271 = vrot.lane.b32.xlu0 %v3582_v26, %s3876_s17  ;;  %s3882_s17 = smov (%p998_p4), 116  }
 0x451   : >> { %2334 = vrot.lane.b32.xlu1 %v3574_v18, %s3877_s19 }
 0x452   : >> { %2336 = vrot.lane.b32.xlu2 %v3578_v27, %s3877_s19 }
 0x454   : >> { %2338 = vrot.lane.b32.xlu0 %v3582_v26, %s3877_s19  ;;  %s3883_s19 = smov (%p998_p4), 118  }
 0x459   : >> { %2398 = vperm.xlu1 %3823, %v3565_v35  }
 0x45a   : >> { %2403 = vperm.xlu2 %3824, %v3566_v24  }
 0x461   : > { %3826 = vset.pattern.permute.xlu1 (%p998_p4), %v3868_v0 }
 0x462   : > { %3827 = vset.pattern.permute.xlu2 (%p998_p4), %v3868_v0 }
 0x474   : >> { %v1821_v41 = vpop.permute.xlu2 %1820 }
 0x47c   : >> { %v1935_v23 = vpop.permute.xlu2 %1934 }
 0x484   : >> { %v2002_v28 = vpop.permute.xlu2 %2001 }
 0x48b   : >> { %v1819_v29 = vpop.permute.xlu1 %1818 }
 0x48c   : >> { %v1824_v2 = vsel %vm374_vm3, %v1819_v29, %v1821_v41  ;;  %v2069_v50 = vpop.permute.xlu2 %2068 }
 0x48d   : >> { %1839 = vmatpush.bf16.msra.mxu3 %v1824_v2 }
 0x48e   : >> { %v1823_v43 = vpop.permute.xlu0 %1822 }
 0x48f   : >> { %v1825_v44 = vsel %vm374_vm3, %v1821_v41, %v1823_v43  ;;  %1867 = vmatpush.bf16.msrb.mxu1 %v1823_v43 }
 0x490   : >> { %3583 = vmatmul.msk.bf16.vlgmr.msra.gmra.mxu3 %vm380_vm1, %v3747_v42  ;;  %1853 = vmatpush.bf16.msrb.mxu0 %v1825_v44 }
 0x491   : >> { %1906 = vmatpush.bf16.msrb.mxu3 %v3578_v27 }
 0x492   : >> { %3585 = vmatmul.msk.bf16.vlgmr.msrb.gmra.mxu1 %vm380_vm1, %v3747_v42 }
 0x493   : >> { %v1933_v39 = vpop.permute.xlu1 %1932  ;;  %3584 = vmatmul.msk.bf16.vlgmr.msrb.gmra.mxu0 %vm380_vm1, %v3747_v42 }
 0x494   : >> { %1920 = vmatpush.bf16.msra.mxu0 %v3582_v26  ;;  %v1938_v13 = vsel %vm490_vm2, %v1933_v39, %v1935_v23  ;;  %v2136_v62 = vpop.permute.xlu2 %2135 }
 0x495   : >> { %1953 = vmatpush.bf16.msra.mxu1 %v1938_v13 }
 0x496   : >> { %v1937_v47 = vpop.permute.xlu0 %1936 }
 0x497   : >> { %v1939_v21 = vsel %vm490_vm2, %v1935_v23, %v1937_v47  ;;  %1981 = vmatpush.bf16.msra.mxu3 %v1937_v47 }
 0x498   : >> { %1967 = vmatpush.bf16.msra.mxu2 %v1939_v21 }
 0x49b   : >> { %v2000_v48 = vpop.permute.xlu1 %1999  ;;  %3598 = vmatmul.msk.bf16.vlgmr.msra.gmra.mxu2 %vm380_vm1, %v3748_v25 }
 0x49c   : >> { %v2005_v45 = vsel %vm558_vm4, %v2000_v48, %v2002_v28  ;;  %v2203_v52 = vpop.permute.xlu2 %2202 }
 0x49d   : >> { %2020 = vmatpush.bf16.msrb.mxu0 %v2005_v45 }
 0x49e   : >> { %v2004_v49 = vpop.permute.xlu0 %2003 }
 0x49f   : >> { %v2006_v32 = vsel %vm558_vm4, %v2002_v28, %v2004_v49  ;;  %2048 = vmatpush.bf16.msrb.mxu2 %v2004_v49  ;;  %v1894_v11 = vpop.f32.mrf.mxu2 }
 0x4a0   : >> { %3591 = vmatmul.msk.bf16.vlgmr.msrb.gmra.mxu3 %vm380_vm1, %v3746_v31  ;;  %2034 = vmatpush.bf16.msrb.mxu1 %v2006_v32 }
 0x4a2   : >> { %3597 = vmatmul.msk.bf16.vlgmr.msra.gmra.mxu1 %vm380_vm1, %v3748_v25 }
 0x4a3   : >> { %v2067_v54 = vpop.permute.xlu1 %2066  ;;  %3592 = vmatmul.msk.bf16.vlgmr.msra.gmra.mxu0 %vm380_vm1, %v3746_v31 }
 0x4a4   : >> { %v2072_v51 = vsel %vm626_vm5, %v2067_v54, %v2069_v50  ;;  %v2270_v14 = vpop.permute.xlu2 %2269 }
 0x4a5   : >> { %2087 = vmatpush.bf16.msrb.mxu3 %v2072_v51 }
 0x4a6   : >> { %v2071_v53 = vpop.permute.xlu0 %2070 }
 0x4a7   : >> { %v2073_v55 = vsel %vm626_vm5, %v2069_v50, %v2071_v53  ;;  %2115 = vmatpush.bf16.msra.mxu1 %v2071_v53  ;;  %v1896_v18 = vpop.f32.mrf.mxu2 }
 0x4a8   : >> { %2101 = vmatpush.bf16.msra.mxu0 %v2073_v55 }
 0x4ab   : >> { %v2134_v1 = vpop.permute.xlu1 %2133  ;;  %3606 = vmatmul.msk.bf16.vlgmr.msrb.gmra.mxu2 %vm380_vm1, %v3749_v56 }
 0x4ac   : >> { %v2139_v7 = vsel %vm694_vm6, %v2134_v1, %v2136_v62  ;;  %v2337_v58 = vpop.permute.xlu2 %2336 }
 0x4ad   : >> { %2154 = vmatpush.bf16.msra.mxu2 %v2139_v7 }
 0x4ae   : >> { %v2138_v33 = vpop.permute.xlu0 %2137 }
 0x4af   : >> { %v2140_v37 = vsel %vm694_vm6, %v2136_v62, %v2138_v33 }
 0x4b0   : >> { %3599 = vmatmul.msk.bf16.vlgmr.msra.gmra.mxu3 %vm380_vm1, %v3748_v25 }
 0x4b1   : >> { %2168 = vmatpush.bf16.msra.mxu3 %v2140_v37 }
 0x4b2   : >> { %3605 = vmatmul.msk.bf16.vlgmr.msrb.gmra.mxu1 %vm380_vm1, %v3749_v56 }
 0x4b3   : >> { %v2201_v40 = vpop.permute.xlu1 %2200  ;;  %3604 = vmatmul.msk.bf16.vlgmr.msrb.gmra.mxu0 %vm380_vm1, %v3749_v56 }
 0x4b4   : >> { %v2206_v57 = vsel %vm762_vm7, %v2201_v40, %v2203_v52  ;;  %2182 = vmatpush.bf16.msrb.mxu0 %v2138_v33 }
 0x4b5   : >> { %2221 = vmatpush.bf16.msrb.mxu1 %v2206_v57 }
 0x4b6   : >> { %v2205_v60 = vpop.permute.xlu0 %2204 }
 0x4b7   : >> { %v2207_v3 = vsel %vm762_vm7, %v2203_v52, %v2205_v60 }
 0x4b8   : >> { %2235 = vmatpush.bf16.msrb.mxu2 %v2207_v3 }
 0x4bb   : >> { %3618 = vmatmul.msk.bf16.vlgmr.msra.gmra.mxu2 %vm380_vm1, %v3751_v6  ;;  %v2268_v12 = vpop.permute.xlu1 %2267 }
 0x4bc   : >> { %v2273_v61 = vsel %vm830_vm8, %v2268_v12, %v2270_v14 }
 0x4be   : >> { %v2272_v20 = vpop.permute.xlu0 %2271 }
 0x4bf   : >> { %2316 = vmatpush.bf16.msra.mxu2 %v2272_v20  ;;  %v2274_v30 = vsel %vm830_vm8, %v2270_v14, %v2272_v20 }
 0x4c0   : >> { %3611 = vmatmul.msk.bf16.vlgmr.msrb.gmra.mxu3 %vm380_vm1, %v3750_v10 }
 0x4c1   : >> { %2249 = vmatpush.bf16.msrb.mxu3 %v2205_v60 }
 0x4c2   : >> { %3613 = vmatmul.msk.bf16.vlgmr.msra.gmra.mxu1 %vm380_vm1, %v3750_v10 }
 0x4c3   : >> { %2302 = vmatpush.bf16.msra.mxu1 %v2274_v30  ;;  %3612 = vmatmul.msk.bf16.vlgmr.msra.gmra.mxu0 %vm380_vm1, %v3750_v10  ;;  %v2335_v46 = vpop.permute.xlu1 %2334 }
 0x4c4   : >> { %2288 = vmatpush.bf16.msra.mxu0 %v2273_v61  ;;  %v2340_v22 = vsel %vm898_vm9, %v2335_v46, %v2337_v58 }
 0x4c6   : >> { %v2339_v17 = vpop.permute.xlu0 %2338 }
 0x4c7   : >> { %v2341_v9 = vsel %vm898_vm9, %v2337_v58, %v2339_v17 }
 0x4cb   : >> { %3626 = vmatmul.msk.bf16.vlgmr.msrb.gmra.mxu2 %vm380_vm1, %v3752_v63 }
 0x4d0   : >> { %3619 = vmatmul.msk.bf16.vlgmr.msra.gmra.mxu3 %vm380_vm1, %v3751_v6 }
 0x4d1   : >> { %2355 = vmatpush.bf16.msra.mxu3 %v2340_v22 }
 0x4d2   : >> { %3625 = vmatmul.msk.bf16.vlgmr.msrb.gmra.mxu1 %vm380_vm1, %v3752_v63 }
 0x4d3   : >> { %2383 = vmatpush.bf16.msrb.mxu1 %v2339_v17  ;;  %3620 = vmatmul.msk.bf16.vlgmr.msrb.gmra.mxu0 %vm380_vm1, %v3751_v6 }
 0x4d4   : >> { %2369 = vmatpush.bf16.msrb.mxu0 %v2341_v9 }
 0x4db   : >> { %3634 = vmatmul.msk.bf16.vlgmr.msra.gmra.mxu2 %vm380_vm1, %v3753_v5 }
 0x4e0   : >> { %3627 = vmatmul.msk.bf16.vlgmr.msrb.gmra.mxu3 %vm380_vm1, %v3752_v63 }
 0x4e2   : >> { %3633 = vmatmul.msk.bf16.vlgmr.msra.gmra.mxu1 %vm380_vm1, %v3753_v5 }
 0x4e3   : >> { %3632 = vmatmul.msk.bf16.vlgmr.msra.gmra.mxu0 %vm380_vm1, %v3753_v5 }
 0x4f0   : >> { %3639 = vmatmul.msk.bf16.vlgmr.msra.gmra.mxu3 %vm380_vm1, %v3754_v19 }
 0x4f2   : >> { %3641 = vmatmul.msk.bf16.vlgmr.msrb.gmra.mxu1 %vm380_vm1, %v3754_v19 }
 0x4f3   : >> { %3640 = vmatmul.msk.bf16.vlgmr.msrb.gmra.mxu0 %vm380_vm1, %v3754_v19 }
 0x50f   : >> { %v1869_v16 = vpop.f32.mrf.mxu1 }
 0x510   : >> { %v1855_v59 = vpop.f32.mrf.mxu0 }
 0x513   : >> { %v1841_v4 = vpop.f32.mrf.mxu3 }
 0x514   : >> { %v1895_v8 = vadd.f32 %v1894_v11, %v1841_v4 }
 0x517   : >> { %v1871_v27 = vpop.f32.mrf.mxu1 }
 0x518   : >> { %v1857_v34 = vpop.f32.mrf.mxu0 }
 0x51b   : >> { %v1843_v36 = vpop.f32.mrf.mxu3 }
 0x51c   : >> { %v1897_v26 = vadd.f32 %v1896_v18, %v1843_v36 }
 0x51e   : >> { %v1969_v35 = vpop.f32.mrf.mxu2 }
 0x51f   : >> { %v1955_v24 = vpop.f32.mrf.mxu1 }
 0x520   : >> { %v1988_v31 = vadd.f32 %v1955_v24, %v1895_v8  ;;  %v1922_v41 = vpop.f32.mrf.mxu0 }
 0x521   : >> { %v1923_v23 = vadd.f32 %v1922_v41, %v1869_v16 }
 0x523   : >> { %v1908_v29 = vpop.f32.mrf.mxu3 }
 0x524   : >> { %v1909_v3 = vadd.f32 %v1908_v29, %v1855_v59 }
 0x526   : >> { %v1971_v2 = vpop.f32.mrf.mxu2  ;;  %v1989_v14 = vadd.f32 %v1969_v35, %v1909_v3 }
 0x527   : >> { %v1957_v42 = vpop.f32.mrf.mxu1 }
 0x528   : >> { %v1991_v43 = vadd.f32 %v1957_v42, %v1897_v26  ;;  %v1924_v44 = vpop.f32.mrf.mxu0 }
 0x529   : >> { %v1925_v39 = vadd.f32 %v1924_v44, %v1871_v27 }
 0x52b   : >> { %v1910_v13 = vpop.f32.mrf.mxu3 }
 0x52c   : >> { %v1911_v58 = vadd.f32 %v1910_v13, %v1857_v34 }
 0x52e   : >> { %v2050_v28 = vpop.f32.mrf.mxu2  ;;  %v1992_v18 = vadd.f32 %v1971_v2, %v1911_v58 }
 0x52f   : >> { %v2036_v47 = vpop.f32.mrf.mxu1 }
 0x530   : >> { %v2022_v21 = vpop.f32.mrf.mxu0  ;;  %v2056_v63 = vadd.f32 %v2036_v47, %v1989_v14  ;;  %v2399_v47 = vpop.permute.xlu1 %2398 }
 0x531   : >> { %v2055_v9 = vadd.f32 %v2022_v21, %v1988_v31 }
 0x533   : >> { %v1983_v25 = vpop.f32.mrf.mxu3 }
 0x534   : >> { %v1990_v20 = vadd.f32 %v1983_v25, %v1923_v23  ;;  %v2419_v25 = vstv %s2418_s27  ;;  %s3887_s27 = smov (%p998_p4), 112  }
 0x536   : >> { %v2052_v45 = vpop.f32.mrf.mxu2  ;;  %v2057_v61 = vadd.f32 %v2050_v28, %v1990_v20 }
 0x537   : >> { %v2038_v48 = vpop.f32.mrf.mxu1 }
 0x538   : >> { %v2024_v49 = vpop.f32.mrf.mxu0  ;;  %v2059_v26 = vadd.f32 %v2038_v48, %v1992_v18  ;;  %v2415_v18 = vld [vmem:[#allocation4 + $0x18] sm:$0xff] }
 0x539   : >> { %v2058_v31 = vadd.f32 %v2024_v49, %v1991_v43 }
 0x53b   : >> { %v1985_v50 = vpop.f32.mrf.mxu3 }
 0x53c   : >> { %v1993_v5 = vadd.f32 %v1985_v50, %v1925_v39 }
 0x53e   : >> { %v2156_v51 = vpop.f32.mrf.mxu2  ;;  %v2060_v36 = vadd.f32 %v2052_v45, %v1993_v5 }
 0x53f   : >> { %v2117_v32 = vpop.f32.mrf.mxu1 }
 0x540   : >> { %v2103_v54 = vpop.f32.mrf.mxu0  ;;  %v2124_v46 = vadd.f32 %v2117_v32, %v2057_v61 }
 0x541   : >> { %v2123_v22 = vadd.f32 %v2103_v54, %v2056_v63  ;;  %v2404_v63 = vpop.permute.xlu2 %2403 }
 0x543   : >> { %v2089_v53 = vpop.f32.mrf.mxu3 }
 0x544   : >> { %v2122_v59 = vadd.f32 %v2089_v53, %v2055_v9 }
 0x546   : >> { %v4313_v1 = vpop.f32.mrf.mxu2  ;;  %v2189_v24 = vadd.f32 %v2156_v51, %v2122_v59  ;;  %v2414_v51 = vld [vmem:[#allocation4 + $0x10] sm:$0xff] }
 0x547   : >> { %v2119_v55 = vpop.f32.mrf.mxu1 }
 0x548   : >> { %v2105_v56 = vpop.f32.mrf.mxu0  ;;  %v2127_v41 = vadd.f32 %v2119_v55, %v2060_v36 }
 0x549   : >> { %v2126_v34 = vadd.f32 %v2105_v56, %v2059_v26 }
 0x54b   : >> { %v2091_v62 = vpop.f32.mrf.mxu3 }
 0x54c   : >> { %v2125_v2 = vadd.f32 %v2091_v62, %v2058_v31  ;;  %v2412_v62 = vld [vmem:[#allocation4] sm:$0xff] }
 0x54e   : >> { %v2237_v52 = vpop.f32.mrf.mxu2 }
 0x54f   : >> { %v2223_v7 = vpop.f32.mrf.mxu1 }
 0x550   : >> { %v2184_v33 = vpop.f32.mrf.mxu0  ;;  %v2256_v44 = vadd.f32 %v2223_v7, %v2189_v24  ;;  %v2192_v7 = vadd.f32 %v4313_v1, %v2125_v2  ;;  %v2445_v24 = vld [vmem:[#allocation3 + $0x8] sm:$0xff] (%p998_p4) }
 0x551   : >> { %v2191_v19 = vadd.f32 %v2184_v33, %v2124_v46  ;;  %v2413_v33 = vld [vmem:[#allocation4 + $0x8] sm:$0xff] }
 0x553   : >> { %v2170_v37 = vpop.f32.mrf.mxu3 }
 0x554   : >> { %v2190_v16 = vadd.f32 %v2170_v37, %v2123_v22  ;;  %v2417_v22 = vld [vmem:[#allocation4 + $0x28] sm:$0xff] }
 0x556   : >> { %v2239_v6 = vpop.f32.mrf.mxu2  ;;  %v2257_v35 = vadd.f32 %v2237_v52, %v2190_v16 }
 0x557   : >> { %v4315_v40 = vpop.f32.mrf.mxu1 }
 0x558   : >> { %v2186_v57 = vpop.f32.mrf.mxu0 }
 0x559   : >> { %v2194_v39 = vadd.f32 %v2186_v57, %v2127_v41 }
 0x55b   : >> { %v2172_v60 = vpop.f32.mrf.mxu3 }
 0x55c   : >> { %v2193_v21 = vadd.f32 %v2172_v60, %v2126_v34  ;;  %v2446_v34 = vld [vmem:[#allocation3 + $0x10] sm:$0xff] (%p998_p4) }
 0x55e   : >> { %v2318_v4 = vpop.f32.mrf.mxu2  ;;  %v2260_v43 = vadd.f32 %v2239_v6, %v2193_v21 }
 0x55f   : >> { %v2304_v10 = vpop.f32.mrf.mxu1 }
 0x560   : >> { %v2290_v12 = vpop.f32.mrf.mxu0  ;;  %v2324_v29 = vadd.f32 %v2304_v10, %v2257_v35  ;;  %v2444_v35 = vld [vmem:[#allocation3] sm:$0xff] (%p998_p4) }
 0x561   : >> { %v2323_v32 = vadd.f32 %v2290_v12, %v2256_v44  ;;  %v2259_v12 = vadd.f32 %v4315_v40, %v2192_v7 }
 0x563   : >> { %v2251_v30 = vpop.f32.mrf.mxu3 }
 0x564   : >> { %v2258_v8 = vadd.f32 %v2251_v30, %v2191_v19  ;;  %v2416_v19 = vld [vmem:[#allocation4 + $0x20] sm:$0xff] }
 0x566   : >> { %v2325_v23 = vadd.f32 %v2318_v4, %v2258_v8  ;;  %v2320_v54 = vpop.f32.mrf.mxu2 }
 0x567   : >> { %v2306_v17 = vpop.f32.mrf.mxu1 }
 0x568   : >> { %v2292_v11 = vpop.f32.mrf.mxu0  ;;  %v2327_v3 = vadd.f32 %v2306_v17, %v2260_v43 }
 0x569   : >> { %v2326_v46 = vadd.f32 %v2292_v11, %v2259_v12 }
 0x56b   : >> { %v2253_v27 = vpop.f32.mrf.mxu3 }
 0x56c   : >> { %v2261_v45 = vadd.f32 %v2253_v27, %v2194_v39  ;;  %v2447_v39 = vld [vmem:[#allocation3 + $0x18] sm:$0xff] (%p998_p4) }
 0x56e   : >> { %v2328_v52 = vadd.f32 %v2320_v54, %v2261_v45  ;;  %v2463_v45 = vld [vmem:[#allocation1 + $0x9] sm:$0xff] (%p998_p4) }
 0x56f   : >> { %v2385_v42 = vpop.f32.mrf.mxu1 }
 0x570   : >> { %v2392_v13 = vadd.f32 %v2385_v42, %v2325_v23  ;;  %v2371_v28 = vpop.f32.mrf.mxu0 }
 0x571   : >> { %v2391_v50 = vadd.f32 %v2371_v28, %v2324_v29 }
 0x572   : >> { %v2408_v48 = vadd.f32 %v2399_v47, %v2392_v13  ;;  %v2448_v13 = vld [vmem:[#allocation3 + $0x20] sm:$0xff] (%p998_p4) }
 0x573   : >> { %v2407_v53 = vadd.f32 %v2399_v47, %v2391_v50  ;;  %v2357_v55 = vpop.f32.mrf.mxu3 }
 0x574   : >> { %v2422_v56 = vmul.f32 %v2419_v25, %v2408_v48  ;;  %v2390_v37 = vadd.f32 %v2357_v55, %v2323_v32  ;;  %v2462_v32 = vld [vmem:[#allocation1] sm:$0xff] (%p998_p4)  ;;  %v2464_v48 = vld [vmem:[#allocation1 + $0x12] sm:$0xff] (%p998_p4) }
 0x575   : >> { %v2421_v49 = vmul.f32 %v2419_v25, %v2407_v53  ;;  %v2465_v54 = vpack.i.b16 (%p998_p4), %v2462_v32, %v2462_v32  ;;  %v2471_v53 = vpack.i.b16 (%p998_p4), %v2464_v48, %v2464_v48 }
 0x576   : >> { %v2428_v57 = vadd.f32 %v2422_v56, %v2414_v51  ;;  %v2406_v60 = vadd.f32 %v2399_v47, %v2390_v37  ;;  %v2449_v47 = vld [vmem:[#allocation3 + $0x28] sm:$0xff] (%p998_p4)  ;;  %v2468_v51 = vpack.i.b16 (%p998_p4), %v2463_v45, %v2463_v45 }
 0x577   : >> { %v2427_v10 = vadd.f32 %v2421_v49, %v2413_v33  ;;  %v2387_v20 = vpop.f32.mrf.mxu1  ;;  %v2467_v37 = vperm.slane (%p998_p4), %v2465_v54, 0  ;;  %v2473_v49 = vperm.slane (%p998_p4), %v2471_v53, 0 }
 0x578   : >> { %2434 = vst.msk [vmem:[#allocation4 + $0x10] sm:$0xff] %vm979_vm10, %v2428_v57  ;;  %v2420_v14 = vmul.f32 %v2419_v25, %v2406_v60  ;;  %v2395_v30 = vadd.f32 %v2387_v20, %v2328_v52  ;;  %v2373_v61 = vpop.f32.mrf.mxu0  ;;  %v2470_v43 = vperm.slane (%p998_p4), %v2468_v51, 0 }
 0x579   : >> { %2433 = vst [vmem:[#allocation4 + $0x8] sm:$0xff] %v2427_v10  ;;  %v2394_v6 = vadd.f32 %v2373_v61, %v2327_v3  ;;  %v2480_v52 = vunpack.c.l.bf16 (%p998_p4), %v2467_v37  ;;  %v2482_v60 = vunpack.c.l.bf16 (%p998_p4), %v2473_v49 }
 0x57a   : >> { %v2426_v58 = vadd.f32 %v2420_v14, %v2412_v62  ;;  %v2411_v1 = vadd.f32 %v2404_v63, %v2395_v30  ;;  %v2481_v57 = vunpack.c.l.bf16 (%p998_p4), %v2470_v43 }
 0x57b   : >> { %v2410_v9 = vadd.f32 %v2404_v63, %v2394_v6  ;;  %v2359_v5 = vpop.f32.mrf.mxu3 }
 0x57c   : >> { %2432 = vst [vmem:[#allocation4] sm:$0xff] %v2426_v58  ;;  %v2425_v17 = vmul.f32 %v2419_v25, %v2411_v1  ;;  %v2393_v16 = vadd.f32 %v2359_v5, %v2326_v46 }
 0x57d   : >> { %v2424_v4 = vmul.f32 %v2419_v25, %v2410_v9 }
 0x57e   : >> { %v2431_v40 = vadd.f32 %v2425_v17, %v2417_v22  ;;  %v2409_v59 = vadd.f32 %v2404_v63, %v2393_v16 }
 0x57f   : >> { %v2430_v8 = vadd.f32 %v2424_v4, %v2416_v19  ;;  %v2440_v23 = vld [vmem:[#allocation4 + $0x10] sm:$0xff] (%p998_p4) }
 0x580   : >> { %2437 = vst.msk [vmem:[#allocation4 + $0x28] sm:$0xff] %vm979_vm10, %v2431_v40  ;;  %v2423_v27 = vmul.f32 %v2419_v25, %v2409_v59  ;;  %v2439_v26 = vld [vmem:[#allocation4 + $0x8] sm:$0xff] (%p998_p4)  ;;  %v2452_v42 = vadd.f32 (%p998_p4), %v2446_v34, %v2440_v23 }
 0x581   : >> { %2436 = vst [vmem:[#allocation4 + $0x20] sm:$0xff] %v2430_v8  ;;  %v2451_v29 = vadd.f32 (%p998_p4), %v2445_v24, %v2439_v26 }
 0x582   : >> { %v2429_v36 = vadd.f32 %v2423_v27, %v2415_v18  ;;  %v2457_v15 = vpack.c.bf16 (%p998_p4), %v2452_v42, %v2452_v42  ;;  %v3760_v42 = vld [vmem:[%s4568_s6 + $0x8] sm:$0xff] (%p998_p4) }
 0x583   : > { %v2438_v11 = vld [vmem:[#allocation4] sm:$0xff] (%p998_p4) }
 0x584   : >> { %2435 = vst [vmem:[#allocation4 + $0x18] sm:$0xff] %v2429_v36  ;;  %v2450_v41 = vadd.f32 (%p998_p4), %v2444_v35, %v2438_v11  ;;  %v2476_v56 = vunpack.c.l.bf16 (%p998_p4), %v2457_v15  ;;  %v3761_v15 = vld [vmem:[%s4568_s6 + $0x10] sm:$0xff] (%p998_p4) }
 0x585   : > { %1000 = sbr.rel (!%p998_p4) target bundleno = 403 (0x193), region = 93 }
 0x586   : > { %v2456_v21 = vpack.c.bf16 (%p998_p4), %v2451_v29, %v2450_v41  ;;  %v2485_v12 = vmul.f32 (%p998_p4), %v2482_v60, %v2476_v56 }
 0x587   : > { %v2443_v28 = vld [vmem:[#allocation4 + $0x28] sm:$0xff] (%p998_p4) }
 0x588   : > { %v2442_v44 = vld [vmem:[#allocation4 + $0x20] sm:$0xff] (%p998_p4)  ;;  %v2455_v2 = vadd.f32 (%p998_p4), %v2449_v47, %v2443_v28  ;;  %v2474_v0 = vunpack.c.l.bf16 (%p998_p4), %v2456_v21  ;;  %v2475_v55 = vunpack.c.h.bf16 (%p998_p4), %v2456_v21  ;;  %v2490_v61 = vpack.c.bf16 (%p998_p4), %v2485_v12, %v2485_v12 }
 0x589   : > { %v2454_v50 = vadd.f32 (%p998_p4), %v2448_v13, %v2442_v44 }
 0x58a   : > { %v2459_v7 = vpack.c.bf16 %v2455_v2, %v2455_v2  ;;  %v2483_v62 = vmul.f32 %v2480_v52, %v2474_v0  ;;  %v2484_v20 = vmul.f32 %v2481_v57, %v2475_v55  ;;  %2499 = vrot.lane.b32.xlu1 %v2490_v61, %s3879_s28  ;;  %v3762_v55 = vld [vmem:[%s4568_s6 + $0x18] sm:$0xff] }
 0x58b   : > { %v2441_v31 = vld [vmem:[#allocation4 + $0x18] sm:$0xff] }
 0x58c   : > { %v2453_v25 = vadd.f32 %v2447_v39, %v2441_v31  ;;  %v2479_v14 = vunpack.c.l.bf16 %v2459_v7  ;;  %v2489_v30 = vpack.c.bf16 %v2484_v20, %v2483_v62 }
 0x58e   : > { %v2458_v33 = vpack.c.bf16 %v2454_v50, %v2453_v25  ;;  %2497 = vrot.lane.b32.xlu0 %v2489_v30, %s3879_s28  ;;  %v2488_v46 = vmul.f32 %v2482_v60, %v2479_v14  ;;  %v3763_v60 = vld [vmem:[%s4568_s6 + $0x20] sm:$0xff]  ;;  %v3764_v30 = vld [vmem:[%s4568_s6 + $0x28] sm:$0xff] }
 0x590   : > { %v2477_v3 = vunpack.c.l.bf16 %v2458_v33  ;;  %v2478_v10 = vunpack.c.h.bf16 %v2458_v33  ;;  %v2492_v1 = vpack.c.bf16 %v2488_v46, %v2488_v46 }
 0x592   : > { %v2486_v63 = vmul.f32 %v2480_v52, %v2477_v3  ;;  %v2487_v6 = vmul.f32 %v2481_v57, %v2478_v10  ;;  %2503 = vrot.lane.b32.xlu1 %v2492_v1, %s3879_s28 }
 0x594   : > { %v2491_v58 = vpack.c.bf16 %v2487_v6, %v2486_v63  ;;  %v3765_v6 = vld [vmem:[%s4568_s6 + $0x30] sm:$0xff] }
 0x596   : > { %2501 = vrot.lane.b32.xlu0 %v2491_v58, %s3879_s28  ;;  %s3888_s28 = smov 100  }
 0x5fc   : > { %v2500_v9 = vpop.permute.xlu1 %2499 }
 0x600   : > { %v2498_v22 = vpop.permute.xlu0 %2497 }
 0x601   : > { %v2505_v5 = vrot.slane %v2498_v22, 4 }
 0x603   : > { %v2508_v17 = vsel %vm1059_vm13, %v2505_v5, %v2498_v22  ;;  %v2509_v19 = vsel %vm1059_vm13, %v2505_v5, %v2500_v9  ;;  %v2542_v22 = vld [vmem:[%s4569_s7] sm:$0xff]  ;;  %v3766_v9 = vld [vmem:[%s4568_s6 + $0x38] sm:$0xff] }
 0x604   : > { %2519 = vst.msk [vmem:[#allocation2] sm:$0xff] %vm4105_vm14, %v2508_v17  ;;  %v2504_v4 = vpop.permute.xlu1 %2503 }
 0x605   : > { %2521 = vst.msk [vmem:[#allocation2 + $0x8] sm:$0xf] %vm1072_vm15, %v2509_v19  ;;  %v3767_v19 = vld [vmem:[%s4568_s6 + $0x40] sm:$0xff] }
 0x608   : > { %v2502_v16 = vpop.permute.xlu0 %2501 }
 0x609   : > { %v2506_v40 = vrot.slane %v2502_v16, 4 }
 0x60b   : > { %v2510_v59 = vsel %vm1059_vm13, %v2506_v40, %v2502_v16  ;;  %v2511_v8 = vsel %vm1059_vm13, %v2506_v40, %v2504_v4  ;;  %v3768_v18 = vld [vmem:[#allocation2 + $0x4] sm:$0xf]  ;;  %v3648_v27 = vld [vmem:[#allocation2] sm:$0xf] }
 0x60c   : > { %2522 = vst.msk [vmem:[#allocation2 + $0xc] sm:$0xff] %vm4105_vm14, %v2510_v59  ;;  %v3656_v41 = vld [vmem:[#allocation2 + $0x8] sm:$0xf]  ;;  %v2543_v16 = vld [vmem:[%s4569_s7 + $0x8] sm:$0xff] }
 0x60d   : > { %2523 = vst.msk [vmem:[#allocation2 + $0x14] sm:$0xf] %vm1072_vm15, %v2511_v8 }
 0x613   : > { %v3650_v36 = vld [vmem:[#allocation2 + $0xc] sm:$0xf0]  ;;  %v3769_v11 = vld [vmem:[#allocation2 + $0x8] sm:$0xf0] }
 0x614   : > { %v3649_v26 = vor.u32 %v3769_v11, %v3648_v27  ;;  %v3653_v35 = vor.u32 %v3768_v18, %v3650_v36  ;;  %v3770_v24 = vld [vmem:[#allocation2 + $0x10] sm:$0xf0] }
 0x615   : > { %v3657_v23 = vor.u32 %v3770_v24, %v3656_v41 }
 0x616   : > { %2680 = vrot.lane.b32.xlu1 %v3649_v26, %s3861_s23  ;;  %2566 = vrot.lane.b32.xlu0 %v3649_v26, %s3860_s22 }
 0x617   : > { %2640 = vmatpush.bf16.msra.mxu3 %v3649_v26  ;;  %2568 = vrot.lane.b32.xlu2 %v3653_v35, %s3860_s22 }
 0x61a   : > { %3665 = vmatmul.msk.bf16.vlgmr.msra.gmra.mxu3 %vm380_vm1, %v3759_v38 }
 0x61e   : > { %2684 = vrot.lane.b32.xlu0 %v3657_v23, %s3861_s23  ;;  %2749 = vrot.lane.b32.xlu1 %v3653_v35, %s3862_s24 }
 0x61f   : > { %2570 = vrot.lane.b32.xlu2 %v3657_v23, %s3860_s22  ;;  %s4581_s22 = smov 91  }
 0x626   : > { %2747 = vrot.lane.b32.xlu0 %v3649_v26, %s3862_s24  ;;  %2816 = vrot.lane.b32.xlu1 %v3653_v35, %s3863_s25 }
 0x627   : > { %2682 = vrot.lane.b32.xlu2 %v3653_v35, %s3861_s23 }
 0x62e   : > { %2814 = vrot.lane.b32.xlu0 %v3649_v26, %s3863_s25  ;;  %2881 = vrot.lane.b32.xlu1 %v3649_v26, %s3864_s26 }
 0x62f   : > { %2751 = vrot.lane.b32.xlu2 %v3657_v23, %s3862_s24 }
 0x636   : > { %2948 = vrot.lane.b32.xlu0 %v3649_v26, %s4580_s30  ;;  %2950 = vrot.lane.b32.xlu1 %v3653_v35, %s4580_s30 }
 0x637   : > { %2818 = vrot.lane.b32.xlu2 %v3657_v23, %s3863_s25 }
 0x63e   : > { %2952 = vrot.lane.b32.xlu0 %v3657_v23, %s4580_s30  ;;  %3017 = vrot.lane.b32.xlu1 %v3653_v35, %s4581_s22  ;;  %s3889_s30 = smov 106  }
 0x63f   : > { %2883 = vrot.lane.b32.xlu2 %v3653_v35, %s3864_s26 }
 0x646   : > { %3015 = vrot.lane.b32.xlu0 %v3649_v26, %s4581_s22  ;;  %3084 = vrot.lane.b32.xlu1 %v3653_v35, %s4582_s10 }
 0x647   : > { %2885 = vrot.lane.b32.xlu2 %v3657_v23, %s3864_s26 }
 0x64e   : > { %3082 = vrot.lane.b32.xlu0 %v3649_v26, %s4582_s10  ;;  %3146 = vperm.xlu1 %3826, %v2542_v22  }
 0x64f   : > { %3019 = vrot.lane.b32.xlu2 %v3657_v23, %s4581_s22  ;;  %s3890_s22 = smov 104  }
 0x657   : > { %3086 = vrot.lane.b32.xlu2 %v3657_v23, %s4582_s10 }
 0x65f   : > { %3151 = vperm.xlu2 %3827, %v2543_v16  }
 0x671   : > { %v2569_v34 = vpop.permute.xlu2 %2568 }
 0x679   : > { %v2571_v29 = vpop.permute.xlu2 %2570 }
 0x67a   : > { %2615 = vmatpush.bf16.msra.mxu2 %v2571_v29  ;;  %v2573_v31 = vsel %vm374_vm3, %v2569_v34, %v2571_v29 }
 0x67b   : > { %2601 = vmatpush.bf16.msra.mxu1 %v2573_v31 }
 0x67d   : > { %3660 = vmatmul.msk.bf16.vlgmr.msra.gmra.mxu2 %vm380_vm1, %v3760_v42 }
 0x67e   : > { %3659 = vmatmul.msk.bf16.vlgmr.msra.gmra.mxu1 %vm380_vm1, %v3760_v42 }
 0x67f   : > { %2668 = vmatpush.bf16.msrb.mxu1 %v3657_v23 }
 0x681   : > { %v2683_v44 = vpop.permute.xlu2 %2682 }
 0x688   : > { %v2681_v39 = vpop.permute.xlu1 %2680  ;;  %v2567_v13 = vpop.permute.xlu0 %2566 }
 0x689   : > { %v2752_v28 = vpop.permute.xlu2 %2751  ;;  %v2572_v47 = vsel %vm374_vm3, %v2567_v13, %v2569_v34  ;;  %v2686_v21 = vsel %vm490_vm2, %v2681_v39, %v2683_v44  ;;  %vm3188_vm3 = vcmask 523648  }
 0x68a   : > { %2587 = vmatpush.bf16.msra.mxu0 %v2572_v47  ;;  %2701 = vmatpush.bf16.msrb.mxu2 %v2686_v21 }
 0x68d   : > { %3658 = vmatmul.msk.bf16.vlgmr.msra.gmra.mxu0 %vm380_vm1, %v3760_v42  ;;  %3672 = vmatmul.msk.bf16.vlgmr.msrb.gmra.mxu2 %vm380_vm1, %v3761_v15 }
 0x68e   : > { %2654 = vmatpush.bf16.msrb.mxu0 %v3653_v35  ;;  %3667 = vmatmul.msk.bf16.vlgmr.msrb.gmra.mxu1 %vm380_vm1, %v3759_v38 }
 0x690   : > { %v2685_v25 = vpop.permute.xlu0 %2684  ;;  %v2750_v50 = vpop.permute.xlu1 %2749 }
 0x691   : > { %v2754_v2 = vsel %vm558_vm4, %v2750_v50, %v2752_v28  ;;  %v2819_v32 = vpop.permute.xlu2 %2818  ;;  %v2687_v45 = vsel %vm490_vm2, %v2683_v44, %v2685_v25  ;;  %vm3179_vm2 = vcmask 392448  }
 0x692   : > { %2729 = vmatpush.bf16.msra.mxu0 %v2685_v25  ;;  %2715 = vmatpush.bf16.msrb.mxu3 %v2687_v45 }
 0x693   : > { %2782 = vmatpush.bf16.msra.mxu2 %v2754_v2 }
 0x695   : > { %3673 = vmatmul.msk.bf16.vlgmr.msrb.gmra.mxu3 %vm380_vm1, %v3761_v15 }
 0x696   : > { %2796 = vmatpush.bf16.msra.mxu3 %v2752_v28 }
 0x697   : > { %2863 = vmatpush.bf16.msrb.mxu2 %v2819_v32 }
 0x698   : > { %v2748_v48 = vpop.permute.xlu0 %2747  ;;  %v2817_v54 = vpop.permute.xlu1 %2816 }
 0x699   : > { %v2753_v51 = vsel %vm558_vm4, %v2748_v48, %v2750_v50  ;;  %v2821_v53 = vsel %vm626_vm5, %v2817_v54, %v2819_v32  ;;  %v2884_v0 = vpop.permute.xlu2 %2883  ;;  %vm3197_vm4 = vcmask 654848  }
 0x69a   : > { %2768 = vmatpush.bf16.msra.mxu1 %v2753_v51 }
 0x69d   : > { %3666 = vmatmul.msk.bf16.vlgmr.msrb.gmra.mxu0 %vm380_vm1, %v3759_v38  ;;  %3680 = vmatmul.msk.bf16.vlgmr.msra.gmra.mxu2 %vm380_vm1, %v3762_v55  ;;  %v2642_v8 = vpop.f32.mrf.mxu3 }
 0x69e   : > { %2849 = vmatpush.bf16.msrb.mxu1 %v2821_v53 }
 0x69f   : > { %3679 = vmatmul.msk.bf16.vlgmr.msra.gmra.mxu1 %vm380_vm1, %v3762_v55 }
 0x6a0   : > { %v2815_v56 = vpop.permute.xlu0 %2814  ;;  %v2882_v33 = vpop.permute.xlu1 %2881 }
 0x6a1   : > { %v2820_v37 = vsel %vm626_vm5, %v2815_v56, %v2817_v54  ;;  %v2887_v43 = vsel %vm694_vm6, %v2882_v33, %v2884_v0  ;;  %v2886_v49 = vpop.permute.xlu2 %2885  ;;  %vm3206_vm5 = vcmask 786048  }
 0x6a2   : > { %2930 = vmatpush.bf16.msra.mxu1 %v2886_v49  ;;  %2835 = vmatpush.bf16.msrb.mxu0 %v2820_v37  ;;  %v2888_v3 = vsel %vm694_vm6, %v2884_v0, %v2886_v49  ;;  %vm3215_vm6 = vcmask 917248  }
 0x6a3   : > { %2902 = vmatpush.bf16.msrb.mxu3 %v2887_v43 }
 0x6a5   : > { %3681 = vmatmul.msk.bf16.vlgmr.msra.gmra.mxu3 %vm380_vm1, %v3762_v55  ;;  %v2644_v35 = vpop.f32.mrf.mxu3 }
 0x6a8   : > { %v2949_v7 = vpop.permute.xlu0 %2948  ;;  %v2951_v52 = vpop.permute.xlu1 %2950 }
 0x6a9   : > { %v2954_v57 = vsel %vm762_vm7, %v2949_v7, %v2951_v52  ;;  %v3020_v10 = vpop.permute.xlu2 %3019 }
 0x6aa   : > { %2969 = vmatpush.bf16.msra.mxu2 %v2954_v57 }
 0x6ad   : > { %3674 = vmatmul.msk.bf16.vlgmr.msra.gmra.mxu0 %vm380_vm1, %v3761_v15  ;;  %3688 = vmatmul.msk.bf16.vlgmr.msrb.gmra.mxu2 %vm380_vm1, %v3763_v60 }
 0x6ae   : > { %2916 = vmatpush.bf16.msra.mxu0 %v2888_v3 }
 0x6af   : > { %3687 = vmatmul.msk.bf16.vlgmr.msrb.gmra.mxu1 %vm380_vm1, %v3763_v60 }
 0x6b0   : > { %v2953_v62 = vpop.permute.xlu0 %2952  ;;  %v3018_v20 = vpop.permute.xlu1 %3017 }
 0x6b1   : > { %v2955_v12 = vsel %vm762_vm7, %v2951_v52, %v2953_v62  ;;  %v3022_v14 = vsel %vm830_vm8, %v3018_v20, %v3020_v10  ;;  %v3087_v58 = vpop.permute.xlu2 %3086  ;;  %vm3228_vm7 = vcmask 932864  }
 0x6b2   : > { %2983 = vmatpush.bf16.msra.mxu3 %v2955_v12  ;;  %3050 = vmatpush.bf16.msrb.mxu2 %v3022_v14 }
 0x6b5   : > { %3693 = vmatmul.msk.bf16.vlgmr.msrb.gmra.mxu3 %vm380_vm1, %v3764_v30 }
 0x6b6   : > { %3064 = vmatpush.bf16.msrb.mxu3 %v3020_v10 }
 0x6b8   : > { %v3016_v61 = vpop.permute.xlu0 %3015  ;;  %v3085_v46 = vpop.permute.xlu1 %3084 }
 0x6b9   : > { %v3021_v63 = vsel %vm830_vm8, %v3016_v61, %v3018_v20  ;;  %v3089_v1 = vsel %vm898_vm9, %v3085_v46, %v3087_v58  ;;  %vm3233_vm8 = vcmask 1048448  }
 0x6ba   : > { %3036 = vmatpush.bf16.msrb.mxu1 %v3021_v63 }
 0x6bd   : > { %3686 = vmatmul.msk.bf16.vlgmr.msrb.gmra.mxu0 %vm380_vm1, %v3763_v60  ;;  %3700 = vmatmul.msk.bf16.vlgmr.msra.gmra.mxu2 %vm380_vm1, %v3765_v6 }
 0x6be   : > { %2997 = vmatpush.bf16.msrb.mxu0 %v2953_v62  ;;  %3131 = vmatpush.bf16.msra.mxu2 %v3087_v58 }
 0x6bf   : > { %3695 = vmatmul.msk.bf16.vlgmr.msra.gmra.mxu1 %vm380_vm1, %v3764_v30 }
 0x6c0   : > { %3117 = vmatpush.bf16.msra.mxu1 %v3089_v1  ;;  %v3083_v5 = vpop.permute.xlu0 %3082 }
 0x6c1   : > { %v3088_v17 = vsel %vm898_vm9, %v3083_v5, %v3085_v46  ;;  %vm3294_vm9 = vcmask 818176  }
 0x6c5   : > { %3701 = vmatmul.msk.bf16.vlgmr.msra.gmra.mxu3 %vm380_vm1, %v3765_v6 }
 0x6cd   : > { %3694 = vmatmul.msk.bf16.vlgmr.msra.gmra.mxu0 %vm380_vm1, %v3764_v30  ;;  %3708 = vmatmul.msk.bf16.vlgmr.msrb.gmra.mxu2 %vm380_vm1, %v3766_v9 }
 0x6ce   : > { %3103 = vmatpush.bf16.msra.mxu0 %v3088_v17 }
 0x6cf   : > { %3707 = vmatmul.msk.bf16.vlgmr.msrb.gmra.mxu1 %vm380_vm1, %v3766_v9 }
 0x6d5   : > { %3709 = vmatmul.msk.bf16.vlgmr.msrb.gmra.mxu3 %vm380_vm1, %v3766_v9 }
 0x6dd   : > { %3702 = vmatmul.msk.bf16.vlgmr.msrb.gmra.mxu0 %vm380_vm1, %v3765_v6  ;;  %3716 = vmatmul.msk.bf16.vlgmr.msra.gmra.mxu2 %vm380_vm1, %v3767_v19 }
 0x6df   : > { %3715 = vmatmul.msk.bf16.vlgmr.msra.gmra.mxu1 %vm380_vm1, %v3767_v19 }
 0x6ed   : > { %3714 = vmatmul.msk.bf16.vlgmr.msra.gmra.mxu0 %vm380_vm1, %v3767_v19 }
 0x6fb   : > { %v2603_v4 = vpop.f32.mrf.mxu1 }
 0x700   : > { %v2617_v40 = vpop.f32.mrf.mxu2 }
 0x703   : > { %v2605_v59 = vpop.f32.mrf.mxu1 }
 0x708   : > { %v2619_v18 = vpop.f32.mrf.mxu2 }
 0x70a   : > { %v2589_v27 = vpop.f32.mrf.mxu0 }
 0x70b   : > { %v2670_v36 = vpop.f32.mrf.mxu1  ;;  %v2643_v20 = vadd.f32 %v2642_v8, %v2589_v27 }
 0x70c   : > { %v2671_v11 = vadd.f32 %v2670_v36, %v2617_v40  ;;  %v3147_v36 = vpop.permute.xlu1 %3146 }
 0x710   : > { %v2703_v26 = vpop.f32.mrf.mxu2 }
 0x711   : > { %v2736_v14 = vadd.f32 %v2703_v26, %v2643_v20 }
 0x712   : > { %v2591_v24 = vpop.f32.mrf.mxu0 }
 0x713   : > { %v2672_v41 = vpop.f32.mrf.mxu1  ;;  %v2645_v58 = vadd.f32 %v2644_v35, %v2591_v24 }
 0x714   : > { %v2673_v23 = vadd.f32 %v2672_v41, %v2619_v18 }
 0x718   : > { %v2705_v38 = vpop.f32.mrf.mxu2  ;;  %v2717_v34 = vpop.f32.mrf.mxu3 }
 0x719   : > { %v2739_v22 = vadd.f32 %v2705_v38, %v2645_v58 }
 0x71a   : > { %v2656_v29 = vpop.f32.mrf.mxu0 }
 0x71b   : > { %v2657_v42 = vadd.f32 %v2656_v29, %v2603_v4 }
 0x71c   : > { %v2770_v31 = vpop.f32.mrf.mxu1 }
 0x71d   : > { %v2803_v61 = vadd.f32 %v2770_v31, %v2736_v14  ;;  %v2737_v8 = vadd.f32 %v2717_v34, %v2657_v42 }
 0x720   : > { %v2784_v44 = vpop.f32.mrf.mxu2  ;;  %v2719_v39 = vpop.f32.mrf.mxu3 }
 0x722   : > { %v2658_v13 = vpop.f32.mrf.mxu0 }
 0x723   : > { %v2659_v28 = vadd.f32 %v2658_v13, %v2605_v59 }
 0x724   : > { %v2772_v47 = vpop.f32.mrf.mxu1 }
 0x725   : > { %v2740_v21 = vadd.f32 %v2719_v39, %v2659_v28  ;;  %v2806_v17 = vadd.f32 %v2772_v47, %v2739_v22 }
 0x728   : > { %v2786_v15 = vpop.f32.mrf.mxu2  ;;  %v4439_v25 = vpop.f32.mrf.mxu3 }
 0x729   : > { %v2807_v50 = vadd.f32 %v2786_v15, %v2740_v21 }
 0x72a   : > { %v2731_v2 = vpop.f32.mrf.mxu0 }
 0x72b   : > { %v4441_v32 = vadd.f32 %v2731_v2, %v2671_v11  ;;  %v2804_v11 = vadd.f32 %v2784_v44, %v2737_v8  ;;  %v4458_v44 = vpop.permute.xlu2 %3151 }
 0x72c   : > { %v2851_v45 = vpop.f32.mrf.mxu1 }
 0x72d   : > { %v2871_v35 = vadd.f32 %v2851_v45, %v2804_v11  ;;  %v2805_v2 = vadd.f32 %v4439_v25, %v4441_v32 }
 0x730   : > { %v4443_v48 = vpop.f32.mrf.mxu2  ;;  %v2800_v51 = vpop.f32.mrf.mxu3 }
 0x732   : > { %v2733_v54 = vpop.f32.mrf.mxu0 }
 0x733   : > { %v2741_v53 = vadd.f32 %v2733_v54, %v2673_v23  ;;  %v2872_v54 = vadd.f32 %v4443_v48, %v2805_v2 }
 0x734   : > { %v2853_v0 = vpop.f32.mrf.mxu1 }
 0x735   : > { %v2874_v55 = vadd.f32 %v2853_v0, %v2807_v50  ;;  %v2808_v56 = vadd.f32 %v2800_v51, %v2741_v53 }
 0x738   : > { %v2867_v33 = vpop.f32.mrf.mxu2  ;;  %v2904_v12 = vpop.f32.mrf.mxu3 }
 0x739   : > { %v2875_v37 = vadd.f32 %v2867_v33, %v2808_v56 }
 0x73a   : > { %v2837_v43 = vpop.f32.mrf.mxu0 }
 0x73b   : > { %v2870_v63 = vadd.f32 %v2837_v43, %v2803_v61 }
 0x73c   : > { %v4445_v49 = vpop.f32.mrf.mxu1 }
 0x73d   : > { %v2937_v9 = vadd.f32 %v2904_v12, %v2870_v63  ;;  %v2939_v51 = vadd.f32 %v4445_v49, %v2872_v54 }
 0x740   : > { %v2971_v30 = vpop.f32.mrf.mxu2  ;;  %v2906_v5 = vpop.f32.mrf.mxu3 }
 0x741   : > { %v3004_v19 = vadd.f32 %v2971_v30, %v2937_v9 }
 0x742   : > { %v2839_v7 = vpop.f32.mrf.mxu0 }
 0x743   : > { %v2873_v4 = vadd.f32 %v2839_v7, %v2806_v17 }
 0x744   : > { %v2934_v52 = vpop.f32.mrf.mxu1 }
 0x745   : > { %v2942_v57 = vadd.f32 %v2934_v52, %v2875_v37  ;;  %v2940_v26 = vadd.f32 %v2906_v5, %v2873_v4 }
 0x748   : > { %v2973_v16 = vpop.f32.mrf.mxu2  ;;  %v2985_v23 = vpop.f32.mrf.mxu3 }
 0x749   : > { %v3007_v24 = vadd.f32 %v2973_v16, %v2940_v26 }
 0x74a   : > { %v2918_v60 = vpop.f32.mrf.mxu0 }
 0x74b   : > { %v2938_v38 = vadd.f32 %v2918_v60, %v2871_v35 }
 0x74c   : > { %v3038_v6 = vpop.f32.mrf.mxu1 }
 0x74d   : > { %v3071_v40 = vadd.f32 %v3038_v6, %v3004_v19  ;;  %v3005_v39 = vadd.f32 %v2985_v23, %v2938_v38 }
 0x750   : > { %v3052_v29 = vpop.f32.mrf.mxu2  ;;  %v2987_v15 = vpop.f32.mrf.mxu3 }
 0x751   : > { %v3072_v47 = vadd.f32 %v3052_v29, %v3005_v39 }
 0x752   : > { %v2920_v3 = vpop.f32.mrf.mxu0 }
 0x753   : > { %v4447_v10 = vadd.f32 %v2920_v3, %v2874_v55 }
 0x754   : > { %v3040_v27 = vpop.f32.mrf.mxu1 }
 0x755   : > { %v3074_v34 = vadd.f32 %v3040_v27, %v3007_v24  ;;  %v3008_v48 = vadd.f32 %v2987_v15, %v4447_v10 }
 0x758   : > { %v3054_v50 = vpop.f32.mrf.mxu2  ;;  %v3066_v0 = vpop.f32.mrf.mxu3 }
 0x759   : > { %v3075_v37 = vadd.f32 %v3054_v50, %v3008_v48 }
 0x75a   : > { %v4449_v62 = vpop.f32.mrf.mxu0 }
 0x75b   : > { %v3006_v53 = vadd.f32 %v4449_v62, %v2939_v51 }
 0x75c   : > { %v3119_v28 = vpop.f32.mrf.mxu1 }
 0x75d   : > { %v3139_v21 = vadd.f32 %v3119_v28, %v3072_v47  ;;  %v3073_v56 = vadd.f32 %v3066_v0, %v3006_v53 }
 0x75f   : > { %v3155_v45 = vadd.f32 %v3147_v36, %v3139_v21 }
 0x760   : > { %v3133_v55 = vpop.f32.mrf.mxu2  ;;  %v3068_v7 = vpop.f32.mrf.mxu3 }
 0x761   : > { %v3140_v25 = vadd.f32 %v3133_v55, %v3073_v56 }
 0x762   : > { %v3001_v46 = vpop.f32.mrf.mxu0 }
 0x763   : > { %v4451_v1 = vadd.f32 %v3001_v46, %v2942_v57  ;;  %v3156_v32 = vadd.f32 %v3147_v36, %v3140_v25 }
 0x764   : > { %v3121_v33 = vpop.f32.mrf.mxu1 }
 0x765   : > { %v3142_v43 = vadd.f32 %v3121_v33, %v3075_v37  ;;  %v3076_v57 = vadd.f32 %v3068_v7, %v4451_v1 }
 0x767   : > { %v3158_v49 = vadd.f32 %v4458_v44, %v3142_v43 }
 0x768   : > { %v3135_v52 = vpop.f32.mrf.mxu2 }
 0x769   : > { %v3143_v60 = vadd.f32 %v3135_v52, %v3076_v57 }
 0x76a   : > { %v3105_v59 = vpop.f32.mrf.mxu0 }
 0x76b   : > { %v3138_v18 = vadd.f32 %v3105_v59, %v3071_v40  ;;  %v3159_v3 = vadd.f32 %v4458_v44, %v3143_v60 }
 0x76d   : > { %v3154_v41 = vadd.f32 %v3147_v36, %v3138_v18 }
 0x76f   : > { %3160 = vst.msk [vmem:[%s3956_s18] sm:$0xff] %vm380_vm1, %v3154_v41  ;;  %3182 = vrot.lane.b32.xlu1 %v3154_v41, %s3880_s15  ;;  %3173 = vrot.lane.b32.xlu2 %v3154_v41, %s3881_s16 }
 0x770   : > { %3164 = vrot.lane.b32.xlu0 %v3154_v41, %s3861_s23 }
 0x772   : > { %v3107_v42 = vpop.f32.mrf.mxu0 }
 0x773   : > { %v3141_v31 = vadd.f32 %v3107_v42, %v3074_v34 }
 0x775   : > { %v3157_v13 = vadd.f32 %v4458_v44, %v3141_v31 }
 0x777   : > { %3161 = vst.msk [vmem:[%s3956_s18 + $0x10] sm:$0xff] %vm380_vm1, %v3157_v13  ;;  %3209 = vrot.lane.b32.xlu1 %v3154_v41, %s3882_s17  ;;  %3200 = vrot.lane.b32.xlu2 %v3154_v41, %s3883_s19 }
 0x778   : > { %3191 = vrot.lane.b32.xlu0 %v3154_v41, %s3884_s29 }
 0x77f   : > { %3252 = vrot.lane.b32.xlu2 %v3155_v45, %s3864_s26  ;;  %3222 = vrot.lane.b32.xlu1 %v3155_v45, %s3885_s20 }
 0x780   : > { %3220 = vrot.lane.b32.xlu0 %v3154_v41, %s3885_s20 }
 0x787   : > { %3276 = vrot.lane.b32.xlu2 %v3155_v45, %s3886_s21  ;;  %3236 = vrot.lane.b32.xlu1 %v3155_v45, %s3887_s27 }
 0x788   : > { %3244 = vrot.lane.b32.xlu0 %v3155_v45, %s3862_s24 }
 0x78f   : > { %3288 = vrot.lane.b32.xlu2 %v3156_v32, %s3888_s28  ;;  %3260 = vrot.lane.b32.xlu1 %v3155_v45, %s3889_s30 }
 0x790   : > { %3268 = vrot.lane.b32.xlu0 %v3155_v45, %s3890_s22 }
 0x797   : > { %3286 = vrot.lane.b32.xlu1 %v3155_v45, %s3888_s28  ;;  %3184 = vrot.lane.b32.xlu2 %v3157_v13, %s3880_s15 }
 0x798   : > { %3175 = vrot.lane.b32.xlu0 %v3157_v13, %s3881_s16 }
 0x79f   : > { %3211 = vrot.lane.b32.xlu2 %v3157_v13, %s3882_s17  ;;  %3166 = vrot.lane.b32.xlu1 %v3157_v13, %s3861_s23  ;;  %s3891_s23 = smov 98  }
 0x7a0   : > { %3202 = vrot.lane.b32.xlu0 %v3157_v13, %s3883_s19 }
 0x7a7   : > { %3224 = vrot.lane.b32.xlu2 %v3157_v13, %s3885_s20  ;;  %3193 = vrot.lane.b32.xlu1 %v3157_v13, %s3884_s29 }
 0x7a8   : > { %3226 = vrot.lane.b32.xlu0 %v3158_v49, %s3885_s20 }
 0x7af   : > { %3238 = vrot.lane.b32.xlu2 %v3158_v49, %s3887_s27  ;;  %3246 = vrot.lane.b32.xlu1 %v3158_v49, %s3862_s24 }
 0x7b0   : > { %3254 = vrot.lane.b32.xlu0 %v3158_v49, %s3864_s26 }
 0x7b7   : > { %3262 = vrot.lane.b32.xlu2 %v3158_v49, %s3889_s30  ;;  %3270 = vrot.lane.b32.xlu1 %v3158_v49, %s3890_s22 }
 0x7b8   : > { %3278 = vrot.lane.b32.xlu0 %v3158_v49, %s3886_s21 }
 0x7bf   : > { %3301 = vrot.lane.b32.xlu2 %v3156_v32, %s3891_s23  ;;  %3292 = vrot.lane.b32.xlu1 %v3159_v3, %s3888_s28 }
 0x7c0   : > { %3290 = vrot.lane.b32.xlu0 %v3158_v49, %s3888_s28 }
 0x7c8   : > { %3303 = vrot.lane.b32.xlu0 %v3159_v3, %s3891_s23 }
 0x7c9   : > { %v3174_v10 = vpop.permute.xlu2 %3173 }
 0x7d1   : > { %v3201_v62 = vpop.permute.xlu2 %3200 }
 0x7d9   : > { %v3253_v20 = vpop.permute.xlu2 %3252 }
 0x7e1   : > { %v3183_v12 = vpop.permute.xlu1 %3182  ;;  %v3277_v14 = vpop.permute.xlu2 %3276 }
 0x7e2   : > { %v3165_v30 = vpop.permute.xlu0 %3164 }
 0x7e3   : > { %3171 = vst.msk [vmem:[%s3956_s18] sm:$0xff] %vm3170_vm0, %v3165_v30 }
 0x7e4   : > { %3180 = vst.msk [vmem:[%s3956_s18] sm:$0xff] %vm3179_vm2, %v3174_v10 }
 0x7e5   : > { %3189 = vst.msk [vmem:[%s3956_s18] sm:$0xff] %vm3188_vm3, %v3183_v12 }
 0x7e9   : > { %v3210_v61 = vpop.permute.xlu1 %3209  ;;  %v3289_v63 = vpop.permute.xlu2 %3288 }
 0x7ea   : > { %v3192_v6 = vpop.permute.xlu0 %3191 }
 0x7eb   : > { %3198 = vst.msk [vmem:[%s3956_s18] sm:$0xff] %vm3197_vm4, %v3192_v6 }
 0x7ec   : > { %3207 = vst.msk [vmem:[%s3956_s18] sm:$0xff] %vm3206_vm5, %v3201_v62 }
 0x7ed   : > { %3216 = vst.msk [vmem:[%s3956_s18] sm:$0xff] %vm3215_vm6, %v3210_v61 }
 0x7f1   : > { %v3223_v46 = vpop.permute.xlu1 %3222  ;;  %v3185_v58 = vpop.permute.xlu2 %3184 }
 0x7f2   : > { %v3221_v1 = vpop.permute.xlu0 %3220 }
 0x7f3   : > { %v3229_v22 = vsel %vm3228_vm7, %v3221_v1, %v3223_v46 }
 0x7f4   : > { %3234 = vst.msk [vmem:[%s3956_s18] sm:$0xff] %vm3233_vm8, %v3229_v22 }
 0x7f9   : > { %v3237_v9 = vpop.permute.xlu1 %3236  ;;  %v3212_v5 = vpop.permute.xlu2 %3211 }
 0x7fa   : > { %v3245_v17 = vpop.permute.xlu0 %3244  ;;  %3242 = vst.msk [vmem:[%s3956_s18 + $0x8] sm:$0xff] %vm380_vm1, %v3237_v9 }
 0x7fb   : > { %3250 = vst.msk [vmem:[%s3956_s18 + $0x8] sm:$0xff] %vm3170_vm0, %v3245_v17 }
 0x7fc   : > { %3258 = vst.msk [vmem:[%s3956_s18 + $0x8] sm:$0xff] %vm3179_vm2, %v3253_v20 }
 0x801   : > { %v3261_v19 = vpop.permute.xlu1 %3260  ;;  %v3225_v16 = vpop.permute.xlu2 %3224 }
 0x802   : > { %v3269_v4 = vpop.permute.xlu0 %3268  ;;  %3266 = vst.msk [vmem:[%s3956_s18 + $0x8] sm:$0xff] %vm3188_vm3, %v3261_v19 }
 0x803   : > { %3274 = vst.msk [vmem:[%s3956_s18 + $0x8] sm:$0xff] %vm3197_vm4, %v3269_v4 }
 0x804   : > { %3282 = vst.msk [vmem:[%s3956_s18 + $0x8] sm:$0xff] %vm3206_vm5, %v3277_v14 }
 0x809   : > { %v3287_v40 = vpop.permute.xlu1 %3286  ;;  %v3239_v59 = vpop.permute.xlu2 %3238 }
 0x80a   : > { %v3295_v8 = vsel %vm3294_vm9, %v3287_v40, %v3289_v63  ;;  %v3176_v18 = vpop.permute.xlu0 %3175  ;;  %3243 = vst.msk [vmem:[%s3956_s18 + $0x18] sm:$0xff] %vm380_vm1, %v3239_v59 }
 0x80b   : > { %3299 = vst.msk [vmem:[%s3956_s18 + $0x8] sm:$0xff] %vm3215_vm6, %v3295_v8 }
 0x811   : > { %v3167_v27 = vpop.permute.xlu1 %3166  ;;  %v3263_v36 = vpop.permute.xlu2 %3262 }
 0x812   : > { %v3203_v11 = vpop.permute.xlu0 %3202  ;;  %3172 = vst.msk [vmem:[%s3956_s18 + $0x10] sm:$0xff] %vm3170_vm0, %v3167_v27 }
 0x813   : > { %3181 = vst.msk [vmem:[%s3956_s18 + $0x10] sm:$0xff] %vm3179_vm2, %v3176_v18 }
 0x814   : > { %3190 = vst.msk [vmem:[%s3956_s18 + $0x10] sm:$0xff] %vm3188_vm3, %v3185_v58 }
 0x819   : > { %v3194_v26 = vpop.permute.xlu1 %3193  ;;  %v3302_v35 = vpop.permute.xlu2 %3301 }
 0x81a   : > { %v3227_v41 = vpop.permute.xlu0 %3226  ;;  %3199 = vst.msk [vmem:[%s3956_s18 + $0x10] sm:$0xff] %vm3197_vm4, %v3194_v26 }
 0x81b   : > { %3208 = vst.msk [vmem:[%s3956_s18 + $0x10] sm:$0xff] %vm3206_vm5, %v3203_v11  ;;  %v3230_v24 = vsel %vm3228_vm7, %v3225_v16, %v3227_v41 }
 0x81c   : > { %3217 = vst.msk [vmem:[%s3956_s18 + $0x10] sm:$0xff] %vm3215_vm6, %v3212_v5 }
 0x81d   : > { %3235 = vst.msk [vmem:[%s3956_s18 + $0x10] sm:$0xff] %vm3233_vm8, %v3230_v24 }
 0x81e   : > { %3307 = vst.msk [vmem:[%s3956_s18 + $0x8] sm:$0xff] %vm3233_vm8, %v3302_v35 }
 0x821   : > { %v3247_v23 = vpop.permute.xlu1 %3246 }
 0x822   : > { %v3255_v38 = vpop.permute.xlu0 %3254  ;;  %3251 = vst.msk [vmem:[%s3956_s18 + $0x18] sm:$0xff] %vm3170_vm0, %v3247_v23 }
 0x823   : > { %3259 = vst.msk [vmem:[%s3956_s18 + $0x18] sm:$0xff] %vm3179_vm2, %v3255_v38 }
 0x824   : > { %3267 = vst.msk [vmem:[%s3956_s18 + $0x18] sm:$0xff] %vm3188_vm3, %v3263_v36 }
 0x829   : > { %v3271_v34 = vpop.permute.xlu1 %3270 }
 0x82a   : > { %v3279_v29 = vpop.permute.xlu0 %3278  ;;  %3275 = vst.msk [vmem:[%s3956_s18 + $0x18] sm:$0xff] %vm3197_vm4, %v3271_v34 }
 0x82b   : > { %3283 = vst.msk [vmem:[%s3956_s18 + $0x18] sm:$0xff] %vm3206_vm5, %v3279_v29 }
 0x831   : > { %v3293_v42 = vpop.permute.xlu1 %3292 }
 0x832   : > { %v3291_v31 = vpop.permute.xlu0 %3290 }
 0x833   : > { %v3296_v44 = vsel %vm3294_vm9, %v3291_v31, %v3293_v42 }
 0x834   : > { %3300 = vst.msk [vmem:[%s3956_s18 + $0x18] sm:$0xff] %vm3215_vm6, %v3296_v44 }
 0x83a   : > { %v3304_v39 = vpop.permute.xlu0 %3303 }
 0x83b   : > { %3308 = vst.msk [vmem:[%s3956_s18 + $0x18] sm:$0xff] %vm3233_vm8, %v3304_v39 }
 0x83c PF: > { %s27_s13 = sadd.s32 1, %s3853_s13  }
 0x83d   : > { %p24_p5 = scmp.ge.s32.totalorder %s27_s13, 4  }
 0x83f   :  { %26 = sbr.rel (!%p24_p5) target bundleno = 7 (0x7), region = 104 }

</bundles_post_ra>
